<compile_context>
chip_gen: v7x
topology: tpu7x:2x2x1
jax: 0.10.0
libtpu: 0.0.40
codegen_flags: <defaults>
</compile_context>

<pallas_src>
import jax
import jax.numpy as jnp
from jax import lax
from jax.experimental import pallas as pl
from jax.experimental.pallas import tpu as pltpu


# --------------------------- per-generation tuning knobs ---------------------------

def _tpu_vmem_capacity_bytes():
    cap = 64 * 1024 * 1024                       # conservative default (v7x per-TC)
    try:
        fn = getattr(pltpu, "get_tpu_info", None)
        if fn is not None:
            cap = int(getattr(fn(), "vmem_capacity_bytes", cap) or cap)
    except Exception:
        pass
    return cap


_VMEM_CAP = _tpu_vmem_capacity_bytes()
_BIG_VMEM = _VMEM_CAP >= 128 * 1024 * 1024       # v5e / v6e
VMEM_LIMIT = (100 if _BIG_VMEM else 48) * 1024 * 1024
MAX_M_TILE = 2048 if _BIG_VMEM else 512


def _silu(y):
    # exp + reciprocal go to the EUP slot; full-precision reciprocal (accuracy).
    return y * pl.reciprocal(1.0 + jnp.exp(-y))


# ------------------ fused split-K matmul + BN + SiLU (+ residual) ------------------

def _make_matmul_kernel(n_in, has_res):
    def kernel(*refs):
        xs = refs[:n_in]
        ws = refs[n_in:2 * n_in]
        scale_ref, bias_ref = refs[2 * n_in], refs[2 * n_in + 1]
        res_ref = refs[2 * n_in + 2] if has_res else None
        o_ref = refs[-1]
        acc = jnp.dot(xs[0][...], ws[0][...], preferred_element_type=jnp.float32)
        for i in range(1, n_in):
            acc = acc + jnp.dot(xs[i][...], ws[i][...],
                                preferred_element_type=jnp.float32)
        y = _silu(acc * scale_ref[...] + bias_ref[...])
        if has_res:
            y = y + res_ref[...].astype(jnp.float32)
        o_ref[...] = y.astype(o_ref.dtype)
    return kernel


def _pick_m_tile(m):
    """Largest tile <= MAX_M_TILE; prefer >=4 grid steps (megacore/pipelining)."""
    cands = [t for t in (2048, 1024, 512, 256, 128, 64, 32, 16) if t <= MAX_M_TILE]
    for t in cands:
        if m % t == 0 and m // t >= 4:
            return t
    for t in cands:
        if m % t == 0:
            return t
    return 0                                      # no divisor: caller pads the tail


def fused_matmul_bn_silu(xs, ws, scale, bias, residual=None):
    """silu((sum_i xs[i] @ ws[i]) * scale + bias) [+ residual], bf16 in / bf16 out.

    xs[i]: (M, K_i), ws[i]: (K_i, N), scale/bias: (1, N) f32.  Tiled over M
    ("parallel", >=4 steps when possible); weights/scale/bias are VMEM-resident via
    constant index_maps; f32 accumulation + f32 epilogue; bf16 stores.  Multiple
    xs/ws fuse channel-concats (C3.cv3, SPPF.cv2) without materializing them in HBM.
    """
    m = xs[0].shape[0]
    n_out = ws[0].shape[1]
    xs = [x.astype(jnp.bfloat16) for x in xs]            # no-op: already bf16
    if residual is not None:
        residual = residual.astype(jnp.bfloat16)

    tm = _pick_m_tile(m)
    m_pad = m
    if tm == 0:                                          # odd M: pad a masked tail
        tm = min(256, MAX_M_TILE)
        m_pad = pl.cdiv(m, tm) * tm
        xs = [jnp.pad(x, ((0, m_pad - m), (0, 0))) for x in xs]
        if residual is not None:
            residual = jnp.pad(residual, ((0, m_pad - m), (0, 0)))

    in_specs, args = [], []
    for x in xs:
        in_specs.append(pl.BlockSpec((tm, x.shape[1]), lambda i: (i, 0)))
        args.append(x)
    for w in ws:
        in_specs.append(pl.BlockSpec((w.shape[0], n_out), lambda i: (0, 0)))
        args.append(w.astype(jnp.bfloat16))
    in_specs += [pl.BlockSpec((1, n_out), lambda i: (0, 0)),
                 pl.BlockSpec((1, n_out), lambda i: (0, 0))]
    args += [scale, bias]
    if residual is not None:
        in_specs.append(pl.BlockSpec((tm, n_out), lambda i: (i, 0)))
        args.append(residual)

    k_total = sum(x.shape[1] for x in xs)
    cost = pl.CostEstimate(
        flops=2 * m_pad * n_out * k_total,
        transcendentals=m_pad * n_out,
        bytes_accessed=sum(int(a.size) * a.dtype.itemsize for a in args)
        + m_pad * n_out * 2)

    y = pl.pallas_call(
        _make_matmul_kernel(len(xs), residual is not None),
        out_shape=jax.ShapeDtypeStruct((m_pad, n_out), jnp.bfloat16),
        grid=(m_pad // tm,),
        in_specs=in_specs,
        out_specs=pl.BlockSpec((tm, n_out), lambda i: (i, 0)),
        compiler_params=pltpu.CompilerParams(
            dimension_semantics=("parallel",), vmem_limit_bytes=VMEM_LIMIT),
        cost_estimate=cost,
    )(*args)
    return y if m_pad == m else y[:m]


# ----------------- k>1 conv + BN + SiLU (+ residual), no HBM im2col -----------------

def _make_conv_kernel(k, s, r_blk, q, has_res):
    n_j = r_blk + q - 1                    # input row-block refs per column phase
    n_in = s * n_j

    def kernel(*refs):
        xs = refs[:n_in]
        w_ref = refs[n_in]                 # (k, k*Cin, Cout) bf16, VMEM-resident
        scale_ref, bias_ref = refs[n_in + 1], refs[n_in + 2]
        res_ref = refs[n_in + 3] if has_res else None
        o_ref = refs[-1]                   # (1, R, Wo, Cout) bf16

        c_in = w_ref.shape[1] // k
        wo = o_ref.shape[2]
        scale = scale_ref[...]
        bias = bias_ref[...]

        for r in range(r_blk):             # R output rows per grid step
            acc = None
            for dh in range(k):            # kh taps (in-kernel, weight stays put)
                qh, rw = dh // s, dh % s
                for dj in range(k):        # kw taps
                    cp, cc = dj % s, dj // s
                    xrow = xs[cp * n_j + r + qh][0, rw, cc:cc + wo, :]   # (Wo, Cin)
                    wtap = w_ref[dh, dj * c_in:(dj + 1) * c_in, :]       # (Cin, Cout)
                    d = jnp.dot(xrow, wtap, preferred_element_type=jnp.float32)
                    acc = d if acc is None else acc + d
            y = _silu(acc * scale + bias)
            if has_res:
                y = y + res_ref[0, r].astype(jnp.float32)
            o_ref[0, r] = y.astype(o_ref.dtype)
    return kernel


def conv_bn_silu(x, p, k, s, pad, residual=None):
    """Conv2d(k, stride=s, padding=pad, bias=False) + folded BN + SiLU.  x: NHWC bf16."""
    x = x.astype(jnp.bfloat16)                           # no-op in the normal path
    n, h, w_in, c = x.shape
    wgt = p["w"]                                          # (k, k, Cin, Cout) f32
    cout = wgt.shape[-1]

    if k == 1 and s == 1 and pad == 0:                    # pointwise -> tiled matmul
        res2d = None if residual is None else residual.reshape(n * h * w_in, cout)
        y = fused_matmul_bn_silu([x.reshape(n * h * w_in, c)],
                                 [wgt.reshape(c, cout)],
                                 p["scale"], p["bias"], residual=res2d)
        return y.reshape(n, h, w_in, cout)

    ho = (h + 2 * pad - k) // s + 1
    wo = (w_in + 2 * pad - k) // s + 1
    qm = (k - 1) // s
    q = qm + 1                                            # kh row-block span
    hp = (ho + qm) * s                                    # padded rows (mult of s)
    wp = (wo + qm) * s                                    # padded cols (mult of s)
    xp = jnp.pad(x, ((0, 0), (pad, hp - h - pad), (pad, wp - w_in - pad), (0, 0)))
    # Column stride phases: one input-sized copy total (never a k^2-sized im2col).
    phases = [xp[:, :, j::s, :] for j in range(s)] if s > 1 else [xp]
    wph = wp // s

    # R output rows per step (caps the in-kernel unroll R*k*k).
    r_blk = max(r for r in (4, 2, 1) if ho % r == 0 and r * k * k <= 80)
    n_j = r_blk + q - 1

    wk = wgt.reshape(k, k * c, cout).astype(jnp.bfloat16)

    in_specs, args = [], []
    for cp in range(s):
        for j in range(n_j):
            in_specs.append(pl.BlockSpec(
                (1, s, wph, c), lambda ni, rb, j=j: (ni, rb * r_blk + j, 0, 0)))
            args.append(phases[cp])
    # Full weight, constant index_map -> fetched once, VMEM-resident across the grid.
    in_specs.append(pl.BlockSpec((k, k * c, cout), lambda ni, rb: (0, 0, 0)))
    args.append(wk)
    in_specs += [pl.BlockSpec((1, cout), lambda ni, rb: (0, 0)),
                 pl.BlockSpec((1, cout), lambda ni, rb: (0, 0))]
    args += [p["scale"], p["bias"]]
    if residual is not None:
        in_specs.append(pl.BlockSpec((1, r_blk, wo, cout),
                                     lambda ni, rb: (ni, rb, 0, 0)))
        args.append(residual.astype(jnp.bfloat16))

    cost = pl.CostEstimate(
        flops=2 * n * ho * wo * cout * k * k * c,
        transcendentals=n * ho * wo * cout,
        bytes_accessed=int(xp.size) * 2 + int(wk.size) * 2 + n * ho * wo * cout * 2)

    return pl.pallas_call(
        _make_conv_kernel(k, s, r_blk, q, residual is not None),
        out_shape=jax.ShapeDtypeStruct((n, ho, wo, cout), jnp.bfloat16),
        grid=(n, ho // r_blk),
        in_specs=in_specs,
        out_specs=pl.BlockSpec((1, r_blk, wo, cout), lambda ni, rb: (ni, rb, 0, 0)),
        compiler_params=pltpu.CompilerParams(
            dimension_semantics=("parallel", "parallel"),
            vmem_limit_bytes=VMEM_LIMIT),
        cost_estimate=cost,
    )(*args)


# --------------------- SPPF: three chained 5x5 max-pools, fused ---------------------

def _sppf_pool_kernel(y1_ref, y2_ref, y3_ref, y4_ref, pad_ref):
    h, w = y1_ref.shape[1], y1_ref.shape[2]
    c = pad_ref.shape[-1]
    dt = pad_ref.dtype
    # -inf only on the four 2-wide border strips (interior is overwritten below).
    pad_ref[0:2, :, :] = jnp.full((2, w + 4, c), -jnp.inf, dt)
    pad_ref[h + 2:h + 4, :, :] = jnp.full((2, w + 4, c), -jnp.inf, dt)
    pad_ref[:, 0:2, :] = jnp.full((h + 4, 2, c), -jnp.inf, dt)
    pad_ref[:, w + 2:w + 4, :] = jnp.full((h + 4, 2, c), -jnp.inf, dt)
    pad_ref[2:h + 2, 2:w + 2, :] = y1_ref[0]
    outs = (y2_ref, y3_ref, y4_ref)
    for idx, out_ref in enumerate(outs):
        xp = pad_ref[...]
        t = xp[0:h, :, :]                       # separable pool: 5x1 over rows ...
        for dh in range(1, 5):
            t = jnp.maximum(t, xp[dh:dh + h, :, :])
        r = t[:, 0:w, :]                        # ... then 1x5 over columns
        for dw in range(1, 5):
            r = jnp.maximum(r, t[:, dw:dw + w, :])
        out_ref[0] = r
        if idx + 1 < len(outs):                 # chain into the next pool; skip last
            pad_ref[2:h + 2, 2:w + 2, :] = r


def sppf_pools(y1):
    """y2, y3, y4 = three chained MaxPool2d(5, stride=1, padding=2) of y1, one kernel."""
    n, h, w, c = y1.shape
    if c <= 128:
        tc = c
    elif c % 256 == 0:
        tc = 256
    elif c % 128 == 0:
        tc = 128
    else:
        tc = c
    sds = jax.ShapeDtypeStruct((n, h, w, c), y1.dtype)
    spec = pl.BlockSpec((1, h, w, tc), lambda ni, ci: (ni, 0, 0, ci))
    # TODO(synk): for very large H*W also tile spatially with a 6-pixel halo.
    return pl.pallas_call(
        _sppf_pool_kernel,
        out_shape=(sds, sds, sds),
        grid=(n, c // tc),
        in_specs=[spec],
        out_specs=(spec, spec, spec),
        scratch_shapes=[pltpu.VMEM((h + 4, w + 4, tc), y1.dtype)],
        compiler_params=pltpu.CompilerParams(
            dimension_semantics=("parallel", "parallel"),
            vmem_limit_bytes=VMEM_LIMIT),
    )(y1)


# ------------------------------- model building blocks ------------------------------

def bottleneck(x, p):
    # Bottleneck(hidden, hidden, shortcut=True, e=1.0): residual add fused into cv2.
    y = conv_bn_silu(x, p["cv1"], 1, 1, 0)
    return conv_bn_silu(y, p["cv2"], 3, 1, 1, residual=x)


def c3(x, p, n_bn):
    x1 = conv_bn_silu(x, p["seq_cv1"], 1, 1, 0)
    for i in range(n_bn):
        x1 = bottleneck(x1, p["bottlenecks"][i])
    x2 = conv_bn_silu(x, p["cv2"], 1, 1, 0)
    # cv3(concat([x1, x2])) fused as x1 @ w_top + x2 @ w_bottom (no HBM concat).
    n, h, w, hidden = x1.shape
    w3 = p["cv3"]["w"].reshape(2 * hidden, -1)
    cout = w3.shape[1]
    y = fused_matmul_bn_silu(
        [x1.reshape(-1, hidden), x2.reshape(-1, hidden)],
        [w3[:hidden], w3[hidden:]],
        p["cv3"]["scale"], p["cv3"]["bias"])
    return y.reshape(n, h, w, cout)


def sppf(x, p):
    y1 = conv_bn_silu(x, p["cv1"], 1, 1, 0)
    n, h, w, hidden = y1.shape
    y2, y3, y4 = sppf_pools(y1)
    # cv2(concat([y1..y4])) fused as four partial matmuls (no HBM concat).
    w2 = p["cv2"]["w"].reshape(4 * hidden, -1)
    cout = w2.shape[1]
    y = fused_matmul_bn_silu(
        [t.reshape(-1, hidden) for t in (y1, y2, y3, y4)],
        [w2[i * hidden:(i + 1) * hidden] for i in range(4)],
        p["cv2"]["scale"], p["cv2"]["bias"])
    return y.reshape(n, h, w, cout)


def backbone_forward_nhwc(x, params, config):
    _, n_conv, cache_block_idx = config
    x = x.astype(jnp.bfloat16)                    # single cast; bf16 thereafter
    features = []
    x = conv_bn_silu(x, params["stem"], 6, 2, 2)
    for i, nb in enumerate(n_conv):
        st = params["stages"][i]
        x = conv_bn_silu(x, st["down"], 3, 2, 1)
        x = c3(x, st["c3"], nb)
        if i in cache_block_idx:                  # Cache(): stash current feature map
            features.append(x)
    x = sppf(x, params["sppf"])
    features.append(x)
    return tuple(features)


def backbone_forward_nchw(x_nchw, params, config):
    x = jnp.transpose(x_nchw, (0, 2, 3, 1))       # NCHW -> NHWC
    feats = backbone_forward_nhwc(x, params, config)
    return tuple(jnp.transpose(f, (0, 3, 1, 2)) for f in feats)


# ----------------------------------- parameter init ---------------------------------

def _conv_params(key, cin, cout, k):
    kw_, kg, kb = jax.random.split(key, 3)
    fan_in = k * k * cin
    w = jax.random.normal(kw_, (k, k, cin, cout), jnp.float32) / jnp.sqrt(float(fan_in))
    gamma = 1.0 + 0.1 * jax.random.normal(kg, (cout,), jnp.float32)
    beta = 0.1 * jax.random.normal(kb, (cout,), jnp.float32)
    eps = 1e-5
    scale = (gamma / jnp.sqrt(1.0 + eps)).reshape(1, cout)   # BN folded (mean=0, var=1)
    bias = beta.reshape(1, cout)
    return {"w": w, "scale": scale, "bias": bias}


def init_backbone_params(key, in_ch, config):
    out_ch, n_conv, _ = config
    keys = iter(jax.random.split(key, 256))
    params = {"stem": _conv_params(next(keys), in_ch, out_ch, 6)}
    cin = out_ch
    stages = []
    for n in n_conv:
        cout = cin * 2
        hidden = cout // 2
        st = {
            "down": _conv_params(next(keys), cin, cout, 3),
            "c3": {
                "seq_cv1": _conv_params(next(keys), cout, hidden, 1),
                "bottlenecks": [
                    {"cv1": _conv_params(next(keys), hidden, hidden, 1),
                     "cv2": _conv_params(next(keys), hidden, hidden, 3)}
                    for _ in range(n)
                ],
                "cv2": _conv_params(next(keys), cout, hidden, 1),
                "cv3": _conv_params(next(keys), 2 * hidden, cout, 1),
            },
        }
        stages.append(st)
        cin = cout
    params["stages"] = stages
    hidden = cin // 2
    params["sppf"] = {
        "cv1": _conv_params(next(keys), cin, hidden, 1),
        "cv2": _conv_params(next(keys), 4 * hidden, cin, 1),
    }
    return params


# ----------------------------------------- main --------------------------------------

if __name__ == "__main__":
    # Small backbone_config (same structure as darknet_config = (64, (3,6,9,3), (1,2)))
    config = (16, (1, 2), (0, 1))     # base channels 16, two stages, cache after both C3s
    key = jax.random.PRNGKey(0)
    pkey, xkey = jax.random.split(key)

    params = init_backbone_params(pkey, in_ch=3, config=config)
    x = jax.random.normal(xkey, (2, 3, 32, 32), jnp.float32)   # NCHW like PyTorch

    # ---- correctness checks: conv kernels vs lax.conv (bf16 operands, f32 ref) ----
    def conv_ref(xb, p, k, s, pad):
        xf = xb.astype(jnp.float32)
        wf = p["w"].astype(jnp.bfloat16).astype(jnp.float32)
        y = lax.conv_general_dilated(xf, wf, (s, s), ((pad, pad), (pad, pad)),
                                     dimension_numbers=("NHWC", "HWIO", "NHWC"))
        y = y * p["scale"][0] + p["bias"][0]
        return y * jax.nn.sigmoid(y)

    x_nhwc = jnp.transpose(x, (0, 2, 3, 1)).astype(jnp.bfloat16)
    got = conv_bn_silu(x_nhwc, params["stem"], 6, 2, 2).astype(jnp.float32)
    err = float(jnp.max(jnp.abs(got - conv_ref(x_nhwc, params["stem"], 6, 2, 2))))
    assert err < 1e-1, f"stem 6x6/s2 conv mismatch: {err}"

    xc = jax.random.normal(jax.random.PRNGKey(2), (2, 8, 8, 32),
                           jnp.float32).astype(jnp.bfloat16)
    p3 = _conv_params(jax.random.PRNGKey(3), 32, 32, 3)
    got = conv_bn_silu(xc, p3, 3, 1, 1).astype(jnp.float32)
    err = float(jnp.max(jnp.abs(got - conv_ref(xc, p3, 3, 1, 1))))
    assert err < 1e-1, f"3x3/s1 conv mismatch: {err}"

    p3s = _conv_params(jax.random.PRNGKey(4), 32, 64, 3)
    got = conv_bn_silu(xc, p3s, 3, 2, 1).astype(jnp.float32)
    err = float(jnp.max(jnp.abs(got - conv_ref(xc, p3s, 3, 2, 1))))
    assert err < 1e-1, f"3x3/s2 conv mismatch: {err}"

    # ---- correctness check: fused SPPF pool chain (exact max on bf16 values) ----
    yp = jax.random.normal(jax.random.PRNGKey(1), (2, 4, 4, 32),
                           jnp.float32).astype(jnp.bfloat16)
    p2, _, p4 = sppf_pools(yp)

    def _pool_ref(v):
        return lax.reduce_window(v, jnp.array(-jnp.inf, jnp.float32), lax.max,
                                 (1, 5, 5, 1), (1, 1, 1, 1),
                                 ((0, 0), (2, 2), (2, 2), (0, 0)))

    ypf = yp.astype(jnp.float32)
    r2 = _pool_ref(ypf)
    r4 = _pool_ref(_pool_ref(r2))
    assert float(jnp.max(jnp.abs(p2.astype(jnp.float32) - r2))) < 1e-6
    assert float(jnp.max(jnp.abs(p4.astype(jnp.float32) - r4))) < 1e-6

    # ---- full backbone forward ----
    fwd = jax.jit(lambda inp: backbone_forward_nchw(inp, params, config))
    feats = jax.block_until_ready(fwd(x))

    expected = [(2, 32, 8, 8), (2, 64, 4, 4), (2, 64, 4, 4)]
    assert [tuple(f.shape) for f in feats] == expected, [f.shape for f in feats]
    assert all(bool(jnp.isfinite(f.astype(jnp.float32)).all()) for f in feats)
    print("KERNEL_OK")
</pallas_src>

<mosaic_0001>
module attributes {stable_mosaic.version = 11 : i64} {
  func.func @kernel(%arg0: i32, %arg1: i32, %arg2: memref<1x2x18x3xbf16, #tpu.memory_space<vmem>>, %arg3: memref<1x2x18x3xbf16, #tpu.memory_space<vmem>>, %arg4: memref<1x2x18x3xbf16, #tpu.memory_space<vmem>>, %arg5: memref<1x2x18x3xbf16, #tpu.memory_space<vmem>>, %arg6: memref<1x2x18x3xbf16, #tpu.memory_space<vmem>>, %arg7: memref<1x2x18x3xbf16, #tpu.memory_space<vmem>>, %arg8: memref<1x2x18x3xbf16, #tpu.memory_space<vmem>>, %arg9: memref<1x2x18x3xbf16, #tpu.memory_space<vmem>>, %arg10: memref<6x18x16xbf16, #tpu.memory_space<vmem>>, %arg11: memref<1x16xf32, #tpu.memory_space<vmem>>, %arg12: memref<1x16xf32, #tpu.memory_space<vmem>>, %arg13: memref<1x2x16x16xbf16, #tpu.memory_space<vmem>>) attributes {dimension_semantics = [#tpu.dimension_semantics<parallel>, #tpu.dimension_semantics<parallel>], iteration_bounds = array<i64: 2, 8>, scalar_prefetch = 0 : i64, scratch_operands = 0 : i64, tpu.core_type = #tpu.core_type<tc>, window_params = [{transform_indices = @transform_0, window_bounds = array<i64: 1, 2, 18, 3>}, {transform_indices = @transform_1, window_bounds = array<i64: 1, 2, 18, 3>}, {transform_indices = @transform_2, window_bounds = array<i64: 1, 2, 18, 3>}, {transform_indices = @transform_3, window_bounds = array<i64: 1, 2, 18, 3>}, {transform_indices = @transform_4, window_bounds = array<i64: 1, 2, 18, 3>}, {transform_indices = @transform_5, window_bounds = array<i64: 1, 2, 18, 3>}, {transform_indices = @transform_6, window_bounds = array<i64: 1, 2, 18, 3>}, {transform_indices = @transform_7, window_bounds = array<i64: 1, 2, 18, 3>}, {pipeline_mode = #tpu.pipeline_mode<synchronous>, transform_indices = @transform_8, window_bounds = array<i64: 6, 18, 16>}, {pipeline_mode = #tpu.pipeline_mode<synchronous>, transform_indices = @transform_9, window_bounds = array<i64: 1, 16>}, {pipeline_mode = #tpu.pipeline_mode<synchronous>, transform_indices = @transform_10, window_bounds = array<i64: 1, 16>}, {transform_indices = @transform_11, window_bounds = array<i64: 1, 2, 16, 16>}]} {
    %c0 = arith.constant 0 : index
    %c0_0 = arith.constant 0 : index
    %0 = vector.load %arg11[%c0, %c0_0] : memref<1x16xf32, #tpu.memory_space<vmem>>, vector<1x16xf32>
    %c0_1 = arith.constant 0 : index
    %c0_2 = arith.constant 0 : index
    %1 = vector.load %arg12[%c0_1, %c0_2] : memref<1x16xf32, #tpu.memory_space<vmem>>, vector<1x16xf32>
    %c0_3 = arith.constant 0 : index
    %c0_4 = arith.constant 0 : index
    %c0_5 = arith.constant 0 : index
    %c0_6 = arith.constant 0 : index
    %2 = vector.load %arg2[%c0_3, %c0_4, %c0_5, %c0_6] : memref<1x2x18x3xbf16, #tpu.memory_space<vmem>>, vector<1x1x16x3xbf16>
    %3 = vector.shape_cast %2 : vector<1x1x16x3xbf16> to vector<16x3xbf16>
    %c0_7 = arith.constant 0 : index
    %c0_8 = arith.constant 0 : index
    %c0_9 = arith.constant 0 : index
    %4 = vector.load %arg10[%c0_7, %c0_8, %c0_9] : memref<6x18x16xbf16, #tpu.memory_space<vmem>>, vector<1x3x16xbf16>
    %5 = vector.shape_cast %4 : vector<1x3x16xbf16> to vector<3x16xbf16>
    %cst = arith.constant dense<0.000000e+00> : vector<16x16xf32>
    %6 = tpu.matmul %3, %5, %cst {dimension_numbers = #tpu.dot_dimension_numbers<[1], [0], [0], [1], [0, 0, 1, 1], [], []>} : vector<16x3xbf16>, vector<3x16xbf16>, vector<16x16xf32> -> vector<16x16xf32>
    %c0_10 = arith.constant 0 : index
    %c0_11 = arith.constant 0 : index
    %c0_12 = arith.constant 0 : index
    %c0_13 = arith.constant 0 : index
    %7 = vector.load %arg6[%c0_10, %c0_11, %c0_12, %c0_13] : memref<1x2x18x3xbf16, #tpu.memory_space<vmem>>, vector<1x1x16x3xbf16>
    %8 = vector.shape_cast %7 : vector<1x1x16x3xbf16> to vector<16x3xbf16>
    %c0_14 = arith.constant 0 : index
    %c3 = arith.constant 3 : index
    %c0_15 = arith.constant 0 : index
    %9 = vector.load %arg10[%c0_14, %c3, %c0_15] : memref<6x18x16xbf16, #tpu.memory_space<vmem>>, vector<1x3x16xbf16>
    %10 = vector.shape_cast %9 : vector<1x3x16xbf16> to vector<3x16xbf16>
    %cst_16 = arith.constant dense<0.000000e+00> : vector<16x16xf32>
    %11 = tpu.matmul %8, %10, %cst_16 {dimension_numbers = #tpu.dot_dimension_numbers<[1], [0], [0], [1], [0, 0, 1, 1], [], []>} : vector<16x3xbf16>, vector<3x16xbf16>, vector<16x16xf32> -> vector<16x16xf32>
    %12 = arith.addf %6, %11 : vector<16x16xf32>
    %c0_17 = arith.constant 0 : index
    %c0_18 = arith.constant 0 : index
    %c1 = arith.constant 1 : index
    %c0_19 = arith.constant 0 : index
    %13 = vector.load %arg2[%c0_17, %c0_18, %c1, %c0_19] : memref<1x2x18x3xbf16, #tpu.memory_space<vmem>>, vector<1x1x16x3xbf16>
    %14 = vector.shape_cast %13 : vector<1x1x16x3xbf16> to vector<16x3xbf16>
    %c0_20 = arith.constant 0 : index
    %c6 = arith.constant 6 : index
    %c0_21 = arith.constant 0 : index
    %15 = vector.load %arg10[%c0_20, %c6, %c0_21] : memref<6x18x16xbf16, #tpu.memory_space<vmem>>, vector<1x3x16xbf16>
    %16 = vector.shape_cast %15 : vector<1x3x16xbf16> to vector<3x16xbf16>
    %cst_22 = arith.constant dense<0.000000e+00> : vector<16x16xf32>
    %17 = tpu.matmul %14, %16, %cst_22 {dimension_numbers = #tpu.dot_dimension_numbers<[1], [0], [0], [1], [0, 0, 1, 1], [], []>} : vector<16x3xbf16>, vector<3x16xbf16>, vector<16x16xf32> -> vector<16x16xf32>
    %18 = arith.addf %12, %17 : vector<16x16xf32>
    %c0_23 = arith.constant 0 : index
    %c0_24 = arith.constant 0 : index
    %c1_25 = arith.constant 1 : index
    %c0_26 = arith.constant 0 : index
    %19 = vector.load %arg6[%c0_23, %c0_24, %c1_25, %c0_26] : memref<1x2x18x3xbf16, #tpu.memory_space<vmem>>, vector<1x1x16x3xbf16>
    %20 = vector.shape_cast %19 : vector<1x1x16x3xbf16> to vector<16x3xbf16>
    %c0_27 = arith.constant 0 : index
    %c9 = arith.constant 9 : index
    %c0_28 = arith.constant 0 : index
    %21 = vector.load %arg10[%c0_27, %c9, %c0_28] : memref<6x18x16xbf16, #tpu.memory_space<vmem>>, vector<1x3x16xbf16>
    %22 = vector.shape_cast %21 : vector<1x3x16xbf16> to vector<3x16xbf16>
    %cst_29 = arith.constant dense<0.000000e+00> : vector<16x16xf32>
    %23 = tpu.matmul %20, %22, %cst_29 {dimension_numbers = #tpu.dot_dimension_numbers<[1], [0], [0], [1], [0, 0, 1, 1], [], []>} : vector<16x3xbf16>, vector<3x16xbf16>, vector<16x16xf32> -> vector<16x16xf32>
    %24 = arith.addf %18, %23 : vector<16x16xf32>
    %c0_30 = arith.constant 0 : index
    %c0_31 = arith.constant 0 : index
    %c2 = arith.constant 2 : index
    %c0_32 = arith.constant 0 : index
    %25 = vector.load %arg2[%c0_30, %c0_31, %c2, %c0_32] : memref<1x2x18x3xbf16, #tpu.memory_space<vmem>>, vector<1x1x16x3xbf16>
    %26 = vector.shape_cast %25 : vector<1x1x16x3xbf16> to vector<16x3xbf16>
    %c0_33 = arith.constant 0 : index
    %c12 = arith.constant 12 : index
    %c0_34 = arith.constant 0 : index
    %27 = vector.load %arg10[%c0_33, %c12, %c0_34] : memref<6x18x16xbf16, #tpu.memory_space<vmem>>, vector<1x3x16xbf16>
    %28 = vector.shape_cast %27 : vector<1x3x16xbf16> to vector<3x16xbf16>
    %cst_35 = arith.constant dense<0.000000e+00> : vector<16x16xf32>
    %29 = tpu.matmul %26, %28, %cst_35 {dimension_numbers = #tpu.dot_dimension_numbers<[1], [0], [0], [1], [0, 0, 1, 1], [], []>} : vector<16x3xbf16>, vector<3x16xbf16>, vector<16x16xf32> -> vector<16x16xf32>
    %30 = arith.addf %24, %29 : vector<16x16xf32>
    %c0_36 = arith.constant 0 : index
    %c0_37 = arith.constant 0 : index
    %c2_38 = arith.constant 2 : index
    %c0_39 = arith.constant 0 : index
    %31 = vector.load %arg6[%c0_36, %c0_37, %c2_38, %c0_39] : memref<1x2x18x3xbf16, #tpu.memory_space<vmem>>, vector<1x1x16x3xbf16>
    %32 = vector.shape_cast %31 : vector<1x1x16x3xbf16> to vector<16x3xbf16>
    %c0_40 = arith.constant 0 : index
    %c15 = arith.constant 15 : index
    %c0_41 = arith.constant 0 : index
    %33 = vector.load %arg10[%c0_40, %c15, %c0_41] : memref<6x18x16xbf16, #tpu.memory_space<vmem>>, vector<1x3x16xbf16>
    %34 = vector.shape_cast %33 : vector<1x3x16xbf16> to vector<3x16xbf16>
    %cst_42 = arith.constant dense<0.000000e+00> : vector<16x16xf32>
    %35 = tpu.matmul %32, %34, %cst_42 {dimension_numbers = #tpu.dot_dimension_numbers<[1], [0], [0], [1], [0, 0, 1, 1], [], []>} : vector<16x3xbf16>, vector<3x16xbf16>, vector<16x16xf32> -> vector<16x16xf32>
    %36 = arith.addf %30, %35 : vector<16x16xf32>
    %c0_43 = arith.constant 0 : index
    %c1_44 = arith.constant 1 : index
    %c0_45 = arith.constant 0 : index
    %c0_46 = arith.constant 0 : index
    %37 = vector.load %arg2[%c0_43, %c1_44, %c0_45, %c0_46] : memref<1x2x18x3xbf16, #tpu.memory_space<vmem>>, vector<1x1x16x3xbf16>
    %38 = vector.shape_cast %37 : vector<1x1x16x3xbf16> to vector<16x3xbf16>
    %c1_47 = arith.constant 1 : index
    %c0_48 = arith.constant 0 : index
    %c0_49 = arith.constant 0 : index
    %39 = vector.load %arg10[%c1_47, %c0_48, %c0_49] : memref<6x18x16xbf16, #tpu.memory_space<vmem>>, vector<1x3x16xbf16>
    %40 = vector.shape_cast %39 : vector<1x3x16xbf16> to vector<3x16xbf16>
    %cst_50 = arith.constant dense<0.000000e+00> : vector<16x16xf32>
    %41 = tpu.matmul %38, %40, %cst_50 {dimension_numbers = #tpu.dot_dimension_numbers<[1], [0], [0], [1], [0, 0, 1, 1], [], []>} : vector<16x3xbf16>, vector<3x16xbf16>, vector<16x16xf32> -> vector<16x16xf32>
    %42 = arith.addf %36, %41 : vector<16x16xf32>
    %c0_51 = arith.constant 0 : index
    %c1_52 = arith.constant 1 : index
    %c0_53 = arith.constant 0 : index
    %c0_54 = arith.constant 0 : index
    %43 = vector.load %arg6[%c0_51, %c1_52, %c0_53, %c0_54] : memref<1x2x18x3xbf16, #tpu.memory_space<vmem>>, vector<1x1x16x3xbf16>
    %44 = vector.shape_cast %43 : vector<1x1x16x3xbf16> to vector<16x3xbf16>
    %c1_55 = arith.constant 1 : index
    %c3_56 = arith.constant 3 : index
    %c0_57 = arith.constant 0 : index
    %45 = vector.load %arg10[%c1_55, %c3_56, %c0_57] : memref<6x18x16xbf16, #tpu.memory_space<vmem>>, vector<1x3x16xbf16>
    %46 = vector.shape_cast %45 : vector<1x3x16xbf16> to vector<3x16xbf16>
    %cst_58 = arith.constant dense<0.000000e+00> : vector<16x16xf32>
    %47 = tpu.matmul %44, %46, %cst_58 {dimension_numbers = #tpu.dot_dimension_numbers<[1], [0], [0], [1], [0, 0, 1, 1], [], []>} : vector<16x3xbf16>, vector<3x16xbf16>, vector<16x16xf32> -> vector<16x16xf32>
    %48 = arith.addf %42, %47 : vector<16x16xf32>
    %c0_59 = arith.constant 0 : index
    %c1_60 = arith.constant 1 : index
    %c1_61 = arith.constant 1 : index
    %c0_62 = arith.constant 0 : index
    %49 = vector.load %arg2[%c0_59, %c1_60, %c1_61, %c0_62] : memref<1x2x18x3xbf16, #tpu.memory_space<vmem>>, vector<1x1x16x3xbf16>
    %50 = vector.shape_cast %49 : vector<1x1x16x3xbf16> to vector<16x3xbf16>
    %c1_63 = arith.constant 1 : index
    %c6_64 = arith.constant 6 : index
    %c0_65 = arith.constant 0 : index
    %51 = vector.load %arg10[%c1_63, %c6_64, %c0_65] : memref<6x18x16xbf16, #tpu.memory_space<vmem>>, vector<1x3x16xbf16>
    %52 = vector.shape_cast %51 : vector<1x3x16xbf16> to vector<3x16xbf16>
    %cst_66 = arith.constant dense<0.000000e+00> : vector<16x16xf32>
    %53 = tpu.matmul %50, %52, %cst_66 {dimension_numbers = #tpu.dot_dimension_numbers<[1], [0], [0], [1], [0, 0, 1, 1], [], []>} : vector<16x3xbf16>, vector<3x16xbf16>, vector<16x16xf32> -> vector<16x16xf32>
    %54 = arith.addf %48, %53 : vector<16x16xf32>
    %c0_67 = arith.constant 0 : index
    %c1_68 = arith.constant 1 : index
    %c1_69 = arith.constant 1 : index
    %c0_70 = arith.constant 0 : index
    %55 = vector.load %arg6[%c0_67, %c1_68, %c1_69, %c0_70] : memref<1x2x18x3xbf16, #tpu.memory_space<vmem>>, vector<1x1x16x3xbf16>
    %56 = vector.shape_cast %55 : vector<1x1x16x3xbf16> to vector<16x3xbf16>
    %c1_71 = arith.constant 1 : index
    %c9_72 = arith.constant 9 : index
    %c0_73 = arith.constant 0 : index
    %57 = vector.load %arg10[%c1_71, %c9_72, %c0_73] : memref<6x18x16xbf16, #tpu.memory_space<vmem>>, vector<1x3x16xbf16>
    %58 = vector.shape_cast %57 : vector<1x3x16xbf16> to vector<3x16xbf16>
    %cst_74 = arith.constant dense<0.000000e+00> : vector<16x16xf32>
    %59 = tpu.matmul %56, %58, %cst_74 {dimension_numbers = #tpu.dot_dimension_numbers<[1], [0], [0], [1], [0, 0, 1, 1], [], []>} : vector<16x3xbf16>, vector<3x16xbf16>, vector<16x16xf32> -> vector<16x16xf32>
    %60 = arith.addf %54, %59 : vector<16x16xf32>
    %c0_75 = arith.constant 0 : index
    %c1_76 = arith.constant 1 : index
    %c2_77 = arith.constant 2 : index
    %c0_78 = arith.constant 0 : index
    %61 = vector.load %arg2[%c0_75, %c1_76, %c2_77, %c0_78] : memref<1x2x18x3xbf16, #tpu.memory_space<vmem>>, vector<1x1x16x3xbf16>
    %62 = vector.shape_cast %61 : vector<1x1x16x3xbf16> to vector<16x3xbf16>
    %c1_79 = arith.constant 1 : index
    %c12_80 = arith.constant 12 : index
    %c0_81 = arith.constant 0 : index
    %63 = vector.load %arg10[%c1_79, %c12_80, %c0_81] : memref<6x18x16xbf16, #tpu.memory_space<vmem>>, vector<1x3x16xbf16>
    %64 = vector.shape_cast %63 : vector<1x3x16xbf16> to vector<3x16xbf16>
    %cst_82 = arith.constant dense<0.000000e+00> : vector<16x16xf32>
    %65 = tpu.matmul %62, %64, %cst_82 {dimension_numbers = #tpu.dot_dimension_numbers<[1], [0], [0], [1], [0, 0, 1, 1], [], []>} : vector<16x3xbf16>, vector<3x16xbf16>, vector<16x16xf32> -> vector<16x16xf32>
    %66 = arith.addf %60, %65 : vector<16x16xf32>
    %c0_83 = arith.constant 0 : index
    %c1_84 = arith.constant 1 : index
    %c2_85 = arith.constant 2 : index
    %c0_86 = arith.constant 0 : index
    %67 = vector.load %arg6[%c0_83, %c1_84, %c2_85, %c0_86] : memref<1x2x18x3xbf16, #tpu.memory_space<vmem>>, vector<1x1x16x3xbf16>
    %68 = vector.shape_cast %67 : vector<1x1x16x3xbf16> to vector<16x3xbf16>
    %c1_87 = arith.constant 1 : index
    %c15_88 = arith.constant 15 : index
    %c0_89 = arith.constant 0 : index
    %69 = vector.load %arg10[%c1_87, %c15_88, %c0_89] : memref<6x18x16xbf16, #tpu.memory_space<vmem>>, vector<1x3x16xbf16>
    %70 = vector.shape_cast %69 : vector<1x3x16xbf16> to vector<3x16xbf16>
    %cst_90 = arith.constant dense<0.000000e+00> : vector<16x16xf32>
    %71 = tpu.matmul %68, %70, %cst_90 {dimension_numbers = #tpu.dot_dimension_numbers<[1], [0], [0], [1], [0, 0, 1, 1], [], []>} : vector<16x3xbf16>, vector<3x16xbf16>, vector<16x16xf32> -> vector<16x16xf32>
    %72 = arith.addf %66, %71 : vector<16x16xf32>
    %c0_91 = arith.constant 0 : index
    %c0_92 = arith.constant 0 : index
    %c0_93 = arith.constant 0 : index
    %c0_94 = arith.constant 0 : index
    %73 = vector.load %arg3[%c0_91, %c0_92, %c0_93, %c0_94] : memref<1x2x18x3xbf16, #tpu.memory_space<vmem>>, vector<1x1x16x3xbf16>
    %74 = vector.shape_cast %73 : vector<1x1x16x3xbf16> to vector<16x3xbf16>
    %c2_95 = arith.constant 2 : index
    %c0_96 = arith.constant 0 : index
    %c0_97 = arith.constant 0 : index
    %75 = vector.load %arg10[%c2_95, %c0_96, %c0_97] : memref<6x18x16xbf16, #tpu.memory_space<vmem>>, vector<1x3x16xbf16>
    %76 = vector.shape_cast %75 : vector<1x3x16xbf16> to vector<3x16xbf16>
    %cst_98 = arith.constant dense<0.000000e+00> : vector<16x16xf32>
    %77 = tpu.matmul %74, %76, %cst_98 {dimension_numbers = #tpu.dot_dimension_numbers<[1], [0], [0], [1], [0, 0, 1, 1], [], []>} : vector<16x3xbf16>, vector<3x16xbf16>, vector<16x16xf32> -> vector<16x16xf32>
    %78 = arith.addf %72, %77 : vector<16x16xf32>
    %c0_99 = arith.constant 0 : index
    %c0_100 = arith.constant 0 : index
    %c0_101 = arith.constant 0 : index
    %c0_102 = arith.constant 0 : index
    %79 = vector.load %arg7[%c0_99, %c0_100, %c0_101, %c0_102] : memref<1x2x18x3xbf16, #tpu.memory_space<vmem>>, vector<1x1x16x3xbf16>
    %80 = vector.shape_cast %79 : vector<1x1x16x3xbf16> to vector<16x3xbf16>
    %c2_103 = arith.constant 2 : index
    %c3_104 = arith.constant 3 : index
    %c0_105 = arith.constant 0 : index
    %81 = vector.load %arg10[%c2_103, %c3_104, %c0_105] : memref<6x18x16xbf16, #tpu.memory_space<vmem>>, vector<1x3x16xbf16>
    %82 = vector.shape_cast %81 : vector<1x3x16xbf16> to vector<3x16xbf16>
    %cst_106 = arith.constant dense<0.000000e+00> : vector<16x16xf32>
    %83 = tpu.matmul %80, %82, %cst_106 {dimension_numbers = #tpu.dot_dimension_numbers<[1], [0], [0], [1], [0, 0, 1, 1], [], []>} : vector<16x3xbf16>, vector<3x16xbf16>, vector<16x16xf32> -> vector<16x16xf32>
    %84 = arith.addf %78, %83 : vector<16x16xf32>
    %c0_107 = arith.constant 0 : index
    %c0_108 = arith.constant 0 : index
    %c1_109 = arith.constant 1 : index
    %c0_110 = arith.constant 0 : index
    %85 = vector.load %arg3[%c0_107, %c0_108, %c1_109, %c0_110] : memref<1x2x18x3xbf16, #tpu.memory_space<vmem>>, vector<1x1x16x3xbf16>
    %86 = vector.shape_cast %85 : vector<1x1x16x3xbf16> to vector<16x3xbf16>
    %c2_111 = arith.constant 2 : index
    %c6_112 = arith.constant 6 : index
    %c0_113 = arith.constant 0 : index
    %87 = vector.load %arg10[%c2_111, %c6_112, %c0_113] : memref<6x18x16xbf16, #tpu.memory_space<vmem>>, vector<1x3x16xbf16>
    %88 = vector.shape_cast %87 : vector<1x3x16xbf16> to vector<3x16xbf16>
    %cst_114 = arith.constant dense<0.000000e+00> : vector<16x16xf32>
    %89 = tpu.matmul %86, %88, %cst_114 {dimension_numbers = #tpu.dot_dimension_numbers<[1], [0], [0], [1], [0, 0, 1, 1], [], []>} : vector<16x3xbf16>, vector<3x16xbf16>, vector<16x16xf32> -> vector<16x16xf32>
    %90 = arith.addf %84, %89 : vector<16x16xf32>
    %c0_115 = arith.constant 0 : index
    %c0_116 = arith.constant 0 : index
    %c1_117 = arith.constant 1 : index
    %c0_118 = arith.constant 0 : index
    %91 = vector.load %arg7[%c0_115, %c0_116, %c1_117, %c0_118] : memref<1x2x18x3xbf16, #tpu.memory_space<vmem>>, vector<1x1x16x3xbf16>
    %92 = vector.shape_cast %91 : vector<1x1x16x3xbf16> to vector<16x3xbf16>
    %c2_119 = arith.constant 2 : index
    %c9_120 = arith.constant 9 : index
    %c0_121 = arith.constant 0 : index
    %93 = vector.load %arg10[%c2_119, %c9_120, %c0_121] : memref<6x18x16xbf16, #tpu.memory_space<vmem>>, vector<1x3x16xbf16>
    %94 = vector.shape_cast %93 : vector<1x3x16xbf16> to vector<3x16xbf16>
    %cst_122 = arith.constant dense<0.000000e+00> : vector<16x16xf32>
    %95 = tpu.matmul %92, %94, %cst_122 {dimension_numbers = #tpu.dot_dimension_numbers<[1], [0], [0], [1], [0, 0, 1, 1], [], []>} : vector<16x3xbf16>, vector<3x16xbf16>, vector<16x16xf32> -> vector<16x16xf32>
    %96 = arith.addf %90, %95 : vector<16x16xf32>
    %c0_123 = arith.constant 0 : index
    %c0_124 = arith.constant 0 : index
    %c2_125 = arith.constant 2 : index
    %c0_126 = arith.constant 0 : index
    %97 = vector.load %arg3[%c0_123, %c0_124, %c2_125, %c0_126] : memref<1x2x18x3xbf16, #tpu.memory_space<vmem>>, vector<1x1x16x3xbf16>
    %98 = vector.shape_cast %97 : vector<1x1x16x3xbf16> to vector<16x3xbf16>
    %c2_127 = arith.constant 2 : index
    %c12_128 = arith.constant 12 : index
    %c0_129 = arith.constant 0 : index
    %99 = vector.load %arg10[%c2_127, %c12_128, %c0_129] : memref<6x18x16xbf16, #tpu.memory_space<vmem>>, vector<1x3x16xbf16>
    %100 = vector.shape_cast %99 : vector<1x3x16xbf16> to vector<3x16xbf16>
    %cst_130 = arith.constant dense<0.000000e+00> : vector<16x16xf32>
    %101 = tpu.matmul %98, %100, %cst_130 {dimension_numbers = #tpu.dot_dimension_numbers<[1], [0], [0], [1], [0, 0, 1, 1], [], []>} : vector<16x3xbf16>, vector<3x16xbf16>, vector<16x16xf32> -> vector<16x16xf32>
    %102 = arith.addf %96, %101 : vector<16x16xf32>
    %c0_131 = arith.constant 0 : index
    %c0_132 = arith.constant 0 : index
    %c2_133 = arith.constant 2 : index
    %c0_134 = arith.constant 0 : index
    %103 = vector.load %arg7[%c0_131, %c0_132, %c2_133, %c0_134] : memref<1x2x18x3xbf16, #tpu.memory_space<vmem>>, vector<1x1x16x3xbf16>
    %104 = vector.shape_cast %103 : vector<1x1x16x3xbf16> to vector<16x3xbf16>
    %c2_135 = arith.constant 2 : index
    %c15_136 = arith.constant 15 : index
    %c0_137 = arith.constant 0 : index
    %105 = vector.load %arg10[%c2_135, %c15_136, %c0_137] : memref<6x18x16xbf16, #tpu.memory_space<vmem>>, vector<1x3x16xbf16>
    %106 = vector.shape_cast %105 : vector<1x3x16xbf16> to vector<3x16xbf16>
    %cst_138 = arith.constant dense<0.000000e+00> : vector<16x16xf32>
    %107 = tpu.matmul %104, %106, %cst_138 {dimension_numbers = #tpu.dot_dimension_numbers<[1], [0], [0], [1], [0, 0, 1, 1], [], []>} : vector<16x3xbf16>, vector<3x16xbf16>, vector<16x16xf32> -> vector<16x16xf32>
    %108 = arith.addf %102, %107 : vector<16x16xf32>
    %c0_139 = arith.constant 0 : index
    %c1_140 = arith.constant 1 : index
    %c0_141 = arith.constant 0 : index
    %c0_142 = arith.constant 0 : index
    %109 = vector.load %arg3[%c0_139, %c1_140, %c0_141, %c0_142] : memref<1x2x18x3xbf16, #tpu.memory_space<vmem>>, vector<1x1x16x3xbf16>
    %110 = vector.shape_cast %109 : vector<1x1x16x3xbf16> to vector<16x3xbf16>
    %c3_143 = arith.constant 3 : index
    %c0_144 = arith.constant 0 : index
    %c0_145 = arith.constant 0 : index
    %111 = vector.load %arg10[%c3_143, %c0_144, %c0_145] : memref<6x18x16xbf16, #tpu.memory_space<vmem>>, vector<1x3x16xbf16>
    %112 = vector.shape_cast %111 : vector<1x3x16xbf16> to vector<3x16xbf16>
    %cst_146 = arith.constant dense<0.000000e+00> : vector<16x16xf32>
    %113 = tpu.matmul %110, %112, %cst_146 {dimension_numbers = #tpu.dot_dimension_numbers<[1], [0], [0], [1], [0, 0, 1, 1], [], []>} : vector<16x3xbf16>, vector<3x16xbf16>, vector<16x16xf32> -> vector<16x16xf32>
    %114 = arith.addf %108, %113 : vector<16x16xf32>
    %c0_147 = arith.constant 0 : index
    %c1_148 = arith.constant 1 : index
    %c0_149 = arith.constant 0 : index
    %c0_150 = arith.constant 0 : index
    %115 = vector.load %arg7[%c0_147, %c1_148, %c0_149, %c0_150] : memref<1x2x18x3xbf16, #tpu.memory_space<vmem>>, vector<1x1x16x3xbf16>
    %116 = vector.shape_cast %115 : vector<1x1x16x3xbf16> to vector<16x3xbf16>
    %c3_151 = arith.constant 3 : index
    %c3_152 = arith.constant 3 : index
    %c0_153 = arith.constant 0 : index
    %117 = vector.load %arg10[%c3_151, %c3_152, %c0_153] : memref<6x18x16xbf16, #tpu.memory_space<vmem>>, vector<1x3x16xbf16>
    %118 = vector.shape_cast %117 : vector<1x3x16xbf16> to vector<3x16xbf16>
    %cst_154 = arith.constant dense<0.000000e+00> : vector<16x16xf32>
    %119 = tpu.matmul %116, %118, %cst_154 {dimension_numbers = #tpu.dot_dimension_numbers<[1], [0], [0], [1], [0, 0, 1, 1], [], []>} : vector<16x3xbf16>, vector<3x16xbf16>, vector<16x16xf32> -> vector<16x16xf32>
    %120 = arith.addf %114, %119 : vector<16x16xf32>
    %c0_155 = arith.constant 0 : index
    %c1_156 = arith.constant 1 : index
    %c1_157 = arith.constant 1 : index
    %c0_158 = arith.constant 0 : index
    %121 = vector.load %arg3[%c0_155, %c1_156, %c1_157, %c0_158] : memref<1x2x18x3xbf16, #tpu.memory_space<vmem>>, vector<1x1x16x3xbf16>
    %122 = vector.shape_cast %121 : vector<1x1x16x3xbf16> to vector<16x3xbf16>
    %c3_159 = arith.constant 3 : index
    %c6_160 = arith.constant 6 : index
    %c0_161 = arith.constant 0 : index
    %123 = vector.load %arg10[%c3_159, %c6_160, %c0_161] : memref<6x18x16xbf16, #tpu.memory_space<vmem>>, vector<1x3x16xbf16>
    %124 = vector.shape_cast %123 : vector<1x3x16xbf16> to vector<3x16xbf16>
    %cst_162 = arith.constant dense<0.000000e+00> : vector<16x16xf32>
    %125 = tpu.matmul %122, %124, %cst_162 {dimension_numbers = #tpu.dot_dimension_numbers<[1], [0], [0], [1], [0, 0, 1, 1], [], []>} : vector<16x3xbf16>, vector<3x16xbf16>, vector<16x16xf32> -> vector<16x16xf32>
    %126 = arith.addf %120, %125 : vector<16x16xf32>
    %c0_163 = arith.constant 0 : index
    %c1_164 = arith.constant 1 : index
    %c1_165 = arith.constant 1 : index
    %c0_166 = arith.constant 0 : index
    %127 = vector.load %arg7[%c0_163, %c1_164, %c1_165, %c0_166] : memref<1x2x18x3xbf16, #tpu.memory_space<vmem>>, vector<1x1x16x3xbf16>
    %128 = vector.shape_cast %127 : vector<1x1x16x3xbf16> to vector<16x3xbf16>
    %c3_167 = arith.constant 3 : index
    %c9_168 = arith.constant 9 : index
    %c0_169 = arith.constant 0 : index
    %129 = vector.load %arg10[%c3_167, %c9_168, %c0_169] : memref<6x18x16xbf16, #tpu.memory_space<vmem>>, vector<1x3x16xbf16>
    %130 = vector.shape_cast %129 : vector<1x3x16xbf16> to vector<3x16xbf16>
    %cst_170 = arith.constant dense<0.000000e+00> : vector<16x16xf32>
    %131 = tpu.matmul %128, %130, %cst_170 {dimension_numbers = #tpu.dot_dimension_numbers<[1], [0], [0], [1], [0, 0, 1, 1], [], []>} : vector<16x3xbf16>, vector<3x16xbf16>, vector<16x16xf32> -> vector<16x16xf32>
    %132 = arith.addf %126, %131 : vector<16x16xf32>
    %c0_171 = arith.constant 0 : index
    %c1_172 = arith.constant 1 : index
    %c2_173 = arith.constant 2 : index
    %c0_174 = arith.constant 0 : index
    %133 = vector.load %arg3[%c0_171, %c1_172, %c2_173, %c0_174] : memref<1x2x18x3xbf16, #tpu.memory_space<vmem>>, vector<1x1x16x3xbf16>
    %134 = vector.shape_cast %133 : vector<1x1x16x3xbf16> to vector<16x3xbf16>
    %c3_175 = arith.constant 3 : index
    %c12_176 = arith.constant 12 : index
    %c0_177 = arith.constant 0 : index
    %135 = vector.load %arg10[%c3_175, %c12_176, %c0_177] : memref<6x18x16xbf16, #tpu.memory_space<vmem>>, vector<1x3x16xbf16>
    %136 = vector.shape_cast %135 : vector<1x3x16xbf16> to vector<3x16xbf16>
    %cst_178 = arith.constant dense<0.000000e+00> : vector<16x16xf32>
    %137 = tpu.matmul %134, %136, %cst_178 {dimension_numbers = #tpu.dot_dimension_numbers<[1], [0], [0], [1], [0, 0, 1, 1], [], []>} : vector<16x3xbf16>, vector<3x16xbf16>, vector<16x16xf32> -> vector<16x16xf32>
    %138 = arith.addf %132, %137 : vector<16x16xf32>
    %c0_179 = arith.constant 0 : index
    %c1_180 = arith.constant 1 : index
    %c2_181 = arith.constant 2 : index
    %c0_182 = arith.constant 0 : index
    %139 = vector.load %arg7[%c0_179, %c1_180, %c2_181, %c0_182] : memref<1x2x18x3xbf16, #tpu.memory_space<vmem>>, vector<1x1x16x3xbf16>
    %140 = vector.shape_cast %139 : vector<1x1x16x3xbf16> to vector<16x3xbf16>
    %c3_183 = arith.constant 3 : index
    %c15_184 = arith.constant 15 : index
    %c0_185 = arith.constant 0 : index
    %141 = vector.load %arg10[%c3_183, %c15_184, %c0_185] : memref<6x18x16xbf16, #tpu.memory_space<vmem>>, vector<1x3x16xbf16>
    %142 = vector.shape_cast %141 : vector<1x3x16xbf16> to vector<3x16xbf16>
    %cst_186 = arith.constant dense<0.000000e+00> : vector<16x16xf32>
    %143 = tpu.matmul %140, %142, %cst_186 {dimension_numbers = #tpu.dot_dimension_numbers<[1], [0], [0], [1], [0, 0, 1, 1], [], []>} : vector<16x3xbf16>, vector<3x16xbf16>, vector<16x16xf32> -> vector<16x16xf32>
    %144 = arith.addf %138, %143 : vector<16x16xf32>
    %c0_187 = arith.constant 0 : index
    %c0_188 = arith.constant 0 : index
    %c0_189 = arith.constant 0 : index
    %c0_190 = arith.constant 0 : index
    %145 = vector.load %arg4[%c0_187, %c0_188, %c0_189, %c0_190] : memref<1x2x18x3xbf16, #tpu.memory_space<vmem>>, vector<1x1x16x3xbf16>
    %146 = vector.shape_cast %145 : vector<1x1x16x3xbf16> to vector<16x3xbf16>
    %c4 = arith.constant 4 : index
    %c0_191 = arith.constant 0 : index
    %c0_192 = arith.constant 0 : index
    %147 = vector.load %arg10[%c4, %c0_191, %c0_192] : memref<6x18x16xbf16, #tpu.memory_space<vmem>>, vector<1x3x16xbf16>
    %148 = vector.shape_cast %147 : vector<1x3x16xbf16> to vector<3x16xbf16>
    %cst_193 = arith.constant dense<0.000000e+00> : vector<16x16xf32>
    %149 = tpu.matmul %146, %148, %cst_193 {dimension_numbers = #tpu.dot_dimension_numbers<[1], [0], [0], [1], [0, 0, 1, 1], [], []>} : vector<16x3xbf16>, vector<3x16xbf16>, vector<16x16xf32> -> vector<16x16xf32>
    %150 = arith.addf %144, %149 : vector<16x16xf32>
    %c0_194 = arith.constant 0 : index
    %c0_195 = arith.constant 0 : index
    %c0_196 = arith.constant 0 : index
    %c0_197 = arith.constant 0 : index
    %151 = vector.load %arg8[%c0_194, %c0_195, %c0_196, %c0_197] : memref<1x2x18x3xbf16, #tpu.memory_space<vmem>>, vector<1x1x16x3xbf16>
    %152 = vector.shape_cast %151 : vector<1x1x16x3xbf16> to vector<16x3xbf16>
    %c4_198 = arith.constant 4 : index
    %c3_199 = arith.constant 3 : index
    %c0_200 = arith.constant 0 : index
    %153 = vector.load %arg10[%c4_198, %c3_199, %c0_200] : memref<6x18x16xbf16, #tpu.memory_space<vmem>>, vector<1x3x16xbf16>
    %154 = vector.shape_cast %153 : vector<1x3x16xbf16> to vector<3x16xbf16>
    %cst_201 = arith.constant dense<0.000000e+00> : vector<16x16xf32>
    %155 = tpu.matmul %152, %154, %cst_201 {dimension_numbers = #tpu.dot_dimension_numbers<[1], [0], [0], [1], [0, 0, 1, 1], [], []>} : vector<16x3xbf16>, vector<3x16xbf16>, vector<16x16xf32> -> vector<16x16xf32>
    %156 = arith.addf %150, %155 : vector<16x16xf32>
    %c0_202 = arith.constant 0 : index
    %c0_203 = arith.constant 0 : index
    %c1_204 = arith.constant 1 : index
    %c0_205 = arith.constant 0 : index
    %157 = vector.load %arg4[%c0_202, %c0_203, %c1_204, %c0_205] : memref<1x2x18x3xbf16, #tpu.memory_space<vmem>>, vector<1x1x16x3xbf16>
    %158 = vector.shape_cast %157 : vector<1x1x16x3xbf16> to vector<16x3xbf16>
    %c4_206 = arith.constant 4 : index
    %c6_207 = arith.constant 6 : index
    %c0_208 = arith.constant 0 : index
    %159 = vector.load %arg10[%c4_206, %c6_207, %c0_208] : memref<6x18x16xbf16, #tpu.memory_space<vmem>>, vector<1x3x16xbf16>
    %160 = vector.shape_cast %159 : vector<1x3x16xbf16> to vector<3x16xbf16>
    %cst_209 = arith.constant dense<0.000000e+00> : vector<16x16xf32>
    %161 = tpu.matmul %158, %160, %cst_209 {dimension_numbers = #tpu.dot_dimension_numbers<[1], [0], [0], [1], [0, 0, 1, 1], [], []>} : vector<16x3xbf16>, vector<3x16xbf16>, vector<16x16xf32> -> vector<16x16xf32>
    %162 = arith.addf %156, %161 : vector<16x16xf32>
    %c0_210 = arith.constant 0 : index
    %c0_211 = arith.constant 0 : index
    %c1_212 = arith.constant 1 : index
    %c0_213 = arith.constant 0 : index
    %163 = vector.load %arg8[%c0_210, %c0_211, %c1_212, %c0_213] : memref<1x2x18x3xbf16, #tpu.memory_space<vmem>>, vector<1x1x16x3xbf16>
    %164 = vector.shape_cast %163 : vector<1x1x16x3xbf16> to vector<16x3xbf16>
    %c4_214 = arith.constant 4 : index
    %c9_215 = arith.constant 9 : index
    %c0_216 = arith.constant 0 : index
    %165 = vector.load %arg10[%c4_214, %c9_215, %c0_216] : memref<6x18x16xbf16, #tpu.memory_space<vmem>>, vector<1x3x16xbf16>
    %166 = vector.shape_cast %165 : vector<1x3x16xbf16> to vector<3x16xbf16>
    %cst_217 = arith.constant dense<0.000000e+00> : vector<16x16xf32>
    %167 = tpu.matmul %164, %166, %cst_217 {dimension_numbers = #tpu.dot_dimension_numbers<[1], [0], [0], [1], [0, 0, 1, 1], [], []>} : vector<16x3xbf16>, vector<3x16xbf16>, vector<16x16xf32> -> vector<16x16xf32>
    %168 = arith.addf %162, %167 : vector<16x16xf32>
    %c0_218 = arith.constant 0 : index
    %c0_219 = arith.constant 0 : index
    %c2_220 = arith.constant 2 : index
    %c0_221 = arith.constant 0 : index
    %169 = vector.load %arg4[%c0_218, %c0_219, %c2_220, %c0_221] : memref<1x2x18x3xbf16, #tpu.memory_space<vmem>>, vector<1x1x16x3xbf16>
    %170 = vector.shape_cast %169 : vector<1x1x16x3xbf16> to vector<16x3xbf16>
    %c4_222 = arith.constant 4 : index
    %c12_223 = arith.constant 12 : index
    %c0_224 = arith.constant 0 : index
    %171 = vector.load %arg10[%c4_222, %c12_223, %c0_224] : memref<6x18x16xbf16, #tpu.memory_space<vmem>>, vector<1x3x16xbf16>
    %172 = vector.shape_cast %171 : vector<1x3x16xbf16> to vector<3x16xbf16>
    %cst_225 = arith.constant dense<0.000000e+00> : vector<16x16xf32>
    %173 = tpu.matmul %170, %172, %cst_225 {dimension_numbers = #tpu.dot_dimension_numbers<[1], [0], [0], [1], [0, 0, 1, 1], [], []>} : vector<16x3xbf16>, vector<3x16xbf16>, vector<16x16xf32> -> vector<16x16xf32>
    %174 = arith.addf %168, %173 : vector<16x16xf32>
    %c0_226 = arith.constant 0 : index
    %c0_227 = arith.constant 0 : index
    %c2_228 = arith.constant 2 : index
    %c0_229 = arith.constant 0 : index
    %175 = vector.load %arg8[%c0_226, %c0_227, %c2_228, %c0_229] : memref<1x2x18x3xbf16, #tpu.memory_space<vmem>>, vector<1x1x16x3xbf16>
    %176 = vector.shape_cast %175 : vector<1x1x16x3xbf16> to vector<16x3xbf16>
    %c4_230 = arith.constant 4 : index
    %c15_231 = arith.constant 15 : index
    %c0_232 = arith.constant 0 : index
    %177 = vector.load %arg10[%c4_230, %c15_231, %c0_232] : memref<6x18x16xbf16, #tpu.memory_space<vmem>>, vector<1x3x16xbf16>
    %178 = vector.shape_cast %177 : vector<1x3x16xbf16> to vector<3x16xbf16>
    %cst_233 = arith.constant dense<0.000000e+00> : vector<16x16xf32>
    %179 = tpu.matmul %176, %178, %cst_233 {dimension_numbers = #tpu.dot_dimension_numbers<[1], [0], [0], [1], [0, 0, 1, 1], [], []>} : vector<16x3xbf16>, vector<3x16xbf16>, vector<16x16xf32> -> vector<16x16xf32>
    %180 = arith.addf %174, %179 : vector<16x16xf32>
    %c0_234 = arith.constant 0 : index
    %c1_235 = arith.constant 1 : index
    %c0_236 = arith.constant 0 : index
    %c0_237 = arith.constant 0 : index
    %181 = vector.load %arg4[%c0_234, %c1_235, %c0_236, %c0_237] : memref<1x2x18x3xbf16, #tpu.memory_space<vmem>>, vector<1x1x16x3xbf16>
    %182 = vector.shape_cast %181 : vector<1x1x16x3xbf16> to vector<16x3xbf16>
    %c5 = arith.constant 5 : index
    %c0_238 = arith.constant 0 : index
    %c0_239 = arith.constant 0 : index
    %183 = vector.load %arg10[%c5, %c0_238, %c0_239] : memref<6x18x16xbf16, #tpu.memory_space<vmem>>, vector<1x3x16xbf16>
    %184 = vector.shape_cast %183 : vector<1x3x16xbf16> to vector<3x16xbf16>
    %cst_240 = arith.constant dense<0.000000e+00> : vector<16x16xf32>
    %185 = tpu.matmul %182, %184, %cst_240 {dimension_numbers = #tpu.dot_dimension_numbers<[1], [0], [0], [1], [0, 0, 1, 1], [], []>} : vector<16x3xbf16>, vector<3x16xbf16>, vector<16x16xf32> -> vector<16x16xf32>
    %186 = arith.addf %180, %185 : vector<16x16xf32>
    %c0_241 = arith.constant 0 : index
    %c1_242 = arith.constant 1 : index
    %c0_243 = arith.constant 0 : index
    %c0_244 = arith.constant 0 : index
    %187 = vector.load %arg8[%c0_241, %c1_242, %c0_243, %c0_244] : memref<1x2x18x3xbf16, #tpu.memory_space<vmem>>, vector<1x1x16x3xbf16>
    %188 = vector.shape_cast %187 : vector<1x1x16x3xbf16> to vector<16x3xbf16>
    %c5_245 = arith.constant 5 : index
    %c3_246 = arith.constant 3 : index
    %c0_247 = arith.constant 0 : index
    %189 = vector.load %arg10[%c5_245, %c3_246, %c0_247] : memref<6x18x16xbf16, #tpu.memory_space<vmem>>, vector<1x3x16xbf16>
    %190 = vector.shape_cast %189 : vector<1x3x16xbf16> to vector<3x16xbf16>
    %cst_248 = arith.constant dense<0.000000e+00> : vector<16x16xf32>
    %191 = tpu.matmul %188, %190, %cst_248 {dimension_numbers = #tpu.dot_dimension_numbers<[1], [0], [0], [1], [0, 0, 1, 1], [], []>} : vector<16x3xbf16>, vector<3x16xbf16>, vector<16x16xf32> -> vector<16x16xf32>
    %192 = arith.addf %186, %191 : vector<16x16xf32>
    %c0_249 = arith.constant 0 : index
    %c1_250 = arith.constant 1 : index
    %c1_251 = arith.constant 1 : index
    %c0_252 = arith.constant 0 : index
    %193 = vector.load %arg4[%c0_249, %c1_250, %c1_251, %c0_252] : memref<1x2x18x3xbf16, #tpu.memory_space<vmem>>, vector<1x1x16x3xbf16>
    %194 = vector.shape_cast %193 : vector<1x1x16x3xbf16> to vector<16x3xbf16>
    %c5_253 = arith.constant 5 : index
    %c6_254 = arith.constant 6 : index
    %c0_255 = arith.constant 0 : index
    %195 = vector.load %arg10[%c5_253, %c6_254, %c0_255] : memref<6x18x16xbf16, #tpu.memory_space<vmem>>, vector<1x3x16xbf16>
    %196 = vector.shape_cast %195 : vector<1x3x16xbf16> to vector<3x16xbf16>
    %cst_256 = arith.constant dense<0.000000e+00> : vector<16x16xf32>
    %197 = tpu.matmul %194, %196, %cst_256 {dimension_numbers = #tpu.dot_dimension_numbers<[1], [0], [0], [1], [0, 0, 1, 1], [], []>} : vector<16x3xbf16>, vector<3x16xbf16>, vector<16x16xf32> -> vector<16x16xf32>
    %198 = arith.addf %192, %197 : vector<16x16xf32>
    %c0_257 = arith.constant 0 : index
    %c1_258 = arith.constant 1 : index
    %c1_259 = arith.constant 1 : index
    %c0_260 = arith.constant 0 : index
    %199 = vector.load %arg8[%c0_257, %c1_258, %c1_259, %c0_260] : memref<1x2x18x3xbf16, #tpu.memory_space<vmem>>, vector<1x1x16x3xbf16>
    %200 = vector.shape_cast %199 : vector<1x1x16x3xbf16> to vector<16x3xbf16>
    %c5_261 = arith.constant 5 : index
    %c9_262 = arith.constant 9 : index
    %c0_263 = arith.constant 0 : index
    %201 = vector.load %arg10[%c5_261, %c9_262, %c0_263] : memref<6x18x16xbf16, #tpu.memory_space<vmem>>, vector<1x3x16xbf16>
    %202 = vector.shape_cast %201 : vector<1x3x16xbf16> to vector<3x16xbf16>
    %cst_264 = arith.constant dense<0.000000e+00> : vector<16x16xf32>
    %203 = tpu.matmul %200, %202, %cst_264 {dimension_numbers = #tpu.dot_dimension_numbers<[1], [0], [0], [1], [0, 0, 1, 1], [], []>} : vector<16x3xbf16>, vector<3x16xbf16>, vector<16x16xf32> -> vector<16x16xf32>
    %204 = arith.addf %198, %203 : vector<16x16xf32>
    %c0_265 = arith.constant 0 : index
    %c1_266 = arith.constant 1 : index
    %c2_267 = arith.constant 2 : index
    %c0_268 = arith.constant 0 : index
    %205 = vector.load %arg4[%c0_265, %c1_266, %c2_267, %c0_268] : memref<1x2x18x3xbf16, #tpu.memory_space<vmem>>, vector<1x1x16x3xbf16>
    %206 = vector.shape_cast %205 : vector<1x1x16x3xbf16> to vector<16x3xbf16>
    %c5_269 = arith.constant 5 : index
    %c12_270 = arith.constant 12 : index
    %c0_271 = arith.constant 0 : index
    %207 = vector.load %arg10[%c5_269, %c12_270, %c0_271] : memref<6x18x16xbf16, #tpu.memory_space<vmem>>, vector<1x3x16xbf16>
    %208 = vector.shape_cast %207 : vector<1x3x16xbf16> to vector<3x16xbf16>
    %cst_272 = arith.constant dense<0.000000e+00> : vector<16x16xf32>
    %209 = tpu.matmul %206, %208, %cst_272 {dimension_numbers = #tpu.dot_dimension_numbers<[1], [0], [0], [1], [0, 0, 1, 1], [], []>} : vector<16x3xbf16>, vector<3x16xbf16>, vector<16x16xf32> -> vector<16x16xf32>
    %210 = arith.addf %204, %209 : vector<16x16xf32>
    %c0_273 = arith.constant 0 : index
    %c1_274 = arith.constant 1 : index
    %c2_275 = arith.constant 2 : index
    %c0_276 = arith.constant 0 : index
    %211 = vector.load %arg8[%c0_273, %c1_274, %c2_275, %c0_276] : memref<1x2x18x3xbf16, #tpu.memory_space<vmem>>, vector<1x1x16x3xbf16>
    %212 = vector.shape_cast %211 : vector<1x1x16x3xbf16> to vector<16x3xbf16>
    %c5_277 = arith.constant 5 : index
    %c15_278 = arith.constant 15 : index
    %c0_279 = arith.constant 0 : index
    %213 = vector.load %arg10[%c5_277, %c15_278, %c0_279] : memref<6x18x16xbf16, #tpu.memory_space<vmem>>, vector<1x3x16xbf16>
    %214 = vector.shape_cast %213 : vector<1x3x16xbf16> to vector<3x16xbf16>
    %cst_280 = arith.constant dense<0.000000e+00> : vector<16x16xf32>
    %215 = tpu.matmul %212, %214, %cst_280 {dimension_numbers = #tpu.dot_dimension_numbers<[1], [0], [0], [1], [0, 0, 1, 1], [], []>} : vector<16x3xbf16>, vector<3x16xbf16>, vector<16x16xf32> -> vector<16x16xf32>
    %216 = arith.addf %210, %215 : vector<16x16xf32>
    %217 = vector.broadcast %0 : vector<1x16xf32> to vector<16x16xf32>
    %218 = arith.mulf %216, %217 : vector<16x16xf32>
    %219 = vector.broadcast %1 : vector<1x16xf32> to vector<16x16xf32>
    %220 = arith.addf %218, %219 : vector<16x16xf32>
    %cst_281 = arith.constant 0.000000e+00 : f32
    %221 = vector.broadcast %cst_281 : f32 to vector<16x16xf32>
    %222 = arith.subf %221, %220 : vector<16x16xf32>
    %223 = math.exp %222 : vector<16x16xf32>
    %cst_282 = arith.constant 1.000000e+00 : f32
    %224 = vector.broadcast %cst_282 : f32 to vector<16x16xf32>
    %225 = arith.addf %224, %223 : vector<16x16xf32>
    %226 = tpu.reciprocal %225 : vector<16x16xf32> -> vector<16x16xf32>
    %227 = arith.mulf %220, %226 : vector<16x16xf32>
    %228 = arith.truncf %227 : vector<16x16xf32> to vector<16x16xbf16>
    %c0_283 = arith.constant 0 : index
    %c0_284 = arith.constant 0 : index
    %c0_285 = arith.constant 0 : index
    %c0_286 = arith.constant 0 : index
    %229 = vector.load %arg13[%c0_283, %c0_284, %c0_285, %c0_286] : memref<1x2x16x16xbf16, #tpu.memory_space<vmem>>, vector<1x1x16x16xbf16>
    %230 = vector.shape_cast %229 : vector<1x1x16x16xbf16> to vector<16x16xbf16>
    %231 = vector.shape_cast %228 : vector<16x16xbf16> to vector<1x1x16x16xbf16>
    tpu.vector_store %arg13[%c0_283, %c0_284, %c0_285, %c0_286], %231 {strides = array<i32>} : memref<1x2x16x16xbf16, #tpu.memory_space<vmem>>, vector<1x1x16x16xbf16>,
    %c0_287 = arith.constant 0 : index
    %c0_288 = arith.constant 0 : index
    %c0_289 = arith.constant 0 : index
    %c0_290 = arith.constant 0 : index
    %232 = vector.load %arg3[%c0_287, %c0_288, %c0_289, %c0_290] : memref<1x2x18x3xbf16, #tpu.memory_space<vmem>>, vector<1x1x16x3xbf16>
    %233 = vector.shape_cast %232 : vector<1x1x16x3xbf16> to vector<16x3xbf16>
    %c0_291 = arith.constant 0 : index
    %c0_292 = arith.constant 0 : index
    %c0_293 = arith.constant 0 : index
    %234 = vector.load %arg10[%c0_291, %c0_292, %c0_293] : memref<6x18x16xbf16, #tpu.memory_space<vmem>>, vector<1x3x16xbf16>
    %235 = vector.shape_cast %234 : vector<1x3x16xbf16> to vector<3x16xbf16>
    %cst_294 = arith.constant dense<0.000000e+00> : vector<16x16xf32>
    %236 = tpu.matmul %233, %235, %cst_294 {dimension_numbers = #tpu.dot_dimension_numbers<[1], [0], [0], [1], [0, 0, 1, 1], [], []>} : vector<16x3xbf16>, vector<3x16xbf16>, vector<16x16xf32> -> vector<16x16xf32>
    %c0_295 = arith.constant 0 : index
    %c0_296 = arith.constant 0 : index
    %c0_297 = arith.constant 0 : index
    %c0_298 = arith.constant 0 : index
    %237 = vector.load %arg7[%c0_295, %c0_296, %c0_297, %c0_298] : memref<1x2x18x3xbf16, #tpu.memory_space<vmem>>, vector<1x1x16x3xbf16>
    %238 = vector.shape_cast %237 : vector<1x1x16x3xbf16> to vector<16x3xbf16>
    %c0_299 = arith.constant 0 : index
    %c3_300 = arith.constant 3 : index
    %c0_301 = arith.constant 0 : index
    %239 = vector.load %arg10[%c0_299, %c3_300, %c0_301] : memref<6x18x16xbf16, #tpu.memory_space<vmem>>, vector<1x3x16xbf16>
    %240 = vector.shape_cast %239 : vector<1x3x16xbf16> to vector<3x16xbf16>
    %cst_302 = arith.constant dense<0.000000e+00> : vector<16x16xf32>
    %241 = tpu.matmul %238, %240, %cst_302 {dimension_numbers = #tpu.dot_dimension_numbers<[1], [0], [0], [1], [0, 0, 1, 1], [], []>} : vector<16x3xbf16>, vector<3x16xbf16>, vector<16x16xf32> -> vector<16x16xf32>
    %242 = arith.addf %236, %241 : vector<16x16xf32>
    %c0_303 = arith.constant 0 : index
    %c0_304 = arith.constant 0 : index
    %c1_305 = arith.constant 1 : index
    %c0_306 = arith.constant 0 : index
    %243 = vector.load %arg3[%c0_303, %c0_304, %c1_305, %c0_306] : memref<1x2x18x3xbf16, #tpu.memory_space<vmem>>, vector<1x1x16x3xbf16>
    %244 = vector.shape_cast %243 : vector<1x1x16x3xbf16> to vector<16x3xbf16>
    %c0_307 = arith.constant 0 : index
    %c6_308 = arith.constant 6 : index
    %c0_309 = arith.constant 0 : index
    %245 = vector.load %arg10[%c0_307, %c6_308, %c0_309] : memref<6x18x16xbf16, #tpu.memory_space<vmem>>, vector<1x3x16xbf16>
    %246 = vector.shape_cast %245 : vector<1x3x16xbf16> to vector<3x16xbf16>
    %cst_310 = arith.constant dense<0.000000e+00> : vector<16x16xf32>
    %247 = tpu.matmul %244, %246, %cst_310 {dimension_numbers = #tpu.dot_dimension_numbers<[1], [0], [0], [1], [0, 0, 1, 1], [], []>} : vector<16x3xbf16>, vector<3x16xbf16>, vector<16x16xf32> -> vector<16x16xf32>
    %248 = arith.addf %242, %247 : vector<16x16xf32>
    %c0_311 = arith.constant 0 : index
    %c0_312 = arith.constant 0 : index
    %c1_313 = arith.constant 1 : index
    %c0_314 = arith.constant 0 : index
    %249 = vector.load %arg7[%c0_311, %c0_312, %c1_313, %c0_314] : memref<1x2x18x3xbf16, #tpu.memory_space<vmem>>, vector<1x1x16x3xbf16>
    %250 = vector.shape_cast %249 : vector<1x1x16x3xbf16> to vector<16x3xbf16>
    %c0_315 = arith.constant 0 : index
    %c9_316 = arith.constant 9 : index
    %c0_317 = arith.constant 0 : index
    %251 = vector.load %arg10[%c0_315, %c9_316, %c0_317] : memref<6x18x16xbf16, #tpu.memory_space<vmem>>, vector<1x3x16xbf16>
    %252 = vector.shape_cast %251 : vector<1x3x16xbf16> to vector<3x16xbf16>
    %cst_318 = arith.constant dense<0.000000e+00> : vector<16x16xf32>
    %253 = tpu.matmul %250, %252, %cst_318 {dimension_numbers = #tpu.dot_dimension_numbers<[1], [0], [0], [1], [0, 0, 1, 1], [], []>} : vector<16x3xbf16>, vector<3x16xbf16>, vector<16x16xf32> -> vector<16x16xf32>
    %254 = arith.addf %248, %253 : vector<16x16xf32>
    %c0_319 = arith.constant 0 : index
    %c0_320 = arith.constant 0 : index
    %c2_321 = arith.constant 2 : index
    %c0_322 = arith.constant 0 : index
    %255 = vector.load %arg3[%c0_319, %c0_320, %c2_321, %c0_322] : memref<1x2x18x3xbf16, #tpu.memory_space<vmem>>, vector<1x1x16x3xbf16>
    %256 = vector.shape_cast %255 : vector<1x1x16x3xbf16> to vector<16x3xbf16>
    %c0_323 = arith.constant 0 : index
    %c12_324 = arith.constant 12 : index
    %c0_325 = arith.constant 0 : index
    %257 = vector.load %arg10[%c0_323, %c12_324, %c0_325] : memref<6x18x16xbf16, #tpu.memory_space<vmem>>, vector<1x3x16xbf16>
    %258 = vector.shape_cast %257 : vector<1x3x16xbf16> to vector<3x16xbf16>
    %cst_326 = arith.constant dense<0.000000e+00> : vector<16x16xf32>
    %259 = tpu.matmul %256, %258, %cst_326 {dimension_numbers = #tpu.dot_dimension_numbers<[1], [0], [0], [1], [0, 0, 1, 1], [], []>} : vector<16x3xbf16>, vector<3x16xbf16>, vector<16x16xf32> -> vector<16x16xf32>
    %260 = arith.addf %254, %259 : vector<16x16xf32>
    %c0_327 = arith.constant 0 : index
    %c0_328 = arith.constant 0 : index
    %c2_329 = arith.constant 2 : index
    %c0_330 = arith.constant 0 : index
    %261 = vector.load %arg7[%c0_327, %c0_328, %c2_329, %c0_330] : memref<1x2x18x3xbf16, #tpu.memory_space<vmem>>, vector<1x1x16x3xbf16>
    %262 = vector.shape_cast %261 : vector<1x1x16x3xbf16> to vector<16x3xbf16>
    %c0_331 = arith.constant 0 : index
    %c15_332 = arith.constant 15 : index
    %c0_333 = arith.constant 0 : index
    %263 = vector.load %arg10[%c0_331, %c15_332, %c0_333] : memref<6x18x16xbf16, #tpu.memory_space<vmem>>, vector<1x3x16xbf16>
    %264 = vector.shape_cast %263 : vector<1x3x16xbf16> to vector<3x16xbf16>
    %cst_334 = arith.constant dense<0.000000e+00> : vector<16x16xf32>
    %265 = tpu.matmul %262, %264, %cst_334 {dimension_numbers = #tpu.dot_dimension_numbers<[1], [0], [0], [1], [0, 0, 1, 1], [], []>} : vector<16x3xbf16>, vector<3x16xbf16>, vector<16x16xf32> -> vector<16x16xf32>
    %266 = arith.addf %260, %265 : vector<16x16xf32>
    %c0_335 = arith.constant 0 : index
    %c1_336 = arith.constant 1 : index
    %c0_337 = arith.constant 0 : index
    %c0_338 = arith.constant 0 : index
    %267 = vector.load %arg3[%c0_335, %c1_336, %c0_337, %c0_338] : memref<1x2x18x3xbf16, #tpu.memory_space<vmem>>, vector<1x1x16x3xbf16>
    %268 = vector.shape_cast %267 : vector<1x1x16x3xbf16> to vector<16x3xbf16>
    %c1_339 = arith.constant 1 : index
    %c0_340 = arith.constant 0 : index
    %c0_341 = arith.constant 0 : index
    %269 = vector.load %arg10[%c1_339, %c0_340, %c0_341] : memref<6x18x16xbf16, #tpu.memory_space<vmem>>, vector<1x3x16xbf16>
    %270 = vector.shape_cast %269 : vector<1x3x16xbf16> to vector<3x16xbf16>
    %cst_342 = arith.constant dense<0.000000e+00> : vector<16x16xf32>
    %271 = tpu.matmul %268, %270, %cst_342 {dimension_numbers = #tpu.dot_dimension_numbers<[1], [0], [0], [1], [0, 0, 1, 1], [], []>} : vector<16x3xbf16>, vector<3x16xbf16>, vector<16x16xf32> -> vector<16x16xf32>
    %272 = arith.addf %266, %271 : vector<16x16xf32>
    %c0_343 = arith.constant 0 : index
    %c1_344 = arith.constant 1 : index
    %c0_345 = arith.constant 0 : index
    %c0_346 = arith.constant 0 : index
    %273 = vector.load %arg7[%c0_343, %c1_344, %c0_345, %c0_346] : memref<1x2x18x3xbf16, #tpu.memory_space<vmem>>, vector<1x1x16x3xbf16>
    %274 = vector.shape_cast %273 : vector<1x1x16x3xbf16> to vector<16x3xbf16>
    %c1_347 = arith.constant 1 : index
    %c3_348 = arith.constant 3 : index
    %c0_349 = arith.constant 0 : index
    %275 = vector.load %arg10[%c1_347, %c3_348, %c0_349] : memref<6x18x16xbf16, #tpu.memory_space<vmem>>, vector<1x3x16xbf16>
    %276 = vector.shape_cast %275 : vector<1x3x16xbf16> to vector<3x16xbf16>
    %cst_350 = arith.constant dense<0.000000e+00> : vector<16x16xf32>
    %277 = tpu.matmul %274, %276, %cst_350 {dimension_numbers = #tpu.dot_dimension_numbers<[1], [0], [0], [1], [0, 0, 1, 1], [], []>} : vector<16x3xbf16>, vector<3x16xbf16>, vector<16x16xf32> -> vector<16x16xf32>
    %278 = arith.addf %272, %277 : vector<16x16xf32>
    %c0_351 = arith.constant 0 : index
    %c1_352 = arith.constant 1 : index
    %c1_353 = arith.constant 1 : index
    %c0_354 = arith.constant 0 : index
    %279 = vector.load %arg3[%c0_351, %c1_352, %c1_353, %c0_354] : memref<1x2x18x3xbf16, #tpu.memory_space<vmem>>, vector<1x1x16x3xbf16>
    %280 = vector.shape_cast %279 : vector<1x1x16x3xbf16> to vector<16x3xbf16>
    %c1_355 = arith.constant 1 : index
    %c6_356 = arith.constant 6 : index
    %c0_357 = arith.constant 0 : index
    %281 = vector.load %arg10[%c1_355, %c6_356, %c0_357] : memref<6x18x16xbf16, #tpu.memory_space<vmem>>, vector<1x3x16xbf16>
    %282 = vector.shape_cast %281 : vector<1x3x16xbf16> to vector<3x16xbf16>
    %cst_358 = arith.constant dense<0.000000e+00> : vector<16x16xf32>
    %283 = tpu.matmul %280, %282, %cst_358 {dimension_numbers = #tpu.dot_dimension_numbers<[1], [0], [0], [1], [0, 0, 1, 1], [], []>} : vector<16x3xbf16>, vector<3x16xbf16>, vector<16x16xf32> -> vector<16x16xf32>
    %284 = arith.addf %278, %283 : vector<16x16xf32>
    %c0_359 = arith.constant 0 : index
    %c1_360 = arith.constant 1 : index
    %c1_361 = arith.constant 1 : index
    %c0_362 = arith.constant 0 : index
    %285 = vector.load %arg7[%c0_359, %c1_360, %c1_361, %c0_362] : memref<1x2x18x3xbf16, #tpu.memory_space<vmem>>, vector<1x1x16x3xbf16>
    %286 = vector.shape_cast %285 : vector<1x1x16x3xbf16> to vector<16x3xbf16>
    %c1_363 = arith.constant 1 : index
    %c9_364 = arith.constant 9 : index
    %c0_365 = arith.constant 0 : index
    %287 = vector.load %arg10[%c1_363, %c9_364, %c0_365] : memref<6x18x16xbf16, #tpu.memory_space<vmem>>, vector<1x3x16xbf16>
    %288 = vector.shape_cast %287 : vector<1x3x16xbf16> to vector<3x16xbf16>
    %cst_366 = arith.constant dense<0.000000e+00> : vector<16x16xf32>
    %289 = tpu.matmul %286, %288, %cst_366 {dimension_numbers = #tpu.dot_dimension_numbers<[1], [0], [0], [1], [0, 0, 1, 1], [], []>} : vector<16x3xbf16>, vector<3x16xbf16>, vector<16x16xf32> -> vector<16x16xf32>
    %290 = arith.addf %284, %289 : vector<16x16xf32>
    %c0_367 = arith.constant 0 : index
    %c1_368 = arith.constant 1 : index
    %c2_369 = arith.constant 2 : index
    %c0_370 = arith.constant 0 : index
    %291 = vector.load %arg3[%c0_367, %c1_368, %c2_369, %c0_370] : memref<1x2x18x3xbf16, #tpu.memory_space<vmem>>, vector<1x1x16x3xbf16>
    %292 = vector.shape_cast %291 : vector<1x1x16x3xbf16> to vector<16x3xbf16>
    %c1_371 = arith.constant 1 : index
    %c12_372 = arith.constant 12 : index
    %c0_373 = arith.constant 0 : index
    %293 = vector.load %arg10[%c1_371, %c12_372, %c0_373] : memref<6x18x16xbf16, #tpu.memory_space<vmem>>, vector<1x3x16xbf16>
    %294 = vector.shape_cast %293 : vector<1x3x16xbf16> to vector<3x16xbf16>
    %cst_374 = arith.constant dense<0.000000e+00> : vector<16x16xf32>
    %295 = tpu.matmul %292, %294, %cst_374 {dimension_numbers = #tpu.dot_dimension_numbers<[1], [0], [0], [1], [0, 0, 1, 1], [], []>} : vector<16x3xbf16>, vector<3x16xbf16>, vector<16x16xf32> -> vector<16x16xf32>
    %296 = arith.addf %290, %295 : vector<16x16xf32>
    %c0_375 = arith.constant 0 : index
    %c1_376 = arith.constant 1 : index
    %c2_377 = arith.constant 2 : index
    %c0_378 = arith.constant 0 : index
    %297 = vector.load %arg7[%c0_375, %c1_376, %c2_377, %c0_378] : memref<1x2x18x3xbf16, #tpu.memory_space<vmem>>, vector<1x1x16x3xbf16>
    %298 = vector.shape_cast %297 : vector<1x1x16x3xbf16> to vector<16x3xbf16>
    %c1_379 = arith.constant 1 : index
    %c15_380 = arith.constant 15 : index
    %c0_381 = arith.constant 0 : index
    %299 = vector.load %arg10[%c1_379, %c15_380, %c0_381] : memref<6x18x16xbf16, #tpu.memory_space<vmem>>, vector<1x3x16xbf16>
    %300 = vector.shape_cast %299 : vector<1x3x16xbf16> to vector<3x16xbf16>
    %cst_382 = arith.constant dense<0.000000e+00> : vector<16x16xf32>
    %301 = tpu.matmul %298, %300, %cst_382 {dimension_numbers = #tpu.dot_dimension_numbers<[1], [0], [0], [1], [0, 0, 1, 1], [], []>} : vector<16x3xbf16>, vector<3x16xbf16>, vector<16x16xf32> -> vector<16x16xf32>
    %302 = arith.addf %296, %301 : vector<16x16xf32>
    %c0_383 = arith.constant 0 : index
    %c0_384 = arith.constant 0 : index
    %c0_385 = arith.constant 0 : index
    %c0_386 = arith.constant 0 : index
    %303 = vector.load %arg4[%c0_383, %c0_384, %c0_385, %c0_386] : memref<1x2x18x3xbf16, #tpu.memory_space<vmem>>, vector<1x1x16x3xbf16>
    %304 = vector.shape_cast %303 : vector<1x1x16x3xbf16> to vector<16x3xbf16>
    %c2_387 = arith.constant 2 : index
    %c0_388 = arith.constant 0 : index
    %c0_389 = arith.constant 0 : index
    %305 = vector.load %arg10[%c2_387, %c0_388, %c0_389] : memref<6x18x16xbf16, #tpu.memory_space<vmem>>, vector<1x3x16xbf16>
    %306 = vector.shape_cast %305 : vector<1x3x16xbf16> to vector<3x16xbf16>
    %cst_390 = arith.constant dense<0.000000e+00> : vector<16x16xf32>
    %307 = tpu.matmul %304, %306, %cst_390 {dimension_numbers = #tpu.dot_dimension_numbers<[1], [0], [0], [1], [0, 0, 1, 1], [], []>} : vector<16x3xbf16>, vector<3x16xbf16>, vector<16x16xf32> -> vector<16x16xf32>
    %308 = arith.addf %302, %307 : vector<16x16xf32>
    %c0_391 = arith.constant 0 : index
    %c0_392 = arith.constant 0 : index
    %c0_393 = arith.constant 0 : index
    %c0_394 = arith.constant 0 : index
    %309 = vector.load %arg8[%c0_391, %c0_392, %c0_393, %c0_394] : memref<1x2x18x3xbf16, #tpu.memory_space<vmem>>, vector<1x1x16x3xbf16>
    %310 = vector.shape_cast %309 : vector<1x1x16x3xbf16> to vector<16x3xbf16>
    %c2_395 = arith.constant 2 : index
    %c3_396 = arith.constant 3 : index
    %c0_397 = arith.constant 0 : index
    %311 = vector.load %arg10[%c2_395, %c3_396, %c0_397] : memref<6x18x16xbf16, #tpu.memory_space<vmem>>, vector<1x3x16xbf16>
    %312 = vector.shape_cast %311 : vector<1x3x16xbf16> to vector<3x16xbf16>
    %cst_398 = arith.constant dense<0.000000e+00> : vector<16x16xf32>
    %313 = tpu.matmul %310, %312, %cst_398 {dimension_numbers = #tpu.dot_dimension_numbers<[1], [0], [0], [1], [0, 0, 1, 1], [], []>} : vector<16x3xbf16>, vector<3x16xbf16>, vector<16x16xf32> -> vector<16x16xf32>
    %314 = arith.addf %308, %313 : vector<16x16xf32>
    %c0_399 = arith.constant 0 : index
    %c0_400 = arith.constant 0 : index
    %c1_401 = arith.constant 1 : index
    %c0_402 = arith.constant 0 : index
    %315 = vector.load %arg4[%c0_399, %c0_400, %c1_401, %c0_402] : memref<1x2x18x3xbf16, #tpu.memory_space<vmem>>, vector<1x1x16x3xbf16>
    %316 = vector.shape_cast %315 : vector<1x1x16x3xbf16> to vector<16x3xbf16>
    %c2_403 = arith.constant 2 : index
    %c6_404 = arith.constant 6 : index
    %c0_405 = arith.constant 0 : index
    %317 = vector.load %arg10[%c2_403, %c6_404, %c0_405] : memref<6x18x16xbf16, #tpu.memory_space<vmem>>, vector<1x3x16xbf16>
    %318 = vector.shape_cast %317 : vector<1x3x16xbf16> to vector<3x16xbf16>
    %cst_406 = arith.constant dense<0.000000e+00> : vector<16x16xf32>
    %319 = tpu.matmul %316, %318, %cst_406 {dimension_numbers = #tpu.dot_dimension_numbers<[1], [0], [0], [1], [0, 0, 1, 1], [], []>} : vector<16x3xbf16>, vector<3x16xbf16>, vector<16x16xf32> -> vector<16x16xf32>
    %320 = arith.addf %314, %319 : vector<16x16xf32>
    %c0_407 = arith.constant 0 : index
    %c0_408 = arith.constant 0 : index
    %c1_409 = arith.constant 1 : index
    %c0_410 = arith.constant 0 : index
    %321 = vector.load %arg8[%c0_407, %c0_408, %c1_409, %c0_410] : memref<1x2x18x3xbf16, #tpu.memory_space<vmem>>, vector<1x1x16x3xbf16>
    %322 = vector.shape_cast %321 : vector<1x1x16x3xbf16> to vector<16x3xbf16>
    %c2_411 = arith.constant 2 : index
    %c9_412 = arith.constant 9 : index
    %c0_413 = arith.constant 0 : index
    %323 = vector.load %arg10[%c2_411, %c9_412, %c0_413] : memref<6x18x16xbf16, #tpu.memory_space<vmem>>, vector<1x3x16xbf16>
    %324 = vector.shape_cast %323 : vector<1x3x16xbf16> to vector<3x16xbf16>
    %cst_414 = arith.constant dense<0.000000e+00> : vector<16x16xf32>
    %325 = tpu.matmul %322, %324, %cst_414 {dimension_numbers = #tpu.dot_dimension_numbers<[1], [0], [0], [1], [0, 0, 1, 1], [], []>} : vector<16x3xbf16>, vector<3x16xbf16>, vector<16x16xf32> -> vector<16x16xf32>
    %326 = arith.addf %320, %325 : vector<16x16xf32>
    %c0_415 = arith.constant 0 : index
    %c0_416 = arith.constant 0 : index
    %c2_417 = arith.constant 2 : index
    %c0_418 = arith.constant 0 : index
    %327 = vector.load %arg4[%c0_415, %c0_416, %c2_417, %c0_418] : memref<1x2x18x3xbf16, #tpu.memory_space<vmem>>, vector<1x1x16x3xbf16>
    %328 = vector.shape_cast %327 : vector<1x1x16x3xbf16> to vector<16x3xbf16>
    %c2_419 = arith.constant 2 : index
    %c12_420 = arith.constant 12 : index
    %c0_421 = arith.constant 0 : index
    %329 = vector.load %arg10[%c2_419, %c12_420, %c0_421] : memref<6x18x16xbf16, #tpu.memory_space<vmem>>, vector<1x3x16xbf16>
    %330 = vector.shape_cast %329 : vector<1x3x16xbf16> to vector<3x16xbf16>
    %cst_422 = arith.constant dense<0.000000e+00> : vector<16x16xf32>
    %331 = tpu.matmul %328, %330, %cst_422 {dimension_numbers = #tpu.dot_dimension_numbers<[1], [0], [0], [1], [0, 0, 1, 1], [], []>} : vector<16x3xbf16>, vector<3x16xbf16>, vector<16x16xf32> -> vector<16x16xf32>
    %332 = arith.addf %326, %331 : vector<16x16xf32>
    %c0_423 = arith.constant 0 : index
    %c0_424 = arith.constant 0 : index
    %c2_425 = arith.constant 2 : index
    %c0_426 = arith.constant 0 : index
    %333 = vector.load %arg8[%c0_423, %c0_424, %c2_425, %c0_426] : memref<1x2x18x3xbf16, #tpu.memory_space<vmem>>, vector<1x1x16x3xbf16>
    %334 = vector.shape_cast %333 : vector<1x1x16x3xbf16> to vector<16x3xbf16>
    %c2_427 = arith.constant 2 : index
    %c15_428 = arith.constant 15 : index
    %c0_429 = arith.constant 0 : index
    %335 = vector.load %arg10[%c2_427, %c15_428, %c0_429] : memref<6x18x16xbf16, #tpu.memory_space<vmem>>, vector<1x3x16xbf16>
    %336 = vector.shape_cast %335 : vector<1x3x16xbf16> to vector<3x16xbf16>
    %cst_430 = arith.constant dense<0.000000e+00> : vector<16x16xf32>
    %337 = tpu.matmul %334, %336, %cst_430 {dimension_numbers = #tpu.dot_dimension_numbers<[1], [0], [0], [1], [0, 0, 1, 1], [], []>} : vector<16x3xbf16>, vector<3x16xbf16>, vector<16x16xf32> -> vector<16x16xf32>
    %338 = arith.addf %332, %337 : vector<16x16xf32>
    %c0_431 = arith.constant 0 : index
    %c1_432 = arith.constant 1 : index
    %c0_433 = arith.constant 0 : index
    %c0_434 = arith.constant 0 : index
    %339 = vector.load %arg4[%c0_431, %c1_432, %c0_433, %c0_434] : memref<1x2x18x3xbf16, #tpu.memory_space<vmem>>, vector<1x1x16x3xbf16>
    %340 = vector.shape_cast %339 : vector<1x1x16x3xbf16> to vector<16x3xbf16>
    %c3_435 = arith.constant 3 : index
    %c0_436 = arith.constant 0 : index
    %c0_437 = arith.constant 0 : index
    %341 = vector.load %arg10[%c3_435, %c0_436, %c0_437] : memref<6x18x16xbf16, #tpu.memory_space<vmem>>, vector<1x3x16xbf16>
    %342 = vector.shape_cast %341 : vector<1x3x16xbf16> to vector<3x16xbf16>
    %cst_438 = arith.constant dense<0.000000e+00> : vector<16x16xf32>
    %343 = tpu.matmul %340, %342, %cst_438 {dimension_numbers = #tpu.dot_dimension_numbers<[1], [0], [0], [1], [0, 0, 1, 1], [], []>} : vector<16x3xbf16>, vector<3x16xbf16>, vector<16x16xf32> -> vector<16x16xf32>
    %344 = arith.addf %338, %343 : vector<16x16xf32>
    %c0_439 = arith.constant 0 : index
    %c1_440 = arith.constant 1 : index
    %c0_441 = arith.constant 0 : index
    %c0_442 = arith.constant 0 : index
    %345 = vector.load %arg8[%c0_439, %c1_440, %c0_441, %c0_442] : memref<1x2x18x3xbf16, #tpu.memory_space<vmem>>, vector<1x1x16x3xbf16>
    %346 = vector.shape_cast %345 : vector<1x1x16x3xbf16> to vector<16x3xbf16>
    %c3_443 = arith.constant 3 : index
    %c3_444 = arith.constant 3 : index
    %c0_445 = arith.constant 0 : index
    %347 = vector.load %arg10[%c3_443, %c3_444, %c0_445] : memref<6x18x16xbf16, #tpu.memory_space<vmem>>, vector<1x3x16xbf16>
    %348 = vector.shape_cast %347 : vector<1x3x16xbf16> to vector<3x16xbf16>
    %cst_446 = arith.constant dense<0.000000e+00> : vector<16x16xf32>
    %349 = tpu.matmul %346, %348, %cst_446 {dimension_numbers = #tpu.dot_dimension_numbers<[1], [0], [0], [1], [0, 0, 1, 1], [], []>} : vector<16x3xbf16>, vector<3x16xbf16>, vector<16x16xf32> -> vector<16x16xf32>
    %350 = arith.addf %344, %349 : vector<16x16xf32>
    %c0_447 = arith.constant 0 : index
    %c1_448 = arith.constant 1 : index
    %c1_449 = arith.constant 1 : index
    %c0_450 = arith.constant 0 : index
    %351 = vector.load %arg4[%c0_447, %c1_448, %c1_449, %c0_450] : memref<1x2x18x3xbf16, #tpu.memory_space<vmem>>, vector<1x1x16x3xbf16>
    %352 = vector.shape_cast %351 : vector<1x1x16x3xbf16> to vector<16x3xbf16>
    %c3_451 = arith.constant 3 : index
    %c6_452 = arith.constant 6 : index
    %c0_453 = arith.constant 0 : index
    %353 = vector.load %arg10[%c3_451, %c6_452, %c0_453] : memref<6x18x16xbf16, #tpu.memory_space<vmem>>, vector<1x3x16xbf16>
    %354 = vector.shape_cast %353 : vector<1x3x16xbf16> to vector<3x16xbf16>
    %cst_454 = arith.constant dense<0.000000e+00> : vector<16x16xf32>
    %355 = tpu.matmul %352, %354, %cst_454 {dimension_numbers = #tpu.dot_dimension_numbers<[1], [0], [0], [1], [0, 0, 1, 1], [], []>} : vector<16x3xbf16>, vector<3x16xbf16>, vector<16x16xf32> -> vector<16x16xf32>
    %356 = arith.addf %350, %355 : vector<16x16xf32>
    %c0_455 = arith.constant 0 : index
    %c1_456 = arith.constant 1 : index
    %c1_457 = arith.constant 1 : index
    %c0_458 = arith.constant 0 : index
    %357 = vector.load %arg8[%c0_455, %c1_456, %c1_457, %c0_458] : memref<1x2x18x3xbf16, #tpu.memory_space<vmem>>, vector<1x1x16x3xbf16>
    %358 = vector.shape_cast %357 : vector<1x1x16x3xbf16> to vector<16x3xbf16>
    %c3_459 = arith.constant 3 : index
    %c9_460 = arith.constant 9 : index
    %c0_461 = arith.constant 0 : index
    %359 = vector.load %arg10[%c3_459, %c9_460, %c0_461] : memref<6x18x16xbf16, #tpu.memory_space<vmem>>, vector<1x3x16xbf16>
    %360 = vector.shape_cast %359 : vector<1x3x16xbf16> to vector<3x16xbf16>
    %cst_462 = arith.constant dense<0.000000e+00> : vector<16x16xf32>
    %361 = tpu.matmul %358, %360, %cst_462 {dimension_numbers = #tpu.dot_dimension_numbers<[1], [0], [0], [1], [0, 0, 1, 1], [], []>} : vector<16x3xbf16>, vector<3x16xbf16>, vector<16x16xf32> -> vector<16x16xf32>
    %362 = arith.addf %356, %361 : vector<16x16xf32>
    %c0_463 = arith.constant 0 : index
    %c1_464 = arith.constant 1 : index
    %c2_465 = arith.constant 2 : index
    %c0_466 = arith.constant 0 : index
    %363 = vector.load %arg4[%c0_463, %c1_464, %c2_465, %c0_466] : memref<1x2x18x3xbf16, #tpu.memory_space<vmem>>, vector<1x1x16x3xbf16>
    %364 = vector.shape_cast %363 : vector<1x1x16x3xbf16> to vector<16x3xbf16>
    %c3_467 = arith.constant 3 : index
    %c12_468 = arith.constant 12 : index
    %c0_469 = arith.constant 0 : index
    %365 = vector.load %arg10[%c3_467, %c12_468, %c0_469] : memref<6x18x16xbf16, #tpu.memory_space<vmem>>, vector<1x3x16xbf16>
    %366 = vector.shape_cast %365 : vector<1x3x16xbf16> to vector<3x16xbf16>
    %cst_470 = arith.constant dense<0.000000e+00> : vector<16x16xf32>
    %367 = tpu.matmul %364, %366, %cst_470 {dimension_numbers = #tpu.dot_dimension_numbers<[1], [0], [0], [1], [0, 0, 1, 1], [], []>} : vector<16x3xbf16>, vector<3x16xbf16>, vector<16x16xf32> -> vector<16x16xf32>
    %368 = arith.addf %362, %367 : vector<16x16xf32>
    %c0_471 = arith.constant 0 : index
    %c1_472 = arith.constant 1 : index
    %c2_473 = arith.constant 2 : index
    %c0_474 = arith.constant 0 : index
    %369 = vector.load %arg8[%c0_471, %c1_472, %c2_473, %c0_474] : memref<1x2x18x3xbf16, #tpu.memory_space<vmem>>, vector<1x1x16x3xbf16>
    %370 = vector.shape_cast %369 : vector<1x1x16x3xbf16> to vector<16x3xbf16>
    %c3_475 = arith.constant 3 : index
    %c15_476 = arith.constant 15 : index
    %c0_477 = arith.constant 0 : index
    %371 = vector.load %arg10[%c3_475, %c15_476, %c0_477] : memref<6x18x16xbf16, #tpu.memory_space<vmem>>, vector<1x3x16xbf16>
    %372 = vector.shape_cast %371 : vector<1x3x16xbf16> to vector<3x16xbf16>
    %cst_478 = arith.constant dense<0.000000e+00> : vector<16x16xf32>
    %373 = tpu.matmul %370, %372, %cst_478 {dimension_numbers = #tpu.dot_dimension_numbers<[1], [0], [0], [1], [0, 0, 1, 1], [], []>} : vector<16x3xbf16>, vector<3x16xbf16>, vector<16x16xf32> -> vector<16x16xf32>
    %374 = arith.addf %368, %373 : vector<16x16xf32>
    %c0_479 = arith.constant 0 : index
    %c0_480 = arith.constant 0 : index
    %c0_481 = arith.constant 0 : index
    %c0_482 = arith.constant 0 : index
    %375 = vector.load %arg5[%c0_479, %c0_480, %c0_481, %c0_482] : memref<1x2x18x3xbf16, #tpu.memory_space<vmem>>, vector<1x1x16x3xbf16>
    %376 = vector.shape_cast %375 : vector<1x1x16x3xbf16> to vector<16x3xbf16>
    %c4_483 = arith.constant 4 : index
    %c0_484 = arith.constant 0 : index
    %c0_485 = arith.constant 0 : index
    %377 = vector.load %arg10[%c4_483, %c0_484, %c0_485] : memref<6x18x16xbf16, #tpu.memory_space<vmem>>, vector<1x3x16xbf16>
    %378 = vector.shape_cast %377 : vector<1x3x16xbf16> to vector<3x16xbf16>
    %cst_486 = arith.constant dense<0.000000e+00> : vector<16x16xf32>
    %379 = tpu.matmul %376, %378, %cst_486 {dimension_numbers = #tpu.dot_dimension_numbers<[1], [0], [0], [1], [0, 0, 1, 1], [], []>} : vector<16x3xbf16>, vector<3x16xbf16>, vector<16x16xf32> -> vector<16x16xf32>
    %380 = arith.addf %374, %379 : vector<16x16xf32>
    %c0_487 = arith.constant 0 : index
    %c0_488 = arith.constant 0 : index
    %c0_489 = arith.constant 0 : index
    %c0_490 = arith.constant 0 : index
    %381 = vector.load %arg9[%c0_487, %c0_488, %c0_489, %c0_490] : memref<1x2x18x3xbf16, #tpu.memory_space<vmem>>, vector<1x1x16x3xbf16>
    %382 = vector.shape_cast %381 : vector<1x1x16x3xbf16> to vector<16x3xbf16>
    %c4_491 = arith.constant 4 : index
    %c3_492 = arith.constant 3 : index
    %c0_493 = arith.constant 0 : index
    %383 = vector.load %arg10[%c4_491, %c3_492, %c0_493] : memref<6x18x16xbf16, #tpu.memory_space<vmem>>, vector<1x3x16xbf16>
    %384 = vector.shape_cast %383 : vector<1x3x16xbf16> to vector<3x16xbf16>
    %cst_494 = arith.constant dense<0.000000e+00> : vector<16x16xf32>
    %385 = tpu.matmul %382, %384, %cst_494 {dimension_numbers = #tpu.dot_dimension_numbers<[1], [0], [0], [1], [0, 0, 1, 1], [], []>} : vector<16x3xbf16>, vector<3x16xbf16>, vector<16x16xf32> -> vector<16x16xf32>
    %386 = arith.addf %380, %385 : vector<16x16xf32>
    %c0_495 = arith.constant 0 : index
    %c0_496 = arith.constant 0 : index
    %c1_497 = arith.constant 1 : index
    %c0_498 = arith.constant 0 : index
    %387 = vector.load %arg5[%c0_495, %c0_496, %c1_497, %c0_498] : memref<1x2x18x3xbf16, #tpu.memory_space<vmem>>, vector<1x1x16x3xbf16>
    %388 = vector.shape_cast %387 : vector<1x1x16x3xbf16> to vector<16x3xbf16>
    %c4_499 = arith.constant 4 : index
    %c6_500 = arith.constant 6 : index
    %c0_501 = arith.constant 0 : index
    %389 = vector.load %arg10[%c4_499, %c6_500, %c0_501] : memref<6x18x16xbf16, #tpu.memory_space<vmem>>, vector<1x3x16xbf16>
    %390 = vector.shape_cast %389 : vector<1x3x16xbf16> to vector<3x16xbf16>
    %cst_502 = arith.constant dense<0.000000e+00> : vector<16x16xf32>
    %391 = tpu.matmul %388, %390, %cst_502 {dimension_numbers = #tpu.dot_dimension_numbers<[1], [0], [0], [1], [0, 0, 1, 1], [], []>} : vector<16x3xbf16>, vector<3x16xbf16>, vector<16x16xf32> -> vector<16x16xf32>
    %392 = arith.addf %386, %391 : vector<16x16xf32>
    %c0_503 = arith.constant 0 : index
    %c0_504 = arith.constant 0 : index
    %c1_505 = arith.constant 1 : index
    %c0_506 = arith.constant 0 : index
    %393 = vector.load %arg9[%c0_503, %c0_504, %c1_505, %c0_506] : memref<1x2x18x3xbf16, #tpu.memory_space<vmem>>, vector<1x1x16x3xbf16>
    %394 = vector.shape_cast %393 : vector<1x1x16x3xbf16> to vector<16x3xbf16>
    %c4_507 = arith.constant 4 : index
    %c9_508 = arith.constant 9 : index
    %c0_509 = arith.constant 0 : index
    %395 = vector.load %arg10[%c4_507, %c9_508, %c0_509] : memref<6x18x16xbf16, #tpu.memory_space<vmem>>, vector<1x3x16xbf16>
    %396 = vector.shape_cast %395 : vector<1x3x16xbf16> to vector<3x16xbf16>
    %cst_510 = arith.constant dense<0.000000e+00> : vector<16x16xf32>
    %397 = tpu.matmul %394, %396, %cst_510 {dimension_numbers = #tpu.dot_dimension_numbers<[1], [0], [0], [1], [0, 0, 1, 1], [], []>} : vector<16x3xbf16>, vector<3x16xbf16>, vector<16x16xf32> -> vector<16x16xf32>
    %398 = arith.addf %392, %397 : vector<16x16xf32>
    %c0_511 = arith.constant 0 : index
    %c0_512 = arith.constant 0 : index
    %c2_513 = arith.constant 2 : index
    %c0_514 = arith.constant 0 : index
    %399 = vector.load %arg5[%c0_511, %c0_512, %c2_513, %c0_514] : memref<1x2x18x3xbf16, #tpu.memory_space<vmem>>, vector<1x1x16x3xbf16>
    %400 = vector.shape_cast %399 : vector<1x1x16x3xbf16> to vector<16x3xbf16>
    %c4_515 = arith.constant 4 : index
    %c12_516 = arith.constant 12 : index
    %c0_517 = arith.constant 0 : index
    %401 = vector.load %arg10[%c4_515, %c12_516, %c0_517] : memref<6x18x16xbf16, #tpu.memory_space<vmem>>, vector<1x3x16xbf16>
    %402 = vector.shape_cast %401 : vector<1x3x16xbf16> to vector<3x16xbf16>
    %cst_518 = arith.constant dense<0.000000e+00> : vector<16x16xf32>
    %403 = tpu.matmul %400, %402, %cst_518 {dimension_numbers = #tpu.dot_dimension_numbers<[1], [0], [0], [1], [0, 0, 1, 1], [], []>} : vector<16x3xbf16>, vector<3x16xbf16>, vector<16x16xf32> -> vector<16x16xf32>
    %404 = arith.addf %398, %403 : vector<16x16xf32>
    %c0_519 = arith.constant 0 : index
    %c0_520 = arith.constant 0 : index
    %c2_521 = arith.constant 2 : index
    %c0_522 = arith.constant 0 : index
    %405 = vector.load %arg9[%c0_519, %c0_520, %c2_521, %c0_522] : memref<1x2x18x3xbf16, #tpu.memory_space<vmem>>, vector<1x1x16x3xbf16>
    %406 = vector.shape_cast %405 : vector<1x1x16x3xbf16> to vector<16x3xbf16>
    %c4_523 = arith.constant 4 : index
    %c15_524 = arith.constant 15 : index
    %c0_525 = arith.constant 0 : index
    %407 = vector.load %arg10[%c4_523, %c15_524, %c0_525] : memref<6x18x16xbf16, #tpu.memory_space<vmem>>, vector<1x3x16xbf16>
    %408 = vector.shape_cast %407 : vector<1x3x16xbf16> to vector<3x16xbf16>
    %cst_526 = arith.constant dense<0.000000e+00> : vector<16x16xf32>
    %409 = tpu.matmul %406, %408, %cst_526 {dimension_numbers = #tpu.dot_dimension_numbers<[1], [0], [0], [1], [0, 0, 1, 1], [], []>} : vector<16x3xbf16>, vector<3x16xbf16>, vector<16x16xf32> -> vector<16x16xf32>
    %410 = arith.addf %404, %409 : vector<16x16xf32>
    %c0_527 = arith.constant 0 : index
    %c1_528 = arith.constant 1 : index
    %c0_529 = arith.constant 0 : index
    %c0_530 = arith.constant 0 : index
    %411 = vector.load %arg5[%c0_527, %c1_528, %c0_529, %c0_530] : memref<1x2x18x3xbf16, #tpu.memory_space<vmem>>, vector<1x1x16x3xbf16>
    %412 = vector.shape_cast %411 : vector<1x1x16x3xbf16> to vector<16x3xbf16>
    %c5_531 = arith.constant 5 : index
    %c0_532 = arith.constant 0 : index
    %c0_533 = arith.constant 0 : index
    %413 = vector.load %arg10[%c5_531, %c0_532, %c0_533] : memref<6x18x16xbf16, #tpu.memory_space<vmem>>, vector<1x3x16xbf16>
    %414 = vector.shape_cast %413 : vector<1x3x16xbf16> to vector<3x16xbf16>
    %cst_534 = arith.constant dense<0.000000e+00> : vector<16x16xf32>
    %415 = tpu.matmul %412, %414, %cst_534 {dimension_numbers = #tpu.dot_dimension_numbers<[1], [0], [0], [1], [0, 0, 1, 1], [], []>} : vector<16x3xbf16>, vector<3x16xbf16>, vector<16x16xf32> -> vector<16x16xf32>
    %416 = arith.addf %410, %415 : vector<16x16xf32>
    %c0_535 = arith.constant 0 : index
    %c1_536 = arith.constant 1 : index
    %c0_537 = arith.constant 0 : index
    %c0_538 = arith.constant 0 : index
    %417 = vector.load %arg9[%c0_535, %c1_536, %c0_537, %c0_538] : memref<1x2x18x3xbf16, #tpu.memory_space<vmem>>, vector<1x1x16x3xbf16>
    %418 = vector.shape_cast %417 : vector<1x1x16x3xbf16> to vector<16x3xbf16>
    %c5_539 = arith.constant 5 : index
    %c3_540 = arith.constant 3 : index
    %c0_541 = arith.constant 0 : index
    %419 = vector.load %arg10[%c5_539, %c3_540, %c0_541] : memref<6x18x16xbf16, #tpu.memory_space<vmem>>, vector<1x3x16xbf16>
    %420 = vector.shape_cast %419 : vector<1x3x16xbf16> to vector<3x16xbf16>
    %cst_542 = arith.constant dense<0.000000e+00> : vector<16x16xf32>
    %421 = tpu.matmul %418, %420, %cst_542 {dimension_numbers = #tpu.dot_dimension_numbers<[1], [0], [0], [1], [0, 0, 1, 1], [], []>} : vector<16x3xbf16>, vector<3x16xbf16>, vector<16x16xf32> -> vector<16x16xf32>
    %422 = arith.addf %416, %421 : vector<16x16xf32>
    %c0_543 = arith.constant 0 : index
    %c1_544 = arith.constant 1 : index
    %c1_545 = arith.constant 1 : index
    %c0_546 = arith.constant 0 : index
    %423 = vector.load %arg5[%c0_543, %c1_544, %c1_545, %c0_546] : memref<1x2x18x3xbf16, #tpu.memory_space<vmem>>, vector<1x1x16x3xbf16>
    %424 = vector.shape_cast %423 : vector<1x1x16x3xbf16> to vector<16x3xbf16>
    %c5_547 = arith.constant 5 : index
    %c6_548 = arith.constant 6 : index
    %c0_549 = arith.constant 0 : index
    %425 = vector.load %arg10[%c5_547, %c6_548, %c0_549] : memref<6x18x16xbf16, #tpu.memory_space<vmem>>, vector<1x3x16xbf16>
    %426 = vector.shape_cast %425 : vector<1x3x16xbf16> to vector<3x16xbf16>
    %cst_550 = arith.constant dense<0.000000e+00> : vector<16x16xf32>
    %427 = tpu.matmul %424, %426, %cst_550 {dimension_numbers = #tpu.dot_dimension_numbers<[1], [0], [0], [1], [0, 0, 1, 1], [], []>} : vector<16x3xbf16>, vector<3x16xbf16>, vector<16x16xf32> -> vector<16x16xf32>
    %428 = arith.addf %422, %427 : vector<16x16xf32>
    %c0_551 = arith.constant 0 : index
    %c1_552 = arith.constant 1 : index
    %c1_553 = arith.constant 1 : index
    %c0_554 = arith.constant 0 : index
    %429 = vector.load %arg9[%c0_551, %c1_552, %c1_553, %c0_554] : memref<1x2x18x3xbf16, #tpu.memory_space<vmem>>, vector<1x1x16x3xbf16>
    %430 = vector.shape_cast %429 : vector<1x1x16x3xbf16> to vector<16x3xbf16>
    %c5_555 = arith.constant 5 : index
    %c9_556 = arith.constant 9 : index
    %c0_557 = arith.constant 0 : index
    %431 = vector.load %arg10[%c5_555, %c9_556, %c0_557] : memref<6x18x16xbf16, #tpu.memory_space<vmem>>, vector<1x3x16xbf16>
    %432 = vector.shape_cast %431 : vector<1x3x16xbf16> to vector<3x16xbf16>
    %cst_558 = arith.constant dense<0.000000e+00> : vector<16x16xf32>
    %433 = tpu.matmul %430, %432, %cst_558 {dimension_numbers = #tpu.dot_dimension_numbers<[1], [0], [0], [1], [0, 0, 1, 1], [], []>} : vector<16x3xbf16>, vector<3x16xbf16>, vector<16x16xf32> -> vector<16x16xf32>
    %434 = arith.addf %428, %433 : vector<16x16xf32>
    %c0_559 = arith.constant 0 : index
    %c1_560 = arith.constant 1 : index
    %c2_561 = arith.constant 2 : index
    %c0_562 = arith.constant 0 : index
    %435 = vector.load %arg5[%c0_559, %c1_560, %c2_561, %c0_562] : memref<1x2x18x3xbf16, #tpu.memory_space<vmem>>, vector<1x1x16x3xbf16>
    %436 = vector.shape_cast %435 : vector<1x1x16x3xbf16> to vector<16x3xbf16>
    %c5_563 = arith.constant 5 : index
    %c12_564 = arith.constant 12 : index
    %c0_565 = arith.constant 0 : index
    %437 = vector.load %arg10[%c5_563, %c12_564, %c0_565] : memref<6x18x16xbf16, #tpu.memory_space<vmem>>, vector<1x3x16xbf16>
    %438 = vector.shape_cast %437 : vector<1x3x16xbf16> to vector<3x16xbf16>
    %cst_566 = arith.constant dense<0.000000e+00> : vector<16x16xf32>
    %439 = tpu.matmul %436, %438, %cst_566 {dimension_numbers = #tpu.dot_dimension_numbers<[1], [0], [0], [1], [0, 0, 1, 1], [], []>} : vector<16x3xbf16>, vector<3x16xbf16>, vector<16x16xf32> -> vector<16x16xf32>
    %440 = arith.addf %434, %439 : vector<16x16xf32>
    %c0_567 = arith.constant 0 : index
    %c1_568 = arith.constant 1 : index
    %c2_569 = arith.constant 2 : index
    %c0_570 = arith.constant 0 : index
    %441 = vector.load %arg9[%c0_567, %c1_568, %c2_569, %c0_570] : memref<1x2x18x3xbf16, #tpu.memory_space<vmem>>, vector<1x1x16x3xbf16>
    %442 = vector.shape_cast %441 : vector<1x1x16x3xbf16> to vector<16x3xbf16>
    %c5_571 = arith.constant 5 : index
    %c15_572 = arith.constant 15 : index
    %c0_573 = arith.constant 0 : index
    %443 = vector.load %arg10[%c5_571, %c15_572, %c0_573] : memref<6x18x16xbf16, #tpu.memory_space<vmem>>, vector<1x3x16xbf16>
    %444 = vector.shape_cast %443 : vector<1x3x16xbf16> to vector<3x16xbf16>
    %cst_574 = arith.constant dense<0.000000e+00> : vector<16x16xf32>
    %445 = tpu.matmul %442, %444, %cst_574 {dimension_numbers = #tpu.dot_dimension_numbers<[1], [0], [0], [1], [0, 0, 1, 1], [], []>} : vector<16x3xbf16>, vector<3x16xbf16>, vector<16x16xf32> -> vector<16x16xf32>
    %446 = arith.addf %440, %445 : vector<16x16xf32>
    %447 = vector.broadcast %0 : vector<1x16xf32> to vector<16x16xf32>
    %448 = arith.mulf %446, %447 : vector<16x16xf32>
    %449 = vector.broadcast %1 : vector<1x16xf32> to vector<16x16xf32>
    %450 = arith.addf %448, %449 : vector<16x16xf32>
    %cst_575 = arith.constant 0.000000e+00 : f32
    %451 = vector.broadcast %cst_575 : f32 to vector<16x16xf32>
    %452 = arith.subf %451, %450 : vector<16x16xf32>
    %453 = math.exp %452 : vector<16x16xf32>
    %cst_576 = arith.constant 1.000000e+00 : f32
    %454 = vector.broadcast %cst_576 : f32 to vector<16x16xf32>
    %455 = arith.addf %454, %453 : vector<16x16xf32>
    %456 = tpu.reciprocal %455 : vector<16x16xf32> -> vector<16x16xf32>
    %457 = arith.mulf %450, %456 : vector<16x16xf32>
    %458 = arith.truncf %457 : vector<16x16xf32> to vector<16x16xbf16>
    %c0_577 = arith.constant 0 : index
    %c1_578 = arith.constant 1 : index
    %c0_579 = arith.constant 0 : index
    %c0_580 = arith.constant 0 : index
    %459 = vector.load %arg13[%c0_577, %c1_578, %c0_579, %c0_580] : memref<1x2x16x16xbf16, #tpu.memory_space<vmem>>, vector<1x1x16x16xbf16>
    %460 = vector.shape_cast %459 : vector<1x1x16x16xbf16> to vector<16x16xbf16>
    %461 = vector.shape_cast %458 : vector<16x16xbf16> to vector<1x1x16x16xbf16>
    tpu.vector_store %arg13[%c0_577, %c1_578, %c0_579, %c0_580], %461 {strides = array<i32>} : memref<1x2x16x16xbf16, #tpu.memory_space<vmem>>, vector<1x1x16x16xbf16>,
    return
  }
  func.func @transform_0(%arg0: i32, %arg1: i32) -> (i32, i32, i32, i32) {
    %c2_i32 = arith.constant 2 : i32
    %0 = arith.muli %arg1, %c2_i32 : i32
    %c0_i32 = arith.constant 0 : i32
    %1 = arith.addi %0, %c0_i32 : i32
    %c0_i32_0 = arith.constant 0 : i32
    %c0_i32_1 = arith.constant 0 : i32
    %c0_i32_2 = arith.constant 0 : i32
    return %arg0, %1, %c0_i32_0, %c0_i32_1 : i32, i32, i32, i32
  }
  func.func @transform_1(%arg0: i32, %arg1: i32) -> (i32, i32, i32, i32) {
    %c2_i32 = arith.constant 2 : i32
    %0 = arith.muli %arg1, %c2_i32 : i32
    %c1_i32 = arith.constant 1 : i32
    %1 = arith.addi %0, %c1_i32 : i32
    %c0_i32 = arith.constant 0 : i32
    %c0_i32_0 = arith.constant 0 : i32
    %c0_i32_1 = arith.constant 0 : i32
    return %arg0, %1, %c0_i32, %c0_i32_0 : i32, i32, i32, i32
  }
  func.func @transform_2(%arg0: i32, %arg1: i32) -> (i32, i32, i32, i32) {
    %c2_i32 = arith.constant 2 : i32
    %0 = arith.muli %arg1, %c2_i32 : i32
    %c2_i32_0 = arith.constant 2 : i32
    %1 = arith.addi %0, %c2_i32_0 : i32
    %c0_i32 = arith.constant 0 : i32
    %c0_i32_1 = arith.constant 0 : i32
    %c0_i32_2 = arith.constant 0 : i32
    return %arg0, %1, %c0_i32, %c0_i32_1 : i32, i32, i32, i32
  }
  func.func @transform_3(%arg0: i32, %arg1: i32) -> (i32, i32, i32, i32) {
    %c2_i32 = arith.constant 2 : i32
    %0 = arith.muli %arg1, %c2_i32 : i32
    %c3_i32 = arith.constant 3 : i32
    %1 = arith.addi %0, %c3_i32 : i32
    %c0_i32 = arith.constant 0 : i32
    %c0_i32_0 = arith.constant 0 : i32
    %c0_i32_1 = arith.constant 0 : i32
    return %arg0, %1, %c0_i32, %c0_i32_0 : i32, i32, i32, i32
  }
  func.func @transform_4(%arg0: i32, %arg1: i32) -> (i32, i32, i32, i32) {
    %c2_i32 = arith.constant 2 : i32
    %0 = arith.muli %arg1, %c2_i32 : i32
    %c0_i32 = arith.constant 0 : i32
    %1 = arith.addi %0, %c0_i32 : i32
    %c0_i32_0 = arith.constant 0 : i32
    %c0_i32_1 = arith.constant 0 : i32
    %c0_i32_2 = arith.constant 0 : i32
    return %arg0, %1, %c0_i32_0, %c0_i32_1 : i32, i32, i32, i32
  }
  func.func @transform_5(%arg0: i32, %arg1: i32) -> (i32, i32, i32, i32) {
    %c2_i32 = arith.constant 2 : i32
    %0 = arith.muli %arg1, %c2_i32 : i32
    %c1_i32 = arith.constant 1 : i32
    %1 = arith.addi %0, %c1_i32 : i32
    %c0_i32 = arith.constant 0 : i32
    %c0_i32_0 = arith.constant 0 : i32
    %c0_i32_1 = arith.constant 0 : i32
    return %arg0, %1, %c0_i32, %c0_i32_0 : i32, i32, i32, i32
  }
  func.func @transform_6(%arg0: i32, %arg1: i32) -> (i32, i32, i32, i32) {
    %c2_i32 = arith.constant 2 : i32
    %0 = arith.muli %arg1, %c2_i32 : i32
    %c2_i32_0 = arith.constant 2 : i32
    %1 = arith.addi %0, %c2_i32_0 : i32
    %c0_i32 = arith.constant 0 : i32
    %c0_i32_1 = arith.constant 0 : i32
    %c0_i32_2 = arith.constant 0 : i32
    return %arg0, %1, %c0_i32, %c0_i32_1 : i32, i32, i32, i32
  }
  func.func @transform_7(%arg0: i32, %arg1: i32) -> (i32, i32, i32, i32) {
    %c2_i32 = arith.constant 2 : i32
    %0 = arith.muli %arg1, %c2_i32 : i32
    %c3_i32 = arith.constant 3 : i32
    %1 = arith.addi %0, %c3_i32 : i32
    %c0_i32 = arith.constant 0 : i32
    %c0_i32_0 = arith.constant 0 : i32
    %c0_i32_1 = arith.constant 0 : i32
    return %arg0, %1, %c0_i32, %c0_i32_0 : i32, i32, i32, i32
  }
  func.func @transform_8(%arg0: i32, %arg1: i32) -> (i32, i32, i32) {
    %c0_i32 = arith.constant 0 : i32
    %c0_i32_0 = arith.constant 0 : i32
    %c0_i32_1 = arith.constant 0 : i32
    %c0_i32_2 = arith.constant 0 : i32
    return %c0_i32, %c0_i32_0, %c0_i32_1 : i32, i32, i32
  }
  func.func @transform_9(%arg0: i32, %arg1: i32) -> (i32, i32) {
    %c0_i32 = arith.constant 0 : i32
    %c0_i32_0 = arith.constant 0 : i32
    %c0_i32_1 = arith.constant 0 : i32
    return %c0_i32, %c0_i32_0 : i32, i32
  }
  func.func @transform_10(%arg0: i32, %arg1: i32) -> (i32, i32) {
    %c0_i32 = arith.constant 0 : i32
    %c0_i32_0 = arith.constant 0 : i32
    %c0_i32_1 = arith.constant 0 : i32
    return %c0_i32, %c0_i32_0 : i32, i32
  }
  func.func @transform_11(%arg0: i32, %arg1: i32) -> (i32, i32, i32, i32) {
    %c0_i32 = arith.constant 0 : i32
    %c0_i32_0 = arith.constant 0 : i32
    %c0_i32_1 = arith.constant 0 : i32
    return %arg0, %arg1, %c0_i32, %c0_i32_0 : i32, i32, i32, i32
  }
}

</mosaic_0001>

<bundles_post_ra>
// kernel: tpu_custom_call.1
= control target key start
LH: loop header
LB: loop body
LE: loop exit
PB: predicated region body
PF: predicated region fallthrough
CT: control target
= control target key end

     0   :  { %s9042_s0 = inlined_call_operand.vmem [shape: bf16[2,36,18,3], index: 0, kind: input, shape index: {}]   ;;  %s9043_s1 = inlined_call_operand.vmem [shape: bf16[2,36,18,3], index: 1, kind: input, shape index: {}]   ;;  %s9044_s2 = inlined_call_operand.vmem [shape: bf16[2,36,18,3], index: 2, kind: input, shape index: {}]   ;;  %s9045_s3 = inlined_call_operand.vmem [shape: bf16[2,36,18,3], index: 3, kind: input, shape index: {}]   ;;  %s9046_s4 = inlined_call_operand.vmem [shape: bf16[2,36,18,3], index: 4, kind: input, shape index: {}]   ;;  %s9047_s5 = inlined_call_operand.vmem [shape: bf16[2,36,18,3], index: 5, kind: input, shape index: {}]   ;;  %s9048_s6 = inlined_call_operand.vmem [shape: bf16[2,36,18,3], index: 6, kind: input, shape index: {}]   ;;  %s9049_s7 = inlined_call_operand.vmem [shape: bf16[2,36,18,3], index: 7, kind: input, shape index: {}]   ;;  %s9050_s8 = inlined_call_operand.vmem [shape: bf16[6,18,16], index: 8, kind: input, shape index: {}]   ;;  %s9051_s9 = inlined_call_operand.vmem [shape: f32[1,16], index: 9, kind: input, shape index: {}]   ;;  %s9052_s10 = inlined_call_operand.vmem [shape: f32[1,16], index: 10, kind: input, shape index: {}]   ;;  %s9053_s11 = inlined_call_operand.hbm [shape: bf16[2,16,16,16], index: 11, kind: output, shape index: {}]  }
   0x1   :  { %9060 = sst [smem:[#allocation12_spill]] %s9042_s0 }
   0x2   :  { %9061 = sst [smem:[#allocation13_spill]] %s9043_s1 }
   0x3   :  { %9062 = sst [smem:[#allocation14_spill]] %s9046_s4 }
   0x4   :  { %16 = vsyncpa [#allocation3], 0 }
   0x5   :  { %18 = vsyncpa [#allocation3 + $0x1], 0  ;;  %s7897_s17 = smov 0   ;;  %s7899_s18 = smov 0  }
   0x6   :  { %s7901_s19 = smov 0   ;;  %s7903_s20 = smov 0  }
   0x7   :  { %s7905_s21 = smov 0   ;;  %s7907_s22 = smov 0  }
   0x8   :  { %s7909_s23 = smov 0   ;;  %s7911_s24 = smov 0  }
   0x9 LB: > { %9063 = sst [smem:[#allocation5_spill]] %s7809_s19  ;;  %s6160_s25 = sadd.s32 4294967295, %s7829_s24   ;;  %s7829_s24 = sphi %s7911_s24, %s24_s24   ;;  %s7825_s23 = sphi %s7909_s23, %s9084_s23   ;;  %s7821_s22 = sphi %s7907_s22, %s9080_s22   ;;  %s7817_s21 = sphi %s7905_s21, %s9079_s21   ;;  %s7813_s20 = sphi %s7903_s20, %s9078_s20   ;;  %s7809_s19 = sphi %s7901_s19, %s9077_s19   ;;  %s7805_s18 = sphi %s7899_s18, %s9083_s18   ;;  %s7801_s17 = sphi %s7897_s17, %s9082_s17  }
   0xa   : > { %9064 = sst [smem:[#allocation6_spill]] %s7821_s22  ;;  %s6161_s26 = sadd.s32 4294967294, %s7829_s24  }
   0xb   : > { %9065 = sst [smem:[#allocation7_spill]] %s7825_s23  ;;  %s33_s27 = sadd.s32 1, %s7821_s22 }
   0xc   : > { %p34_p0 = scmp.ge.s32.totalorder %s33_s27, 8  ;;  %s36_s28 = sadd.s32 1, %s7825_s23 }
   0xd   : > { %p370_p1 = scmp.ne.s32.totalorder %s7809_s19, %s7805_s18  ;;  %p371_p2 = scmp.eq.s32.totalorder %s6160_s25, 15 }
   0xe   : > { %s9086_s27 = smov (%p34_p0, %s33_s27), 0  ;;  %s9088_s28 = smov (!%p34_p0, %s36_s28), %s7825_s23 }
   0xf   : > { %9066 = sst [smem:[#allocation8_spill]] %s9086_s27  ;;  %s356_s29 = ssub.s32 %s7821_s22, %s9086_s27 }
  0x10   : > { %p7948_p3 = por %p371_p2, %p370_p1  ;;  %p38_p4 = scmp.ge.s32.totalorder %s9088_s28, 2 }
  0x11   : > { %p376_p5 = scmp.ne.s32.totalorder %s7805_s18, %s7801_s17  ;;  %p377_p6 = scmp.eq.s32.totalorder %s6161_s26, 15 }
  0x12   : > { %p6180_p7 = scmp.ge.s32.totalorder %s7829_s24, 1  ;;  %s9090_s28 = smov (%p38_p4, %s9088_s28), 0 }
  0x13   : > { %9068 = sst [smem:[#allocation9_spill]] %s9090_s28  ;;  %p7957_p8 = por %p377_p6, %p376_p5 }
  0x14   : > { %p544_p9 = scmp.lt.s32.totalorder %s7829_s24, 17  ;;  %s355_s13 = ssub.s32 %s7825_s23, %s9090_s28 }
  0x15   : > { %s9069_s12 = scalar_select %p7957_p8, 1, 0 }
  0x16   : > { %s360_s14 = sadd.s32 1, %s7809_s19  ;;  %s357_s15 = sor.u32 %s356_s29, %s355_s13 }
  0x17   : > { %9070 = sst [smem:[#allocation10_spill]] %s9069_s12  ;;  %p545_p10 = pnand %p6180_p7, %p544_p9 }
  0x18   : > { %p358_p11 = scmp.eq.s32.totalorder %s357_s15, 0  ;;  %v7563_v0 = vld [vmem:[%s9050_s8] ss:$0 sps:$4 sm:$0x66] (!%p545_p10)   ;;  %v7831_v1 = vmov (!%p545_p10), 0.0   ;;  %vm819_vm0 = vcmask (!%p545_p10), 1040384  }
  0x19   : > { %548 = sbr.rel (%p545_p10) target bundleno = 728 (0x2d8), region = 64  ;;  %6770 = vmatprep.subr.bf16.mxu0 (!%p545_p10), %v7831_v1  ;;  %6986 = vmatprep.subr.bf16.mxu1 (!%p545_p10), %v7831_v1  ;;  %vm820_vm1 = vcmask (!%p545_p10), 1041408   ;;  %v808_v2 = vshrl.u32 (!%p545_p10), %v7563_v0, 16  ;;  %v811_v3 = vshll.u32 (!%p545_p10), %v7563_v0, 16  ;;  %v7832_v4 = vmov (!%p545_p10), 65535   ;;  %s7981_s27 = sshll.u32 (!%p545_p10), %s7813_s20, 2 }
  0x1a   : > { %s7966_s16 = scalar_select %p358_p11, %s7809_s19, %s360_s14  }
  0x1b   : > { %v821_v5 = vsel (!%p545_p10), %vm819_vm0, 4294967295, %v7832_v4  ;;  %v7564_v6 = vld [vmem:[%s9050_s8] ss:$0 sps:$4 sm:$0x66] (!%p545_p10)   ;;  %vm7833_vm2 = vmmov (!%p545_p10), 0   ;;  %p675_p12 = scmp.lt.s32.totalorder (!%p545_p10), %s7817_s21, 1 }
  0x1c   : > { %9071 = sst [smem:[#allocation11_spill]] %s7966_s16  ;;  %6772 = vmatprep.mubr.msk.bf16.mxu0 (!%p545_p10), %vm7833_vm2, %v7831_v1  ;;  %6988 = vmatprep.mubr.msk.bf16.mxu1 (!%p545_p10), %vm7833_vm2, %v7831_v1  ;;  %v810_v7 = vrot.slane (!%p545_p10), %v808_v2, 1  ;;  %v813_v8 = vrot.slane (!%p545_p10), %v811_v3, 2  ;;  %v3381_v9 = vshrl.u32 (!%p545_p10), %v7564_v6, 16  ;;  %v3384_v10 = vshll.u32 (!%p545_p10), %v7564_v6, 16  ;;  %p677_p13 = scmp.lt.s32.totalorder (!%p545_p10), %s7981_s27, 35 }
  0x1d   : > { %s6603_s13 = sadd.s32 (!%p545_p10), 2, %s7981_s27  ;;  %v7987_v11 = vsel (!%p545_p10), %vm820_vm1, %v821_v5, 0  ;;  %v795_v17 = vld [vmem:[%s9050_s8] sm:$0x3] (!%p545_p10)  ;;  %s9072_s4 = sld [smem:[#allocation14_spill]] (!%p545_p10)  ;;  %vm815_vm3 = vcmask (!%p545_p10), 23552  }
  0x1e   : > { %v814_v12 = vor.u32 (!%p545_p10), %v813_v8, %v810_v7  ;;  %v3383_v13 = vrot.slane (!%p545_p10), %v3381_v9, 1  ;;  %v3386_v14 = vrot.slane (!%p545_p10), %v3384_v10, 2  ;;  %p691_p0 = scmp.lt.s32.totalorder (!%p545_p10), %s6603_s13, 35  ;;  %v876_v19 = vand.u32 (!%p545_p10), %v7987_v11, %v795_v17  ;;  %v3368_v20 = vld [vmem:[%s9050_s8] sm:$0x3] (!%p545_p10)  ;;  %s9073_s0 = sld [smem:[#allocation12_spill]] (!%p545_p10) }
  0x1f   : > { %v3444_v22 = vand.u32 (!%p545_p10), %v3368_v20, %v7987_v11  ;;  %v7569_v23 = vld [vmem:[%s9050_s8] sm:$0x18] (!%p545_p10)   ;;  %s9074_s1 = sld [smem:[#allocation13_spill]] (!%p545_p10)  ;;  %vm932_vm4 = vsmask.f32 (!%p545_p10), 7424  ;;  %vm1088_vm5 = vcmask (!%p545_p10), 1046528  }
  0x20   : > { %s676_s14 = scalar_select %p675_p12, %s7817_s21, 1  ;;  %v824_v15 = vand.u32 %v7987_v11, %v814_v12  ;;  %v3387_v16 = vor.u32 %v3386_v14, %v3383_v13  ;;  %v7570_v27 = vld [vmem:[%s9050_s8] sm:$0x18]   ;;  %v950_v31 = vrot.slane %v7569_v23, 3  ;;  %vm3363_vm6 = vcmask 125952  }
  0x21   : > { %s678_s15 = scalar_select %p677_p13, %s7981_s27, 35  ;;  %v7575_v28 = vld [vmem:[%s9050_s8 + $0x4] ss:$0 sps:$4 sm:$0x33]   ;;  %v3517_v36 = vrot.slane %v7570_v27, 3 }
  0x22   : > { %s7991_s20 = smul.u32 108, %s676_s14  ;;  %s9092_s13 = smov (!%p691_p0, %s6603_s13), 35  ;;  %6771 = vmatpush3.bf16.msra.mxu0 %v824_v15  ;;  %v3392_v18 = vand.u32 %v3387_v16, %v7987_v11  ;;  %v7576_v34 = vld [vmem:[%s9050_s8 + $0x4] ss:$0 sps:$4 sm:$0x33]   ;;  %v1030_v37 = vshll.u32 %v7575_v28, 16  ;;  %v955_v38 = vand.u32 %v950_v31, %v7987_v11 }
  0x23   : > { %s7482_s25 = smul.u32 3, %s678_s15  ;;  %6776 = vmatprep.subr.bf16.mxu0 %v7831_v1  ;;  %v3597_v44 = vshll.u32 %v7576_v34, 16  ;;  %v3522_v45 = vand.u32 %v3517_v36, %v7987_v11  ;;  %v1028_v46 = vshrl.u32 %v7575_v28, 16  ;;  %v3595_v51 = vshrl.u32 %v7576_v34, 16  ;;  %v7586_v31 = vld [vmem:[%s9050_s8 + $0x4] sm:$0x18]  }
  0x24   : > { %s7484_s22 = smul.u32 3, %s9092_s13  ;;  %6987 = vmatpush3.bf16.msra.mxu1 %v3392_v18  ;;  %v1032_v47 = vrot.slane %v1030_v37, 1  ;;  %v7581_v17 = vld [vmem:[%s9050_s8 + $0x4] ss:$0 sps:$4 sm:$0xcc]   ;;  %s6607_s14 = sadd.s32 6, %s7981_s27 }
  0x25   : > { %s681_s28 = sadd.s32 %s7991_s20, %s7482_s25  ;;  %6992 = vmatprep.subr.bf16.mxu1 %v7831_v1  ;;  %v3599_v57 = vrot.slane %v3597_v44, 1  ;;  %s6605_s25 = sadd.s32 4, %s7981_s27 }
  0x26   : > { %s6184_s23 = sshll.u32 %s681_s28, 2  ;;  %s695_s13 = sadd.s32 %s7484_s22, %s7991_s20  ;;  %v1033_v62 = vor.u32 %v1032_v47, %v1028_v46 }
  0x27   : > { %s8003_s19 = scalar_lea.vmem %s9072_s4, %s6184_s23  ;;  %s8012_s28 = scalar_lea.vmem %s9073_s0, %s6184_s23  ;;  %v3600_v5 = vor.u32 %v3599_v57, %v3595_v51 }
  0x28   : > { %v7565_v21 = vld [vmem:[%s8003_s19] sm:$0xff]   ;;  %s6187_s16 = sshll.u32 %s695_s13, 2  ;;  %v8062_v39 = vld [vmem:[%s8012_s28 + $0x8] ss:$0 sps:$4 sm:$0x11]   ;;  %v1038_v7 = vand.u32 %v1033_v62, %v7987_v11  ;;  %p706_p1 = scmp.lt.s32.totalorder %s6605_s25, 35 }
  0x29   : > { %s8020_s12 = scalar_lea.vmem %s9047_s5, %s6187_s16  ;;  %6773 = vmatmul.mubr.msk.bf16.vlgmr.msra.gmra.mrb[0].mxu0 %vm815_vm3, %v7565_v21  ;;  %v919_v24 = vld [vmem:[%s8012_s28] sm:$0xf]  ;;  %s8031_s29 = scalar_lea.vmem %s9074_s1, %s6187_s16  ;;  %v8038_v26 = vld [vmem:[%s8012_s28 + $0x4] sm:$0xf]  ;;  %v941_v50 = vshll.u32 %v8062_v39, 16  ;;  %v3605_v15 = vand.u32 %v3600_v5, %v7987_v11 }
  0x2a   : > { %v7566_v25 = vld [vmem:[%s8020_s12] sm:$0xff]   ;;  %6777 = vmatpush3.bf16.msra.mxu0 %v876_v19  ;;  %6778 = vmatprep.mubr.msk.bf16.mxu0 %vm7833_vm2, %v7831_v1  ;;  %v6211_v32 = vcombine.low %v919_v24, %v8038_v26  ;;  %v8065_v41 = vld [vmem:[%s8031_s29 + $0x8] ss:$0 sps:$4 sm:$0x11]   ;;  %v1095_v24 = vrot.slane %v7581_v17, 2  ;;  %s9094_s25 = smov (!%p706_p1, %s6605_s25), 35 }
  0x2b   : > { %6782 = vmatprep.subr.bf16.mxu0 %v7831_v1  ;;  %6989 = vmatmul.mubr.msk.bf16.vlgmr.msra.gmra.mrb[0].mxu1 %vm815_vm3, %v7566_v25  ;;  %v3487_v29 = vld [vmem:[%s8031_s29] sm:$0xf]  ;;  %v8051_v30 = vld [vmem:[%s8031_s29 + $0x4] sm:$0xf]  ;;  %v3508_v54 = vshll.u32 %v8065_v41, 16  ;;  %v943_v61 = vrot.slane %v941_v50, 1 }
  0x2c   : > { %6993 = vmatpush3.bf16.msra.mxu1 %v3444_v22  ;;  %6994 = vmatprep.mubr.msk.bf16.mxu1 %vm7833_vm2, %v7831_v1  ;;  %v6405_v33 = vcombine.low %v3487_v29, %v8051_v30  ;;  %v7567_v35 = vld [vmem:[%s8012_s28] sm:$0xff]   ;;  %v936_v40 = vshll.u32 %v6211_v32, 16  ;;  %v934_v48 = vshrl.u32 %v6211_v32, 16  ;;  %v8089_v0 = vld [vmem:[%s8003_s19 + $0x8] ss:$0 sps:$4 sm:$0x11]  }
  0x2d   : > { %6998 = vmatprep.subr.bf16.mxu1 %v7831_v1  ;;  %v7568_v42 = vld [vmem:[%s8031_s29] sm:$0xff]   ;;  %v3510_v4 = vrot.slane %v3508_v54, 1  ;;  %v1020_v10 = vshll.u32 %v8089_v0, 16  ;;  %v8096_v12 = vld [vmem:[%s8020_s12 + $0x8] ss:$0 sps:$4 sm:$0x11]  }
  0x2e   : > { %v3503_v43 = vshll.u32 %v6405_v33, 16  ;;  %v938_v49 = vrot.slane %v936_v40, 1  ;;  %v1000_v52 = vld [vmem:[%s8003_s19] sm:$0xf]  ;;  %v3501_v53 = vshrl.u32 %v6405_v33, 16  ;;  %v3587_v21 = vshll.u32 %v8096_v12, 16 }
  0x2f   : > { %v8077_v55 = vld [vmem:[%s8003_s19 + $0x4] sm:$0xf]  ;;  %v3567_v58 = vld [vmem:[%s8020_s12] sm:$0xf]  ;;  %v1022_v23 = vrot.slane %v1020_v10, 1  ;;  %v1100_v33 = vand.u32 %v1095_v24, %v7987_v11  ;;  %v3726_v40 = vshrl.u32 %v7586_v31, 16 }
  0x30   : > { %v3505_v56 = vrot.slane %v3503_v43, 1  ;;  %v8084_v59 = vld [vmem:[%s8020_s12 + $0x4] sm:$0xf]  ;;  %v939_v60 = vor.u32 %v938_v49, %v934_v48  ;;  %v6215_v63 = vcombine.low %v1000_v52, %v8077_v55  ;;  %v3589_v28 = vrot.slane %v3587_v21, 1  ;;  %v1083_v36 = vld [vmem:[%s8012_s28] sm:$0xe] }
  0x31   : > { %v6409_v2 = vcombine.low %v3567_v58, %v8084_v59  ;;  %v7582_v19 = vld [vmem:[%s9050_s8 + $0x4] ss:$0 sps:$4 sm:$0xcc]   ;;  %v7585_v25 = vld [vmem:[%s9050_s8 + $0x4] sm:$0x18]   ;;  %v6219_v43 = vcombine.low %v1083_v36, %v8038_v26  ;;  %s7485_s23 = smul.u32 3, %s9094_s25 }
  0x32   : > { %v3506_v3 = vor.u32 %v3505_v56, %v3501_v53  ;;  %v944_v6 = vsel %vm932_vm4, %v939_v60, %v943_v61  ;;  %v1015_v8 = vshll.u32 %v6215_v63, 16  ;;  %v1013_v9 = vshrl.u32 %v6215_v63, 16  ;;  %v3650_v44 = vld [vmem:[%s8031_s29] sm:$0xe]  ;;  %v7589_v21 = vld [vmem:[%s8012_s28 + $0xc] sm:$0xff]   ;;  %p721_p2 = scmp.lt.s32.totalorder %s6607_s14, 35 }
  0x33   : > { %v3582_v13 = vshll.u32 %v6409_v2, 16  ;;  %v3580_v18 = vshrl.u32 %v6409_v2, 16  ;;  %v3661_v29 = vrot.slane %v7582_v19, 2  ;;  %v1160_v34 = vshrl.u32 %v7585_v25, 16  ;;  %s710_s22 = sadd.s32 %s7485_s23, %s7991_s20  ;;  %v6236_v19 = vld [vmem:[%s8012_s28 + $0xc] sm:$0xf] }
  0x34   : > { %v3511_v14 = vsel %vm932_vm4, %v3506_v3, %v3510_v4  ;;  %v1017_v16 = vrot.slane %v1015_v8, 1  ;;  %v6413_v47 = vcombine.low %v3650_v44, %v8051_v30  ;;  %v3728_v48 = vrot.slane %v3726_v40, 3  ;;  %v1145_v30 = vld [vmem:[%s8003_s19] sm:$0xe]  ;;  %s6190_s26 = sshll.u32 %s710_s22, 2  ;;  %s9096_s14 = smov (!%p721_p2, %s6607_s14), 35 }
  0x35   : > { %6779 = vmatmul.mubr.msk.bf16.vlgmr.msra.gmra.mrb[0].mxu0 %vm815_vm3, %v7567_v35  ;;  %v3584_v20 = vrot.slane %v3582_v13, 1  ;;  %v1163_v35 = vshll.u32 %v7585_v25, 16  ;;  %v1089_v50 = vrot.slane %v6219_v43, 1  ;;  %v1090_v26 = vrot.slane %v8062_v39, 1  ;;  %s8154_s13 = scalar_lea.vmem %s9044_s2, %s6190_s26  ;;  %s8172_s25 = scalar_lea.vmem %s9048_s6, %s6190_s26  ;;  %v6430_v25 = vld [vmem:[%s8031_s29 + $0xc] sm:$0xf] }
  0x36   : > { %6783 = vmatpush3.bf16.msra.mxu0 %v955_v38  ;;  %6784 = vmatprep.mubr.msk.bf16.mxu0 %vm7833_vm2, %v7831_v1  ;;  %v1018_v22 = vor.u32 %v1017_v16, %v1013_v9  ;;  %v3666_v38 = vand.u32 %v3661_v29, %v7987_v11  ;;  %v3655_v52 = vrot.slane %v6413_v47, 1  ;;  %v3656_v53 = vrot.slane %v8065_v41, 1  ;;  %v3711_v41 = vld [vmem:[%s8020_s12] sm:$0xe]  ;;  %v7590_v29 = vld [vmem:[%s8031_s29 + $0xc] sm:$0xff]   ;;  %s7486_s26 = smul.u32 3, %s9096_s14 }
  0x37   : > { %6788 = vmatprep.subr.bf16.mxu0 %v7831_v1  ;;  %6995 = vmatmul.mubr.msk.bf16.vlgmr.msra.gmra.mrb[0].mxu1 %vm815_vm3, %v7568_v42  ;;  %v3585_v27 = vor.u32 %v3584_v20, %v3580_v18  ;;  %v3729_v42 = vshll.u32 %v7586_v31, 16  ;;  %v1165_v46 = vrot.slane %v1163_v35, 4  ;;  %v1091_v56 = vsel %vm1088_vm5, %v1089_v50, %v1090_v26  ;;  %v7591_v2 = vld [vmem:[%s9050_s8 + $0xc] ss:$0 sps:$4 sm:$0x66]   ;;  %s6597_s0 = sshll.u32 %s7817_s21, 5 }
  0x38   : > { %6999 = vmatpush3.bf16.msra.mxu1 %v3522_v45  ;;  %7000 = vmatprep.mubr.msk.bf16.mxu1 %vm7833_vm2, %v7831_v1  ;;  %v1023_v32 = vsel %vm932_vm4, %v1018_v22, %v1022_v23  ;;  %v1162_v45 = vrot.slane %v1160_v34, 3  ;;  %v3657_v39 = vsel %vm1088_vm5, %v3655_v52, %v3656_v53  ;;  %v6222_v60 = vcombine.low %v1145_v30, %v8077_v55  ;;  %v6227_v55 = vld [vmem:[%s9050_s8 + $0xc] sm:$0x3]  ;;  %v8195_v20 = vld [vmem:[%s8012_s28 + $0x10] sm:$0xf]  ;;  %s8404_s15 = sadd.s32 %s7486_s26, %s7991_s20  ;;  %s5925_s1 = sadd.s32 %s7981_s27, %s6597_s0 }
  0x39   : > { %7004 = vmatprep.subr.bf16.mxu1 %v7831_v1  ;;  %v3590_v37 = vsel %vm932_vm4, %v3585_v27, %v3589_v28  ;;  %v3731_v49 = vrot.slane %v3729_v42, 4  ;;  %v1152_v61 = vrot.slane %v8089_v0, 1  ;;  %v6416_v62 = vcombine.low %v3711_v41, %v8084_v59  ;;  %v7592_v59 = vld [vmem:[%s9050_s8 + $0xc] ss:$0 sps:$4 sm:$0x66]   ;;  %s6193_s23 = sshll.u32 %s8404_s15, 2 }
  0x3a   : > { %v1166_v51 = vor.u32 %v1165_v46, %v1162_v45  ;;  %v1151_v63 = vrot.slane %v6222_v60, 1  ;;  %v3718_v3 = vrot.slane %v8096_v12, 1  ;;  %v1230_v5 = vand.u32 %v6227_v55, %v7987_v11  ;;  %v8199_v23 = vld [vmem:[%s8012_s28 + $0x14] ss:$0 sps:$4 sm:$0x11]   ;;  %s8417_s4 = scalar_lea.vmem %s9045_s3, %s6193_s23  ;;  %s8455_s26 = scalar_lea.vmem %s9049_s7, %s6193_s23 }
  0x3b   : > { %v3732_v54 = vor.u32 %v3731_v49, %v3728_v48  ;;  %v3717_v0 = vrot.slane %v6416_v62, 1  ;;  %v1291_v8 = vshll.u32 %v7591_v2, 16  ;;  %v3851_v13 = vshrl.u32 %v7592_v59, 16  ;;  %v8204_v27 = vld [vmem:[%s8031_s29 + $0x10] sm:$0xf]  ;;  %s6598_s20 = sshll.u32 %s5925_s1, 6 }
  0x3c   : > { %v1171_v57 = vand.u32 %v1166_v51, %v7987_v11  ;;  %v1153_v4 = vsel %vm1088_vm5, %v1151_v63, %v1152_v61  ;;  %v3854_v12 = vshll.u32 %v7592_v59, 16  ;;  %v6241_v28 = vcombine.low %v6236_v19, %v8195_v20  ;;  %v7596_v34 = vld [vmem:[%s9050_s8 + $0xc] sm:$0x18]   ;;  %v8245_v61 = vld [vmem:[%s8003_s19 + $0x14] ss:$0 sps:$4 sm:$0x11]  }
  0x3d   : > { %v3737_v58 = vand.u32 %v3732_v54, %v7987_v11  ;;  %v3719_v9 = vsel %vm1088_vm5, %v3717_v0, %v3718_v3  ;;  %v3853_v16 = vrot.slane %v3851_v13, 1  ;;  %v7601_v35 = vld [vmem:[%s9050_s8 + $0x10] ss:$0 sps:$4 sm:$0x33]   ;;  %v6245_v40 = vld [vmem:[%s8003_s19 + $0xc] sm:$0xf] }
  0x3e   : > { %v3856_v17 = vrot.slane %v3854_v12, 2  ;;  %v1360_v36 = vshll.u32 %v6241_v28, 16  ;;  %v8230_v42 = vld [vmem:[%s8003_s19 + $0x10] sm:$0xf]  ;;  %v1454_v45 = vshll.u32 %v7601_v35, 16  ;;  %v3937_v48 = vrot.slane %v7596_v34, 3 }
  0x3f   : > { %v7602_v46 = vld [vmem:[%s9050_s8 + $0x10] ss:$0 sps:$4 sm:$0x33]   ;;  %v6249_v47 = vcombine.low %v6245_v40, %v8230_v42  ;;  %v1358_v49 = vshrl.u32 %v6241_v28, 16  ;;  %v6439_v60 = vld [vmem:[%s8020_s12 + $0xc] sm:$0xf] }
  0x40   : > { %v3857_v22 = vor.u32 %v3856_v17, %v3853_v16  ;;  %v1362_v50 = vrot.slane %v1360_v36, 1  ;;  %v7593_v51 = vld [vmem:[%s8003_s19 + $0xc] sm:$0xff]   ;;  %v4017_v41 = vshll.u32 %v7602_v46, 16  ;;  %v3942_v63 = vand.u32 %v3937_v48, %v7987_v11  ;;  %v8261_v3 = vld [vmem:[%s8020_s12 + $0x14] ss:$0 sps:$4 sm:$0x11]  }
  0x41   : > { %6785 = vmatmul.mubr.msk.bf16.vlgmr.msra.gmra.mrb[0].mxu0 %vm815_vm3, %v944_v6  ;;  %v6421_v6 = vld [vmem:[%s9050_s8 + $0xc] sm:$0x3]  ;;  %v1439_v62 = vshll.u32 %v6249_v47, 16  ;;  %v8248_v55 = vld [vmem:[%s8020_s12 + $0x10] sm:$0xf]  ;;  %v1444_v0 = vshll.u32 %v8245_v61, 16 }
  0x42   : > { %6789 = vmatpush3.bf16.msra.mxu0 %v1038_v7  ;;  %6790 = vmatprep.mubr.msk.bf16.mxu0 %vm7833_vm2, %v7831_v1  ;;  %v1288_v7 = vshrl.u32 %v7591_v2, 16  ;;  %v3794_v10 = vand.u32 %v6421_v6, %v7987_v11  ;;  %v3862_v31 = vand.u32 %v3857_v22, %v7987_v11  ;;  %v6443_v2 = vcombine.low %v6439_v60, %v8248_v55  ;;  %v7611_v28 = vld [vmem:[%s9050_s8 + $0x10] sm:$0x18]   ;;  %s7834_s16 = smov [#allocation2]  }
  0x43   : > { %6794 = vmatprep.subr.bf16.mxu0 %v7831_v1  ;;  %7001 = vmatmul.mubr.msk.bf16.vlgmr.msra.gmra.mrb[0].mxu1 %vm815_vm3, %v3511_v14  ;;  %v4019_v59 = vrot.slane %v4017_v41, 1  ;;  %v1437_v13 = vshrl.u32 %v6249_v47, 16  ;;  %v1441_v12 = vrot.slane %v1439_v62, 1  ;;  %v4007_v19 = vshll.u32 %v8261_v3, 16  ;;  %v7612_v34 = vld [vmem:[%s9050_s8 + $0x10] sm:$0x18]  }
  0x44   : > { %7005 = vmatpush3.bf16.msra.mxu1 %v3605_v15  ;;  %7006 = vmatprep.mubr.msk.bf16.mxu1 %vm7833_vm2, %v7831_v1  ;;  %v1290_v14 = vrot.slane %v1288_v7, 1  ;;  %v1293_v15 = vrot.slane %v1291_v8, 2  ;;  %v4002_v7 = vshll.u32 %v6443_v2, 16  ;;  %v7607_v8 = vld [vmem:[%s9050_s8 + $0x10] ss:$0 sps:$4 sm:$0xcc]  }
  0x45   : > { %7010 = vmatprep.subr.bf16.mxu1 %v7831_v1  ;;  %v4000_v17 = vshrl.u32 %v6443_v2, 16  ;;  %v1586_v40 = vshll.u32 %v7611_v28, 16  ;;  %v4146_v47 = vshrl.u32 %v7612_v34, 16  ;;  %v4149_v48 = vshll.u32 %v7612_v34, 16  ;;  %v6258_v41 = vld [vmem:[%s8003_s19 + $0xc] sm:$0xe] }
  0x46   : > { %v1294_v18 = vor.u32 %v1293_v15, %v1290_v14  ;;  %v1446_v14 = vrot.slane %v1444_v0, 1  ;;  %v6264_v0 = vld [vmem:[%s9050_s8 + $0x18] sm:$0x3]  ;;  %s7739_s14 = sshll.u32 %s7834_s16, 4  ;;  %s7740_s14 = int_to_ptr.vmem [resolvable:$false] %s7739_s14 }
  0x48   : > { %v1299_v24 = vand.u32 %v1294_v18, %v7987_v11  ;;  %v4004_v18 = vrot.slane %v4002_v7, 1  ;;  %v6458_v7 = vld [vmem:[%s9050_s8 + $0x18] sm:$0x3] }
  0x4d   : > { %6791 = vmatmul.mubr.msk.bf16.vlgmr.msra.gmra.mrb[0].mxu0 %vm815_vm3, %v1023_v32  ;;  %v7595_v32 = vld [vmem:[%s9050_s8 + $0xc] sm:$0x18]  }
  0x4e   : > { %6795 = vmatpush3.bf16.msra.mxu0 %v1100_v33  ;;  %6796 = vmatprep.mubr.msk.bf16.mxu0 %vm7833_vm2, %v7831_v1  ;;  %v6435_v33 = vcombine.low %v6430_v25, %v8204_v27  ;;  %v1374_v44 = vrot.slane %v7595_v32, 3  ;;  %v7608_v25 = vld [vmem:[%s9050_s8 + $0x10] ss:$0 sps:$4 sm:$0xcc]   ;;  %v4009_v32 = vrot.slane %v4007_v19, 1  ;;  %v7615_v19 = vld [vmem:[%s8031_s29] sm:$0xff]  }
  0x4f   : > { %6800 = vmatprep.subr.bf16.mxu0 %v7831_v1  ;;  %7007 = vmatmul.mubr.msk.bf16.vlgmr.msra.gmra.mrb[0].mxu1 %vm815_vm3, %v3590_v37  ;;  %v1365_v37 = vshll.u32 %v8199_v23, 16 }
  0x50   : > { %7011 = vmatpush3.bf16.msra.mxu1 %v3666_v38  ;;  %7012 = vmatprep.mubr.msk.bf16.mxu1 %vm7833_vm2, %v7831_v1  ;;  %v8225_v38 = vld [vmem:[%s8031_s29 + $0x14] ss:$0 sps:$4 sm:$0x11]   ;;  %v3923_v43 = vshll.u32 %v6435_v33, 16  ;;  %v3921_v52 = vshrl.u32 %v6435_v33, 16  ;;  %v1379_v30 = vand.u32 %v1374_v44, %v7987_v11  ;;  %v4081_v33 = vrot.slane %v7608_v25, 2 }
  0x51   : > { %7016 = vmatprep.subr.bf16.mxu1 %v7831_v1  ;;  %v1367_v26 = vrot.slane %v1365_v37, 1  ;;  %v3928_v54 = vshll.u32 %v8225_v38, 16  ;;  %v1583_v37 = vshrl.u32 %v7611_v28, 16  ;;  %v7621_v28 = vld [vmem:[%s9050_s8 + $0x18] sm:$0x18]  }
  0x52   : > { %v3925_v53 = vrot.slane %v3923_v43, 1  ;;  %v6253_v43 = vld [vmem:[%s8012_s28 + $0xc] sm:$0xe]  ;;  %v1795_v34 = vrot.slane %v7621_v28, 3  ;;  %s8984_s28 = scalar_lea.hbm %s9053_s11, %s6598_s20 }
  0x53   : > { %v3930_v6 = vrot.slane %v3928_v54, 1 }
  0x59   : > { %6797 = vmatmul.mubr.msk.bf16.vlgmr.msra.gmra.mrb[0].mxu0 %vm815_vm3, %v1091_v56  ;;  %v1452_v56 = vshrl.u32 %v7601_v35, 16 }
  0x5a   : > { %6801 = vmatpush3.bf16.msra.mxu0 %v1171_v57  ;;  %6802 = vmatprep.mubr.msk.bf16.mxu0 %vm7833_vm2, %v7831_v1  ;;  %v7594_v57 = vld [vmem:[%s8020_s12 + $0xc] sm:$0xff]  }
  0x5b   : > { %6806 = vmatprep.subr.bf16.mxu0 %v7831_v1  ;;  %7013 = vmatmul.mubr.msk.bf16.vlgmr.msra.gmra.mrb[0].mxu1 %vm815_vm3, %v3657_v39  ;;  %v1456_v39 = vrot.slane %v1454_v45, 1  ;;  %v4086_v45 = vand.u32 %v4081_v33, %v7987_v11  ;;  %v4327_v33 = vld [vmem:[%s8154_s13] sm:$0xf] }
  0x5c   : > { %7017 = vmatpush3.bf16.msra.mxu1 %v3737_v58  ;;  %7018 = vmatprep.mubr.msk.bf16.mxu1 %vm7833_vm2, %v7831_v1  ;;  %v4015_v58 = vshrl.u32 %v7602_v46, 16  ;;  %v6447_v46 = vld [vmem:[%s8031_s29 + $0xc] sm:$0xe] }
  0x5d   : > { %7022 = vmatprep.subr.bf16.mxu1 %v7831_v1 }
  0x65   : > { %6803 = vmatmul.mubr.msk.bf16.vlgmr.msra.gmra.mrb[0].mxu0 %vm815_vm3, %v1153_v4  ;;  %v1363_v4 = vor.u32 %v1362_v50, %v1358_v49  ;;  %v6255_v49 = vcombine.low %v6253_v43, %v8195_v20  ;;  %v1585_v50 = vrot.slane %v1583_v37, 3  ;;  %v7627_v37 = vld [vmem:[%s9050_s8 + $0x1c] ss:$0 sps:$4 sm:$0x33]   ;;  %v7619_v43 = vld [vmem:[%s8020_s12] sm:$0xff]  }
  0x66   : > { %6807 = vmatpush3.bf16.msra.mxu0 %v1230_v5  ;;  %6808 = vmatprep.mubr.msk.bf16.mxu0 %vm7833_vm2, %v7831_v1  ;;  %v1457_v5 = vor.u32 %v1456_v39, %v1452_v56  ;;  %v1513_v56 = vrot.slane %v8199_v23, 1  ;;  %v6261_v23 = vcombine.low %v6258_v41, %v8230_v42  ;;  %v7617_v42 = vld [vmem:[%s9050_s8 + $0x18] ss:$0 sps:$4 sm:$0x66]  }
  0x67   : > { %6812 = vmatprep.subr.bf16.mxu0 %v7831_v1  ;;  %7019 = vmatmul.mubr.msk.bf16.vlgmr.msra.gmra.mrb[0].mxu1 %vm815_vm3, %v3719_v9  ;;  %v3926_v9 = vor.u32 %v3925_v53, %v3921_v52  ;;  %v1368_v15 = vsel %vm932_vm4, %v1363_v4, %v1367_v26  ;;  %v1588_v26 = vrot.slane %v1586_v40, 4  ;;  %v4148_v52 = vrot.slane %v4146_v47, 3  ;;  %v8380_v40 = vld [vmem:[%s8031_s29 + $0x8] ss:$0 sps:$4 sm:$0x11]  }
  0x68   : > { %7023 = vmatpush3.bf16.msra.mxu1 %v3794_v10  ;;  %7024 = vmatprep.mubr.msk.bf16.mxu1 %vm7833_vm2, %v7831_v1  ;;  %v4020_v10 = vor.u32 %v4019_v59, %v4015_v58  ;;  %v1462_v16 = vand.u32 %v1457_v5, %v7987_v11  ;;  %v4151_v53 = vrot.slane %v4149_v48, 4  ;;  %v1512_v54 = vrot.slane %v6255_v49, 1 }
  0x69   : > { %7028 = vmatprep.subr.bf16.mxu1 %v7831_v1  ;;  %v3931_v22 = vsel %vm932_vm4, %v3926_v9, %v3930_v6  ;;  %v1589_v20 = vor.u32 %v1588_v26, %v1585_v50  ;;  %v1574_v2 = vrot.slane %v6261_v23, 1  ;;  %v1575_v59 = vrot.slane %v8245_v61, 1  ;;  %v7620_v50 = vld [vmem:[%s8172_s25] sm:$0xff]   ;;  %v8391_v26 = vld [vmem:[%s8154_s13 + $0x8] ss:$0 sps:$4 sm:$0x11]  }
  0x6a   : > { %v4152_v39 = vor.u32 %v4151_v53, %v4148_v52  ;;  %v1514_v58 = vsel %vm1088_vm5, %v1512_v54, %v1513_v56  ;;  %v4138_v5 = vrot.slane %v8261_v3, 1  ;;  %v1652_v61 = vand.u32 %v6264_v0, %v7987_v11  ;;  %v8422_v0 = vld [vmem:[%s8172_s25 + $0x4] sm:$0xf] }
  0x6b   : > { %v1594_v60 = vand.u32 %v1589_v20, %v7987_v11  ;;  %v1576_v6 = vsel %vm1088_vm5, %v1574_v2, %v1575_v59  ;;  %v1712_v9 = vshll.u32 %v7617_v42, 16  ;;  %v4214_v3 = vand.u32 %v6458_v7, %v7987_v11 }
  0x6c   : > { %v4157_v62 = vand.u32 %v4152_v39, %v7987_v11  ;;  %v1800_v47 = vand.u32 %v1795_v34, %v7987_v11  ;;  %v1875_v49 = vshll.u32 %v7627_v37, 16  ;;  %v1786_v52 = vshll.u32 %v8380_v40, 16  ;;  %v1845_v39 = vld [vmem:[%s8020_s12] sm:$0xf] }
  0x6d   : > { %v4348_v41 = vshll.u32 %v8391_v26, 16 }
  0x71   : > { %6809 = vmatmul.mubr.msk.bf16.vlgmr.msra.gmra.mrb[0].mxu0 %vm815_vm3, %v7589_v21  ;;  %v1518_v21 = vrot.slane %v7607_v8, 2  ;;  %v1709_v8 = vshrl.u32 %v7617_v42, 16 }
  0x72   : > { %6813 = vmatpush3.bf16.msra.mxu0 %v1299_v24  ;;  %6814 = vmatprep.mubr.msk.bf16.mxu0 %vm7833_vm2, %v7831_v1  ;;  %v4025_v24 = vand.u32 %v4020_v10, %v7987_v11 }
  0x73   : > { %6818 = vmatprep.subr.bf16.mxu0 %v7831_v1  ;;  %7025 = vmatmul.mubr.msk.bf16.vlgmr.msra.gmra.mrb[0].mxu1 %vm815_vm3, %v7590_v29  ;;  %v1442_v29 = vor.u32 %v1441_v12, %v1437_v13  ;;  %v1523_v36 = vand.u32 %v1518_v21, %v7987_v11 }
  0x74   : > { %7029 = vmatpush3.bf16.msra.mxu1 %v3862_v31  ;;  %7030 = vmatprep.mubr.msk.bf16.mxu1 %vm7833_vm2, %v7831_v1  ;;  %v4005_v31 = vor.u32 %v4004_v18, %v4000_v17 }
  0x75   : > { %7034 = vmatprep.subr.bf16.mxu1 %v7831_v1  ;;  %v1447_v35 = vsel %vm932_vm4, %v1442_v29, %v1446_v14  ;;  %v1711_v14 = vrot.slane %v1709_v8, 1  ;;  %v1765_v29 = vld [vmem:[%s8031_s29] sm:$0xf] }
  0x76   : > { %v4010_v44 = vsel %vm932_vm4, %v4005_v31, %v4009_v32  ;;  %v8362_v31 = vld [vmem:[%s8031_s29 + $0x4] sm:$0xf]  ;;  %v7622_v32 = vld [vmem:[%s9050_s8 + $0x18] sm:$0x18]  }
  0x7d   : > { %6815 = vmatmul.mubr.msk.bf16.vlgmr.msra.gmra.mrb[0].mxu0 %vm815_vm3, %v7593_v51  ;;  %v6449_v51 = vcombine.low %v6447_v46, %v8204_v27  ;;  %v7628_v46 = vld [vmem:[%s9050_s8 + $0x1c] ss:$0 sps:$4 sm:$0x33]  }
  0x7e   : > { %6819 = vmatpush3.bf16.msra.mxu0 %v1379_v30  ;;  %6820 = vmatprep.mubr.msk.bf16.mxu0 %vm7833_vm2, %v7831_v1  ;;  %v4076_v30 = vrot.slane %v8225_v38, 1  ;;  %v4437_v54 = vshll.u32 %v7628_v46, 16  ;;  %v4435_v23 = vshrl.u32 %v7628_v46, 16  ;;  %v1928_v46 = vld [vmem:[%s8031_s29] sm:$0xe] }
  0x7f   : > { %6824 = vmatprep.subr.bf16.mxu0 %v7831_v1  ;;  %7031 = vmatmul.mubr.msk.bf16.vlgmr.msra.gmra.mrb[0].mxu1 %vm815_vm3, %v7594_v57  ;;  %v4075_v57 = vrot.slane %v6449_v51, 1 }
  0x80   : > { %7035 = vmatpush3.bf16.msra.mxu1 %v3942_v63  ;;  %7036 = vmatprep.mubr.msk.bf16.mxu1 %vm7833_vm2, %v7831_v1  ;;  %v6452_v63 = vld [vmem:[%s8020_s12 + $0xc] sm:$0xe] }
  0x81   : > { %7040 = vmatprep.subr.bf16.mxu1 %v7831_v1  ;;  %v4077_v27 = vsel %vm1088_vm5, %v4075_v57, %v4076_v30  ;;  %v6455_v38 = vcombine.low %v6452_v63, %v8248_v55  ;;  %v7618_v55 = vld [vmem:[%s9050_s8 + $0x18] ss:$0 sps:$4 sm:$0x66]   ;;  %v1873_v57 = vshrl.u32 %v7627_v37, 16  ;;  %v1877_v30 = vrot.slane %v1875_v49, 1 }
  0x82   : > { %v4271_v13 = vshrl.u32 %v7618_v55, 16  ;;  %v4274_v12 = vshll.u32 %v7618_v55, 16  ;;  %v4439_v63 = vrot.slane %v4437_v54, 1  ;;  %v4350_v55 = vrot.slane %v4348_v41, 1 }
  0x83   : > { %v4137_v4 = vrot.slane %v6455_v38, 1  ;;  %v4407_v38 = vld [vmem:[%s8172_s25] sm:$0xf]  ;;  %v1878_v59 = vor.u32 %v1877_v30, %v1873_v57  ;;  %v4496_v41 = vrot.slane %v8391_v26, 1 }
  0x84   : > { %v4276_v17 = vrot.slane %v4274_v12, 2 }
  0x85   : > { %v4139_v10 = vsel %vm1088_vm5, %v4137_v4, %v4138_v5  ;;  %v8425_v4 = vld [vmem:[%s8020_s12 + $0x8] ss:$0 sps:$4 sm:$0x11]   ;;  %v1883_v8 = vand.u32 %v1878_v59, %v7987_v11 }
  0x89   : > { %6821 = vmatmul.mubr.msk.bf16.vlgmr.msra.gmra.mrb[0].mxu0 %vm815_vm3, %v1368_v15  ;;  %v1714_v15 = vrot.slane %v1712_v9, 2 }
  0x8a   : > { %6825 = vmatpush3.bf16.msra.mxu0 %v1462_v16  ;;  %6826 = vmatprep.mubr.msk.bf16.mxu0 %vm7833_vm2, %v7831_v1  ;;  %v4273_v16 = vrot.slane %v4271_v13, 1 }
  0x8b   : > { %6830 = vmatprep.subr.bf16.mxu0 %v7831_v1  ;;  %7037 = vmatmul.mubr.msk.bf16.vlgmr.msra.gmra.mrb[0].mxu1 %vm815_vm3, %v3931_v22  ;;  %v1715_v18 = vor.u32 %v1714_v15, %v1711_v14  ;;  %v7633_v15 = vld [vmem:[%s9050_s8 + $0x1c] ss:$0 sps:$4 sm:$0xcc]  }
  0x8c   : > { %7041 = vmatpush3.bf16.msra.mxu1 %v4025_v24  ;;  %7042 = vmatprep.mubr.msk.bf16.mxu1 %vm7833_vm2, %v7831_v1  ;;  %v4277_v21 = vor.u32 %v4276_v17, %v4273_v16  ;;  %v7616_v24 = vld [vmem:[%s8154_s13] sm:$0xff]  }
  0x8d   : > { %7046 = vmatprep.subr.bf16.mxu1 %v7831_v1  ;;  %v1720_v22 = vand.u32 %v1715_v18, %v7987_v11 }
  0x8e   : > { %v4282_v25 = vand.u32 %v4277_v21, %v7987_v11 }
  0x95   : > { %6827 = vmatmul.mubr.msk.bf16.vlgmr.msra.gmra.mrb[0].mxu0 %vm815_vm3, %v1447_v35  ;;  %v6273_v35 = vcombine.low %v1765_v29, %v8362_v31  ;;  %v7637_v29 = vld [vmem:[%s9050_s8 + $0x1c] sm:$0x18]  }
  0x96   : > { %6831 = vmatpush3.bf16.msra.mxu0 %v1523_v36  ;;  %6832 = vmatprep.mubr.msk.bf16.mxu0 %vm7833_vm2, %v7831_v1  ;;  %v8374_v36 = vld [vmem:[%s8154_s13 + $0x4] sm:$0xf] }
  0x97   : > { %6836 = vmatprep.subr.bf16.mxu0 %v7831_v1  ;;  %7043 = vmatmul.mubr.msk.bf16.vlgmr.msra.gmra.mrb[0].mxu1 %vm815_vm3, %v4010_v44  ;;  %v4357_v44 = vrot.slane %v7622_v32, 3  ;;  %v1781_v48 = vshll.u32 %v6273_v35, 16  ;;  %v1779_v56 = vshrl.u32 %v6273_v35, 16  ;;  %v7638_v35 = vld [vmem:[%s9050_s8 + $0x1c] sm:$0x18]  }
  0x98   : > { %7047 = vmatpush3.bf16.msra.mxu1 %v4086_v45  ;;  %7048 = vmatprep.mubr.msk.bf16.mxu1 %vm7833_vm2, %v7831_v1  ;;  %v6467_v45 = vcombine.low %v4327_v33, %v8374_v36  ;;  %v4566_v49 = vshrl.u32 %v7638_v35, 16 }
  0x99   : > { %7052 = vmatprep.subr.bf16.mxu1 %v7831_v1  ;;  %v4362_v51 = vand.u32 %v4357_v44, %v7987_v11  ;;  %v1783_v20 = vrot.slane %v1781_v48, 1  ;;  %v2004_v44 = vshrl.u32 %v7637_v29, 16 }
  0x9a   : > { %v4343_v53 = vshll.u32 %v6467_v45, 16 }
  0x9b   : > { %v1784_v2 = vor.u32 %v1783_v20, %v1779_v56  ;;  %v4568_v20 = vrot.slane %v4566_v49, 3 }
  0xa1   : > { %6833 = vmatmul.mubr.msk.bf16.vlgmr.msra.gmra.mrb[0].mxu0 %vm815_vm3, %v1514_v58  ;;  %v8401_v58 = vld [vmem:[%s8020_s12 + $0x4] sm:$0xf] }
  0xa2   : > { %6837 = vmatpush3.bf16.msra.mxu0 %v1594_v60  ;;  %6838 = vmatprep.mubr.msk.bf16.mxu0 %vm7833_vm2, %v7831_v1  ;;  %v4341_v60 = vshrl.u32 %v6467_v45, 16  ;;  %v6278_v42 = vcombine.low %v1845_v39, %v8401_v58  ;;  %v2007_v45 = vshll.u32 %v7637_v29, 16  ;;  %v6302_v29 = vld [vmem:[%s8031_s29 + $0xc] sm:$0xf] }
  0xa3   : > { %6842 = vmatprep.subr.bf16.mxu0 %v7831_v1  ;;  %7049 = vmatmul.mubr.msk.bf16.vlgmr.msra.gmra.mrb[0].mxu1 %vm815_vm3, %v4077_v27  ;;  %v1788_v27 = vrot.slane %v1786_v52, 1  ;;  %v4490_v52 = vld [vmem:[%s8154_s13] sm:$0xe] }
  0xa4   : > { %7053 = vmatpush3.bf16.msra.mxu1 %v4157_v62  ;;  %7054 = vmatprep.mubr.msk.bf16.mxu1 %vm7833_vm2, %v7831_v1  ;;  %v4345_v62 = vrot.slane %v4343_v53, 1  ;;  %v1860_v9 = vshll.u32 %v6278_v42, 16  ;;  %v1858_v16 = vshrl.u32 %v6278_v42, 16  ;;  %v2006_v53 = vrot.slane %v2004_v44, 3 }
  0xa5   : > { %7058 = vmatprep.subr.bf16.mxu1 %v7831_v1  ;;  %v1789_v7 = vsel %vm932_vm4, %v1784_v2, %v1788_v27  ;;  %v2009_v54 = vrot.slane %v2007_v45, 4  ;;  %v6477_v56 = vcombine.low %v4490_v52, %v8374_v36  ;;  %v4551_v2 = vld [vmem:[%s8172_s25] sm:$0xe]  ;;  %v1996_v42 = vrot.slane %v8425_v4, 1  ;;  %v7645_v45 = vld [vmem:[%s8020_s12 + $0xc] sm:$0xff]  }
  0xa6   : > { %v4346_v5 = vor.u32 %v4345_v62, %v4341_v60  ;;  %v1862_v17 = vrot.slane %v1860_v9, 1  ;;  %v6482_v26 = vcombine.low %v4551_v2, %v8422_v0  ;;  %v7653_v44 = vld [vmem:[%s9050_s8 + $0x28] ss:$0 sps:$4 sm:$0x33]  }
  0xa7   : > { %v2010_v39 = vor.u32 %v2009_v54, %v2006_v53  ;;  %v4495_v60 = vrot.slane %v6477_v56, 1  ;;  %v2298_v52 = vshll.u32 %v7653_v44, 16  ;;  %v7646_v53 = vld [vmem:[%s8172_s25 + $0xc] sm:$0xff]  }
  0xa8   : > { %v4351_v13 = vsel %vm932_vm4, %v4346_v5, %v4350_v55  ;;  %v1863_v28 = vor.u32 %v1862_v17, %v1858_v16  ;;  %v6293_v5 = vld [vmem:[%s9050_s8 + $0x24] sm:$0x3]  ;;  %v4557_v55 = vrot.slane %v6482_v26, 1 }
  0xa9   : > { %v4497_v36 = vsel %vm1088_vm5, %v4495_v60, %v4496_v41  ;;  %v2296_v60 = vshrl.u32 %v7653_v44, 16  ;;  %v2300_v41 = vrot.slane %v2298_v52, 1 }
  0xad   : > { %6839 = vmatmul.mubr.msk.bf16.vlgmr.msra.gmra.mrb[0].mxu0 %vm815_vm3, %v1576_v6  ;;  %v4440_v6 = vor.u32 %v4439_v63, %v4435_v23  ;;  %v2015_v23 = vand.u32 %v2010_v39, %v7987_v11  ;;  %v1989_v63 = vld [vmem:[%s8020_s12] sm:$0xe] }
  0xae   : > { %6843 = vmatpush3.bf16.msra.mxu0 %v1652_v61  ;;  %6844 = vmatprep.mubr.msk.bf16.mxu0 %vm7833_vm2, %v7831_v1  ;;  %v6472_v61 = vcombine.low %v4407_v38, %v8422_v0  ;;  %v7644_v0 = vld [vmem:[%s9050_s8 + $0x24] ss:$0 sps:$4 sm:$0x66]  }
  0xaf   : > { %6848 = vmatprep.subr.bf16.mxu0 %v7831_v1  ;;  %7055 = vmatmul.mubr.msk.bf16.vlgmr.msra.gmra.mrb[0].mxu1 %vm815_vm3, %v4139_v10  ;;  %v1865_v10 = vshll.u32 %v8425_v4, 16  ;;  %v4445_v12 = vand.u32 %v4440_v6, %v7987_v11  ;;  %v2074_v4 = vand.u32 %v6293_v5, %v7987_v11  ;;  %v8585_v5 = vld [vmem:[%s8172_s25 + $0x10] sm:$0xf] }
  0xb0   : > { %7059 = vmatpush3.bf16.msra.mxu1 %v4214_v3  ;;  %7060 = vmatprep.mubr.msk.bf16.mxu1 %vm7833_vm2, %v7831_v1  ;;  %v8432_v3 = vld [vmem:[%s8172_s25 + $0x8] ss:$0 sps:$4 sm:$0x11]   ;;  %v4422_v14 = vshll.u32 %v6472_v61, 16 }
  0xb1   : > { %7064 = vmatprep.subr.bf16.mxu1 %v7831_v1  ;;  %v1867_v18 = vrot.slane %v1865_v10, 1  ;;  %v4558_v6 = vrot.slane %v8432_v3, 1 }
  0xb2   : > { %v4424_v21 = vrot.slane %v4422_v14, 1 }
  0xb3   : > { %v1868_v37 = vsel %vm932_vm4, %v1863_v28, %v1867_v18  ;;  %v4559_v10 = vsel %vm1088_vm5, %v4557_v55, %v4558_v6  ;;  %v7647_v28 = vld [vmem:[%s9050_s8 + $0x24] sm:$0x18]  }
  0xb9   : > { %6845 = vmatmul.mubr.msk.bf16.vlgmr.msra.gmra.mrb[0].mxu0 %vm815_vm3, %v7615_v19  ;;  %v4420_v19 = vshrl.u32 %v6472_v61, 16 }
  0xba   : > { %6849 = vmatpush3.bf16.msra.mxu0 %v1720_v22  ;;  %6850 = vmatprep.mubr.msk.bf16.mxu0 %vm7833_vm2, %v7831_v1  ;;  %v4427_v22 = vshll.u32 %v8432_v3, 16 }
  0xbb   : > { %6854 = vmatprep.subr.bf16.mxu0 %v7831_v1  ;;  %7061 = vmatmul.mubr.msk.bf16.vlgmr.msra.gmra.mrb[0].mxu1 %vm815_vm3, %v7616_v24  ;;  %v1939_v24 = vrot.slane %v7633_v15, 2  ;;  %v4425_v32 = vor.u32 %v4424_v21, %v4420_v19  ;;  %v7641_v19 = vld [vmem:[%s8031_s29 + $0xc] sm:$0xff]  }
  0xbc   : > { %7065 = vmatpush3.bf16.msra.mxu1 %v4282_v25  ;;  %7066 = vmatprep.mubr.msk.bf16.mxu1 %vm7833_vm2, %v7831_v1  ;;  %v7634_v25 = vld [vmem:[%s9050_s8 + $0x1c] ss:$0 sps:$4 sm:$0xcc]   ;;  %v4429_v33 = vrot.slane %v4427_v22, 1 }
  0xbd   : > { %7070 = vmatprep.subr.bf16.mxu1 %v7831_v1  ;;  %v4501_v34 = vrot.slane %v7634_v25, 2 }
  0xbf   : > { %v4506_v48 = vand.u32 %v4501_v34, %v7987_v11  ;;  %v6496_v34 = vld [vmem:[%s8154_s13 + $0xc] sm:$0xf] }
  0xc5   : > { %6851 = vmatmul.mubr.msk.bf16.vlgmr.msra.gmra.mrb[0].mxu0 %vm815_vm3, %v7619_v43  ;;  %v1944_v43 = vand.u32 %v1939_v24, %v7987_v11  ;;  %v7642_v24 = vld [vmem:[%s8154_s13 + $0xc] sm:$0xff]  }
  0xc6   : > { %6855 = vmatpush3.bf16.msra.mxu0 %v1800_v47  ;;  %6856 = vmatprep.mubr.msk.bf16.mxu0 %vm7833_vm2, %v7831_v1  ;;  %v4430_v47 = vsel %vm932_vm4, %v4425_v32, %v4429_v33  ;;  %v8537_v32 = vld [vmem:[%s8031_s29 + $0x10] sm:$0xf]  ;;  %v7648_v33 = vld [vmem:[%s9050_s8 + $0x24] sm:$0x18]  }
  0xc7   : > { %6860 = vmatprep.subr.bf16.mxu0 %v7831_v1  ;;  %7067 = vmatmul.mubr.msk.bf16.vlgmr.msra.gmra.mrb[0].mxu1 %vm815_vm3, %v7620_v50  ;;  %v4569_v50 = vshll.u32 %v7638_v35, 16  ;;  %v2218_v35 = vrot.slane %v7647_v28, 3 }
  0xc8   : > { %7071 = vmatpush3.bf16.msra.mxu1 %v4362_v51  ;;  %7072 = vmatprep.mubr.msk.bf16.mxu1 %vm7833_vm2, %v7831_v1  ;;  %v6283_v51 = vcombine.low %v1928_v46, %v8362_v31  ;;  %v1934_v31 = vrot.slane %v8380_v40, 1  ;;  %v6288_v40 = vcombine.low %v1989_v63, %v8401_v58  ;;  %v7643_v58 = vld [vmem:[%s9050_s8 + $0x24] ss:$0 sps:$4 sm:$0x66]   ;;  %v4777_v46 = vrot.slane %v7648_v33, 3 }
  0xc9   : > { %7076 = vmatprep.subr.bf16.mxu1 %v7831_v1  ;;  %v4571_v57 = vrot.slane %v4569_v50, 4  ;;  %v2135_v9 = vshll.u32 %v7643_v58, 16  ;;  %v2223_v49 = vand.u32 %v2218_v35, %v7987_v11  ;;  %v8561_v50 = vld [vmem:[%s8031_s29 + $0x14] ss:$0 sps:$4 sm:$0x11]  }
  0xca   : > { %v1933_v30 = vrot.slane %v6283_v51, 1  ;;  %v1995_v59 = vrot.slane %v6288_v40, 1  ;;  %v4782_v54 = vand.u32 %v4777_v46, %v7987_v11  ;;  %v2209_v39 = vshll.u32 %v8561_v50, 16 }
  0xcb   : > { %v4572_v27 = vor.u32 %v4571_v57, %v4568_v20  ;;  %v2137_v15 = vrot.slane %v2135_v9, 2  ;;  %v8567_v20 = vld [vmem:[%s8154_s13 + $0x14] ss:$0 sps:$4 sm:$0x11]  }
  0xcc   : > { %v1935_v62 = vsel %vm1088_vm5, %v1933_v30, %v1934_v31  ;;  %v1997_v61 = vsel %vm1088_vm5, %v1995_v59, %v1996_v42  ;;  %v2211_v26 = vrot.slane %v2209_v39, 1  ;;  %v2301_v59 = vor.u32 %v2300_v41, %v2296_v60 }
  0xcd   : > { %v4577_v38 = vand.u32 %v4572_v27, %v7987_v11  ;;  %v6311_v27 = vld [vmem:[%s8020_s12 + $0xc] sm:$0xf] }
  0xd1   : > { %6857 = vmatmul.mubr.msk.bf16.vlgmr.msra.gmra.mrb[0].mxu0 %vm815_vm3, %v1789_v7  ;;  %v6487_v7 = vld [vmem:[%s9050_s8 + $0x24] sm:$0x3] }
  0xd2   : > { %6861 = vmatpush3.bf16.msra.mxu0 %v1883_v8  ;;  %6862 = vmatprep.mubr.msk.bf16.mxu0 %vm7833_vm2, %v7831_v1  ;;  %v2132_v8 = vshrl.u32 %v7643_v58, 16  ;;  %v4634_v3 = vand.u32 %v6487_v7, %v7987_v11  ;;  %v6505_v58 = vld [vmem:[%s8172_s25 + $0xc] sm:$0xf]  ;;  %v2306_v7 = vand.u32 %v2301_v59, %v7987_v11 }
  0xd3   : > { %6866 = vmatprep.subr.bf16.mxu0 %v7831_v1  ;;  %7073 = vmatmul.mubr.msk.bf16.vlgmr.msra.gmra.mrb[0].mxu1 %vm815_vm3, %v4351_v13  ;;  %v4691_v13 = vshrl.u32 %v7644_v0, 16  ;;  %v6518_v59 = vld [vmem:[%s8172_s25 + $0xc] sm:$0xe] }
  0xd4   : > { %7077 = vmatpush3.bf16.msra.mxu1 %v4445_v12  ;;  %7078 = vmatprep.mubr.msk.bf16.mxu1 %vm7833_vm2, %v7831_v1  ;;  %v4694_v12 = vshll.u32 %v7644_v0, 16  ;;  %v2134_v14 = vrot.slane %v2132_v8, 1  ;;  %v8591_v8 = vld [vmem:[%s8020_s12 + $0x14] ss:$0 sps:$4 sm:$0x11]  }
  0xd5   : > { %7082 = vmatprep.subr.bf16.mxu1 %v7831_v1  ;;  %v4693_v16 = vrot.slane %v4691_v13, 1  ;;  %v8597_v13 = vld [vmem:[%s8172_s25 + $0x14] ss:$0 sps:$4 sm:$0x11]  }
  0xd6   : > { %v4696_v17 = vrot.slane %v4694_v12, 2  ;;  %v2138_v18 = vor.u32 %v2137_v15, %v2134_v14 }
  0xd8   : > { %v4697_v21 = vor.u32 %v4696_v17, %v4693_v16  ;;  %v2143_v22 = vand.u32 %v2138_v18, %v7987_v11  ;;  %v2288_v16 = vshll.u32 %v8591_v8, 16  ;;  %v7659_v17 = vld [vmem:[%s9050_s8 + $0x28] ss:$0 sps:$4 sm:$0xcc]  }
  0xd9   : > { %v2362_v28 = vrot.slane %v7659_v17, 2 }
  0xda   : > { %v4702_v25 = vand.u32 %v4697_v21, %v7987_v11  ;;  %v4847_v21 = vshll.u32 %v8597_v13, 16 }
  0xdd   : > { %6863 = vmatmul.mubr.msk.bf16.vlgmr.msra.gmra.mrb[0].mxu0 %vm815_vm3, %v1868_v37  ;;  %v6307_v37 = vcombine.low %v6302_v29, %v8537_v32  ;;  %v7663_v29 = vld [vmem:[%s9050_s8 + $0x28] sm:$0x18]  }
  0xde   : > { %6867 = vmatpush3.bf16.msra.mxu0 %v1944_v43  ;;  %6868 = vmatprep.mubr.msk.bf16.mxu0 %vm7833_vm2, %v7831_v1  ;;  %v8549_v43 = vld [vmem:[%s8154_s13 + $0x10] sm:$0xf]  ;;  %v2427_v46 = vshrl.u32 %v7663_v29, 16 }
  0xdf   : > { %6872 = vmatprep.subr.bf16.mxu0 %v7831_v1  ;;  %7079 = vmatmul.mubr.msk.bf16.vlgmr.msra.gmra.mrb[0].mxu1 %vm815_vm3, %v4430_v47  ;;  %v6501_v47 = vcombine.low %v6496_v34, %v8549_v43  ;;  %v2204_v51 = vshll.u32 %v6307_v37, 16  ;;  %v2202_v56 = vshrl.u32 %v6307_v37, 16  ;;  %v4849_v34 = vrot.slane %v4847_v21, 1  ;;  %v7664_v37 = vld [vmem:[%s9050_s8 + $0x28] sm:$0x18]  }
  0xe0   : > { %7083 = vmatpush3.bf16.msra.mxu1 %v4506_v48  ;;  %7084 = vmatprep.mubr.msk.bf16.mxu1 %vm7833_vm2, %v7831_v1  ;;  %v7654_v48 = vld [vmem:[%s9050_s8 + $0x28] ss:$0 sps:$4 sm:$0x33]   ;;  %v4986_v52 = vshrl.u32 %v7664_v37, 16 }
  0xe1   : > { %7088 = vmatprep.subr.bf16.mxu1 %v7831_v1  ;;  %v4763_v57 = vshll.u32 %v6501_v47, 16  ;;  %v4857_v30 = vshll.u32 %v7654_v48, 16  ;;  %v2206_v31 = vrot.slane %v2204_v51, 1 }
  0xe2   : > { %v4988_v39 = vrot.slane %v4986_v52, 3 }
  0xe3   : > { %v4765_v63 = vrot.slane %v4763_v57, 1  ;;  %v4859_v40 = vrot.slane %v4857_v30, 1  ;;  %v2207_v2 = vor.u32 %v2206_v31, %v2202_v56  ;;  %v6513_v56 = vld [vmem:[%s8154_s13 + $0xc] sm:$0xe]  ;;  %v2429_v57 = vrot.slane %v2427_v46, 3 }
  0xe4   : > { %v6515_v31 = vcombine.low %v6513_v56, %v8549_v43  ;;  %v7679_v46 = vld [vmem:[%s9050_s8 + $0x34] ss:$0 sps:$4 sm:$0x33]  }
  0xe5   : > { %v2719_v56 = vshll.u32 %v7679_v46, 16 }
  0xe9   : > { %6869 = vmatmul.mubr.msk.bf16.vlgmr.msra.gmra.mrb[0].mxu0 %vm815_vm3, %v1935_v62  ;;  %v8575_v62 = vld [vmem:[%s8020_s12 + $0x10] sm:$0xf] }
  0xea   : > { %6873 = vmatpush3.bf16.msra.mxu0 %v2015_v23  ;;  %6874 = vmatprep.mubr.msk.bf16.mxu0 %vm7833_vm2, %v7831_v1  ;;  %v4761_v23 = vshrl.u32 %v6501_v47, 16  ;;  %v6315_v42 = vcombine.low %v6311_v27, %v8575_v62  ;;  %v2430_v47 = vshll.u32 %v7663_v29, 16  ;;  %v2609_v29 = vld [vmem:[%s8154_s13] sm:$0xf] }
  0xeb   : > { %6878 = vmatprep.subr.bf16.mxu0 %v7831_v1  ;;  %7085 = vmatmul.mubr.msk.bf16.vlgmr.msra.gmra.mrb[0].mxu1 %vm815_vm3, %v4497_v36  ;;  %v4768_v36 = vshll.u32 %v8567_v20, 16 }
  0xec   : > { %7089 = vmatpush3.bf16.msra.mxu1 %v4577_v38  ;;  %7090 = vmatprep.mubr.msk.bf16.mxu1 %vm7833_vm2, %v7831_v1  ;;  %v4855_v38 = vshrl.u32 %v7654_v48, 16  ;;  %v4766_v55 = vor.u32 %v4765_v63, %v4761_v23  ;;  %v2283_v9 = vshll.u32 %v6315_v42, 16  ;;  %v2281_v14 = vshrl.u32 %v6315_v42, 16  ;;  %v6319_v48 = vld [vmem:[%s8031_s29 + $0xc] sm:$0xe] }
  0xed   : > { %7094 = vmatprep.subr.bf16.mxu1 %v7831_v1  ;;  %v4770_v6 = vrot.slane %v4768_v36, 1  ;;  %v2432_v30 = vrot.slane %v2430_v47, 4  ;;  %v4915_v23 = vrot.slane %v6515_v31, 1  ;;  %v4916_v63 = vrot.slane %v8567_v20, 1  ;;  %v7671_v47 = vld [vmem:[%s8172_s25] sm:$0xff]  }
  0xee   : > { %v4860_v0 = vor.u32 %v4859_v40, %v4855_v38  ;;  %v2285_v15 = vrot.slane %v2283_v9, 1  ;;  %v6521_v20 = vcombine.low %v6518_v59, %v8585_v5 }
  0xef   : > { %v2433_v27 = vor.u32 %v2432_v30, %v2429_v57  ;;  %v4917_v43 = vsel %vm1088_vm5, %v4915_v23, %v4916_v63  ;;  %v7672_v57 = vld [vmem:[%s8455_s26] sm:$0xff]   ;;  %v2717_v23 = vshrl.u32 %v7679_v46, 16  ;;  %v2721_v63 = vrot.slane %v2719_v56, 1 }
  0xf1   : > { %v2438_v40 = vand.u32 %v2433_v27, %v7987_v11 }
  0xf5   : > { %6875 = vmatmul.mubr.msk.bf16.vlgmr.msra.gmra.mrb[0].mxu0 %vm815_vm3, %v1997_v61  ;;  %v6509_v61 = vcombine.low %v6505_v58, %v8585_v5  ;;  %v2419_v58 = vrot.slane %v8591_v8, 1  ;;  %v7670_v5 = vld [vmem:[%s9050_s8 + $0x30] ss:$0 sps:$4 sm:$0x66]  }
  0xf6   : > { %6879 = vmatpush3.bf16.msra.mxu0 %v2074_v4  ;;  %6880 = vmatprep.mubr.msk.bf16.mxu0 %vm7833_vm2, %v7831_v1  ;;  %v2212_v4 = vsel %vm932_vm4, %v2207_v2, %v2211_v26  ;;  %v6324_v2 = vld [vmem:[%s8020_s12 + $0xc] sm:$0xe]  ;;  %s670_s12 = sand.u32 1, %s7805_s18  }
  0xf7   : > { %6884 = vmatprep.subr.bf16.mxu0 %v7831_v1  ;;  %7091 = vmatmul.mubr.msk.bf16.vlgmr.msra.gmra.mrb[0].mxu1 %vm815_vm3, %v4559_v10  ;;  %v4771_v10 = vsel %vm932_vm4, %v4766_v55, %v4770_v6  ;;  %v4842_v12 = vshll.u32 %v6509_v61, 16  ;;  %v4840_v18 = vshrl.u32 %v6509_v61, 16  ;;  %v6330_v55 = vld [vmem:[%s9050_s8 + $0x30] sm:$0x3]  ;;  %v4977_v6 = vrot.slane %v6521_v20, 1  ;;  %s6181_s29 = sshll.u32 %s670_s12, 4 }
  0xf8   : > { %7095 = vmatpush3.bf16.msra.mxu1 %v4634_v3  ;;  %7096 = vmatprep.mubr.msk.bf16.mxu1 %vm7833_vm2, %v7831_v1  ;;  %v4865_v3 = vand.u32 %v4860_v0, %v7987_v11  ;;  %v4978_v0 = vrot.slane %v8597_v13, 1  ;;  %v5111_v13 = vshrl.u32 %v7670_v5, 16  ;;  %s672_s22 = scalar_lea.vmem [#allocation2], %s6181_s29  ;;  %s8990_s15 = scalar_lea.sflag [#allocation3], %s670_s12 }
  0xf9   : > { %7100 = vmatprep.subr.bf16.mxu1 %v7831_v1  ;;  %s5928_s19 = sshll.u32 %s672_s22, 4  ;;  %s8986_s19 = int_to_ptr.vmem [resolvable:$true] %s5928_s19 }
  0xfa   : > { %s7735_s23 = scalar_lea.vmem %s8986_s19, 256  ;;  %p7742_p7 = scmp.lt.s32.totalorder %s8986_s19, %s7740_s14 }
  0xfb   : > { %p7736_p4 = scmp.ne.s32.totalorder %s8986_s19, %s7735_s23 }
  0xfd   : > { %p7737_p5 = pnand %p7736_p4, %p7948_p3 }
  0xff   : > { %p7738_p6 = pneg %p7737_p5 }
 0x101   : > { %6881 = vmatmul.mubr.msk.bf16.vlgmr.msra.gmra.mrb[0].mxu0 %vm815_vm3, %v7641_v19  ;;  %v4844_v19 = vrot.slane %v4842_v12, 1  ;;  %v5114_v12 = vshll.u32 %v7670_v5, 16 }
 0x102   : > { %6885 = vmatpush3.bf16.msra.mxu0 %v2143_v22  ;;  %6886 = vmatprep.mubr.msk.bf16.mxu0 %vm7833_vm2, %v7831_v1  ;;  %v7660_v22 = vld [vmem:[%s9050_s8 + $0x28] ss:$0 sps:$4 sm:$0xcc]  }
 0x103   : > { %6890 = vmatprep.subr.bf16.mxu0 %v7831_v1  ;;  %7097 = vmatmul.mubr.msk.bf16.vlgmr.msra.gmra.mrb[0].mxu1 %vm815_vm3, %v7642_v24  ;;  %v2286_v24 = vor.u32 %v2285_v15, %v2281_v14  ;;  %v4845_v33 = vor.u32 %v4844_v19, %v4840_v18  ;;  %v4921_v35 = vrot.slane %v7660_v22, 2  ;;  %v5116_v17 = vrot.slane %v5114_v12, 2  ;;  %v7667_v19 = vld [vmem:[%s8154_s13] sm:$0xff]  }
 0x104   : > { %7101 = vmatpush3.bf16.msra.mxu1 %v4702_v25  ;;  %7102 = vmatprep.mubr.msk.bf16.mxu1 %vm7833_vm2, %v7831_v1  ;;  %v2290_v25 = vrot.slane %v2288_v16, 1  ;;  %v5113_v16 = vrot.slane %v5111_v13, 1  ;;  %v8753_v13 = vld [vmem:[%s8455_s26 + $0x8] ss:$0 sps:$4 sm:$0x11]  }
 0x105   : > { %7106 = vmatprep.subr.bf16.mxu1 %v7831_v1  ;;  %v4926_v51 = vand.u32 %v4921_v35, %v7987_v11  ;;  %v5167_v35 = vld [vmem:[%s8417_s4] sm:$0xf] }
 0x106   : > { %v2291_v44 = vsel %vm932_vm4, %v2286_v24, %v2290_v25  ;;  %v5117_v21 = vor.u32 %v5116_v17, %v5113_v16  ;;  %v7668_v24 = vld [vmem:[%s8417_s4] sm:$0xff]   ;;  %v7685_v17 = vld [vmem:[%s9050_s8 + $0x34] ss:$0 sps:$4 sm:$0xcc]  }
 0x108   : > { %v5122_v25 = vand.u32 %v5117_v21, %v7987_v11  ;;  %v5267_v21 = vshll.u32 %v8753_v13, 16 }
 0x10d   : > { %6887 = vmatmul.mubr.msk.bf16.vlgmr.msra.gmra.mrb[0].mxu0 %vm815_vm3, %v7645_v45  ;;  %v2367_v45 = vand.u32 %v2362_v28, %v7987_v11  ;;  %v7673_v28 = vld [vmem:[%s9050_s8 + $0x30] sm:$0x18]  }
 0x10e   : > { %6891 = vmatpush3.bf16.msra.mxu0 %v2223_v49  ;;  %6892 = vmatprep.mubr.msk.bf16.mxu0 %vm7833_vm2, %v7831_v1  ;;  %v4850_v49 = vsel %vm932_vm4, %v4845_v33, %v4849_v34  ;;  %v8693_v33 = vld [vmem:[%s8154_s13 + $0x4] sm:$0xf]  ;;  %v7674_v34 = vld [vmem:[%s9050_s8 + $0x30] sm:$0x18]  }
 0x10f   : > { %6896 = vmatprep.subr.bf16.mxu0 %v7831_v1  ;;  %7103 = vmatmul.mubr.msk.bf16.vlgmr.msra.gmra.mrb[0].mxu1 %vm815_vm3, %v7646_v53  ;;  %v4989_v53 = vshll.u32 %v7664_v37, 16  ;;  %v2639_v37 = vrot.slane %v7673_v28, 3  ;;  %v2783_v28 = vrot.slane %v7685_v17, 2 }
 0x110   : > { %7107 = vmatpush3.bf16.msra.mxu1 %v4782_v54  ;;  %7108 = vmatprep.mubr.msk.bf16.mxu1 %vm7833_vm2, %v7831_v1  ;;  %v6321_v54 = vcombine.low %v6319_v48, %v8537_v32  ;;  %v2357_v32 = vrot.slane %v8561_v50, 1  ;;  %v6327_v50 = vcombine.low %v6324_v2, %v8575_v62  ;;  %v7669_v62 = vld [vmem:[%s9050_s8 + $0x30] ss:$0 sps:$4 sm:$0x66]   ;;  %v5197_v48 = vrot.slane %v7674_v34, 3 }
 0x111   : > { %7112 = vmatprep.subr.bf16.mxu1 %v7831_v1  ;;  %v4991_v60 = vrot.slane %v4989_v53, 4  ;;  %v2553_v8 = vshrl.u32 %v7669_v62, 16  ;;  %v2556_v9 = vshll.u32 %v7669_v62, 16  ;;  %v2644_v52 = vand.u32 %v2639_v37, %v7987_v11  ;;  %v8717_v53 = vld [vmem:[%s8154_s13 + $0x8] ss:$0 sps:$4 sm:$0x11]  }
 0x112   : > { %v2356_v41 = vrot.slane %v6321_v54, 1  ;;  %v2418_v42 = vrot.slane %v6327_v50, 1  ;;  %v5202_v30 = vand.u32 %v5197_v48, %v7987_v11  ;;  %v2630_v27 = vshll.u32 %v8717_v53, 16  ;;  %v5247_v62 = vld [vmem:[%s8455_s26] sm:$0xf] }
 0x113   : > { %v4992_v36 = vor.u32 %v4991_v60, %v4988_v39  ;;  %v2555_v14 = vrot.slane %v2553_v8, 1  ;;  %v2558_v15 = vrot.slane %v2556_v9, 2  ;;  %v8723_v39 = vld [vmem:[%s8417_s4 + $0x8] ss:$0 sps:$4 sm:$0x11]  }
 0x114   : > { %v2358_v38 = vsel %vm1088_vm5, %v2356_v41, %v2357_v32  ;;  %v2420_v61 = vsel %vm1088_vm5, %v2418_v42, %v2419_v58  ;;  %v2632_v20 = vrot.slane %v2630_v27, 1  ;;  %v2722_v42 = vor.u32 %v2721_v63, %v2717_v23  ;;  %v8747_v8 = vld [vmem:[%s8172_s25 + $0x8] ss:$0 sps:$4 sm:$0x11]  }
 0x115   : > { %v4997_v26 = vand.u32 %v4992_v36, %v7987_v11  ;;  %v2559_v18 = vor.u32 %v2558_v15, %v2555_v14  ;;  %v2689_v36 = vld [vmem:[%s8172_s25] sm:$0xf]  ;;  %v2709_v16 = vshll.u32 %v8747_v8, 16 }
 0x117   : > { %v2564_v22 = vand.u32 %v2559_v18, %v7987_v11 }
 0x119   : > { %6893 = vmatmul.mubr.msk.bf16.vlgmr.msra.gmra.mrb[0].mxu0 %vm815_vm3, %v2212_v4  ;;  %v2496_v4 = vand.u32 %v6330_v55, %v7987_v11  ;;  %v8741_v55 = vld [vmem:[%s8455_s26 + $0x4] sm:$0xf] }
 0x11a   : > { %6897 = vmatpush3.bf16.msra.mxu0 %v2306_v7  ;;  %6898 = vmatprep.mubr.msk.bf16.mxu0 %vm7833_vm2, %v7831_v1  ;;  %v6524_v7 = vld [vmem:[%s9050_s8 + $0x30] sm:$0x3] }
 0x11b   : > { %6902 = vmatprep.subr.bf16.mxu0 %v7831_v1  ;;  %7109 = vmatmul.mubr.msk.bf16.vlgmr.msra.gmra.mrb[0].mxu1 %vm815_vm3, %v4771_v10  ;;  %v4979_v10 = vsel %vm1088_vm5, %v4977_v6, %v4978_v0 }
 0x11c   : > { %7113 = vmatpush3.bf16.msra.mxu1 %v4865_v3  ;;  %7114 = vmatprep.mubr.msk.bf16.mxu1 %vm7833_vm2, %v7831_v1  ;;  %v5054_v3 = vand.u32 %v6524_v7, %v7987_v11  ;;  %v2727_v7 = vand.u32 %v2722_v42, %v7987_v11  ;;  %v5391_v42 = vld [vmem:[%s8455_s26] sm:$0xe] }
 0x11d   : > { %7118 = vmatprep.subr.bf16.mxu1 %v7831_v1 }
 0x125   : > { %6899 = vmatmul.mubr.msk.bf16.vlgmr.msra.gmra.mrb[0].mxu0 %vm815_vm3, %v2291_v44  ;;  %v6339_v44 = vcombine.low %v2609_v29, %v8693_v33  ;;  %v7689_v29 = vld [vmem:[%s9050_s8 + $0x34] sm:$0x18]  }
 0x126   : > { %6903 = vmatpush3.bf16.msra.mxu0 %v2367_v45  ;;  %6904 = vmatprep.mubr.msk.bf16.mxu0 %vm7833_vm2, %v7831_v1  ;;  %v8705_v45 = vld [vmem:[%s8417_s4 + $0x4] sm:$0xf]  ;;  %v2848_v48 = vshrl.u32 %v7689_v29, 16 }
 0x127   : > { %6908 = vmatprep.subr.bf16.mxu0 %v7831_v1  ;;  %7115 = vmatmul.mubr.msk.bf16.vlgmr.msra.gmra.mrb[0].mxu1 %vm815_vm3, %v4850_v49  ;;  %v6533_v49 = vcombine.low %v5167_v35, %v8705_v45  ;;  %v2625_v54 = vshll.u32 %v6339_v44, 16  ;;  %v2623_v31 = vshrl.u32 %v6339_v44, 16  ;;  %v5269_v35 = vrot.slane %v5267_v21, 1  ;;  %v7690_v44 = vld [vmem:[%s9050_s8 + $0x34] sm:$0x18]  }
 0x128   : > { %7119 = vmatpush3.bf16.msra.mxu1 %v4926_v51  ;;  %7120 = vmatprep.mubr.msk.bf16.mxu1 %vm7833_vm2, %v7831_v1  ;;  %v7680_v51 = vld [vmem:[%s9050_s8 + $0x34] ss:$0 sps:$4 sm:$0x33]   ;;  %v5406_v56 = vshrl.u32 %v7690_v44, 16 }
 0x129   : > { %7124 = vmatprep.subr.bf16.mxu1 %v7831_v1  ;;  %v5183_v60 = vshll.u32 %v6533_v49, 16  ;;  %v5277_v41 = vshll.u32 %v7680_v51, 16  ;;  %v2627_v32 = vrot.slane %v2625_v54, 1 }
 0x12a   : > { %v5408_v27 = vrot.slane %v5406_v56, 3 }
 0x12b   : > { %v5185_v2 = vrot.slane %v5183_v60, 1  ;;  %v5279_v50 = vrot.slane %v5277_v41, 1  ;;  %v2628_v59 = vor.u32 %v2627_v32, %v2623_v31  ;;  %v5330_v31 = vld [vmem:[%s8417_s4] sm:$0xe]  ;;  %v2850_v60 = vrot.slane %v2848_v48, 3 }
 0x12c   : > { %v6543_v32 = vcombine.low %v5330_v31, %v8705_v45  ;;  %v7705_v48 = vld [vmem:[%s9050_s8 + $0x40] ss:$0 sps:$4 sm:$0x33]  }
 0x12d   : > { %v3142_v31 = vshll.u32 %v7705_v48, 16 }
 0x131   : > { %6905 = vmatmul.mubr.msk.bf16.vlgmr.msra.gmra.mrb[0].mxu0 %vm815_vm3, %v2358_v38  ;;  %v8731_v38 = vld [vmem:[%s8172_s25 + $0x4] sm:$0xf] }
 0x132   : > { %6909 = vmatpush3.bf16.msra.mxu0 %v2438_v40  ;;  %6910 = vmatprep.mubr.msk.bf16.mxu0 %vm7833_vm2, %v7831_v1  ;;  %v5181_v40 = vshrl.u32 %v6533_v49, 16  ;;  %v6344_v58 = vcombine.low %v2689_v36, %v8731_v38  ;;  %v2851_v49 = vshll.u32 %v7689_v29, 16  ;;  %v6368_v29 = vld [vmem:[%s8154_s13 + $0xc] sm:$0xf] }
 0x133   : > { %6914 = vmatprep.subr.bf16.mxu0 %v7831_v1  ;;  %7121 = vmatmul.mubr.msk.bf16.vlgmr.msra.gmra.mrb[0].mxu1 %vm815_vm3, %v4917_v43  ;;  %v5188_v43 = vshll.u32 %v8723_v39, 16 }
 0x134   : > { %7125 = vmatpush3.bf16.msra.mxu1 %v4997_v26  ;;  %7126 = vmatprep.mubr.msk.bf16.mxu1 %vm7833_vm2, %v7831_v1  ;;  %v5275_v26 = vshrl.u32 %v7680_v51, 16  ;;  %v5186_v6 = vor.u32 %v5185_v2, %v5181_v40  ;;  %v2704_v9 = vshll.u32 %v6344_v58, 16  ;;  %v2702_v14 = vshrl.u32 %v6344_v58, 16  ;;  %v2772_v51 = vld [vmem:[%s8154_s13] sm:$0xe] }
 0x135   : > { %7130 = vmatprep.subr.bf16.mxu1 %v7831_v1  ;;  %v5190_v0 = vrot.slane %v5188_v43, 1  ;;  %v2853_v41 = vrot.slane %v2851_v49, 4  ;;  %v5335_v40 = vrot.slane %v6543_v32, 1  ;;  %v5336_v2 = vrot.slane %v8723_v39, 1  ;;  %v7697_v49 = vld [vmem:[%s8172_s25 + $0xc] sm:$0xff]  }
 0x136   : > { %v5280_v5 = vor.u32 %v5279_v50, %v5275_v26  ;;  %v2706_v15 = vrot.slane %v2704_v9, 1  ;;  %v6548_v39 = vcombine.low %v5391_v42, %v8741_v55 }
 0x137   : > { %v2854_v36 = vor.u32 %v2853_v41, %v2850_v60  ;;  %v5337_v45 = vsel %vm1088_vm5, %v5335_v40, %v5336_v2  ;;  %v7698_v60 = vld [vmem:[%s8455_s26 + $0xc] sm:$0xff]   ;;  %v3140_v40 = vshrl.u32 %v7705_v48, 16  ;;  %v3144_v2 = vrot.slane %v3142_v31, 1 }
 0x139   : > { %v2859_v50 = vand.u32 %v2854_v36, %v7987_v11 }
 0x13d   : > { %6911 = vmatmul.mubr.msk.bf16.vlgmr.msra.gmra.mrb[0].mxu0 %vm815_vm3, %v2420_v61  ;;  %v6538_v61 = vcombine.low %v5247_v62, %v8741_v55  ;;  %v2840_v62 = vrot.slane %v8747_v8, 1  ;;  %v7696_v55 = vld [vmem:[%s9050_s8 + $0x3c] ss:$0 sps:$4 sm:$0x66]  }
 0x13e   : > { %6915 = vmatpush3.bf16.msra.mxu0 %v2496_v4  ;;  %6916 = vmatprep.mubr.msk.bf16.mxu0 %vm7833_vm2, %v7831_v1  ;;  %v2633_v4 = vsel %vm932_vm4, %v2628_v59, %v2632_v20  ;;  %v2833_v59 = vld [vmem:[%s8172_s25] sm:$0xe] }
 0x13f   : > { %6920 = vmatprep.subr.bf16.mxu0 %v7831_v1  ;;  %7127 = vmatmul.mubr.msk.bf16.vlgmr.msra.gmra.mrb[0].mxu1 %vm815_vm3, %v4979_v10  ;;  %v5191_v10 = vsel %vm932_vm4, %v5186_v6, %v5190_v0  ;;  %v5262_v12 = vshll.u32 %v6538_v61, 16  ;;  %v5260_v18 = vshrl.u32 %v6538_v61, 16  ;;  %v6359_v6 = vld [vmem:[%s9050_s8 + $0x3c] sm:$0x3]  ;;  %v5397_v0 = vrot.slane %v6548_v39, 1 }
 0x140   : > { %7131 = vmatpush3.bf16.msra.mxu1 %v5054_v3  ;;  %7132 = vmatprep.mubr.msk.bf16.mxu1 %vm7833_vm2, %v7831_v1  ;;  %v5285_v3 = vand.u32 %v5280_v5, %v7987_v11  ;;  %v5398_v5 = vrot.slane %v8753_v13, 1  ;;  %v5533_v13 = vshrl.u32 %v7696_v55, 16 }
 0x141   : > { %7136 = vmatprep.subr.bf16.mxu1 %v7831_v1 }
 0x149   : > { %6917 = vmatmul.mubr.msk.bf16.vlgmr.msra.gmra.mrb[0].mxu0 %vm815_vm3, %v7667_v19  ;;  %v5264_v19 = vrot.slane %v5262_v12, 1  ;;  %v5536_v12 = vshll.u32 %v7696_v55, 16 }
 0x14a   : > { %6921 = vmatpush3.bf16.msra.mxu0 %v2564_v22  ;;  %6922 = vmatprep.mubr.msk.bf16.mxu0 %vm7833_vm2, %v7831_v1  ;;  %v7686_v22 = vld [vmem:[%s9050_s8 + $0x34] ss:$0 sps:$4 sm:$0xcc]  }
 0x14b   : > { %6926 = vmatprep.subr.bf16.mxu0 %v7831_v1  ;;  %7133 = vmatmul.mubr.msk.bf16.vlgmr.msra.gmra.mrb[0].mxu1 %vm815_vm3, %v7668_v24  ;;  %v2707_v24 = vor.u32 %v2706_v15, %v2702_v14  ;;  %v5265_v34 = vor.u32 %v5264_v19, %v5260_v18  ;;  %v5341_v37 = vrot.slane %v7686_v22, 2  ;;  %v5538_v17 = vrot.slane %v5536_v12, 2  ;;  %v7693_v19 = vld [vmem:[%s8154_s13 + $0xc] sm:$0xff]  }
 0x14c   : > { %7137 = vmatpush3.bf16.msra.mxu1 %v5122_v25  ;;  %7138 = vmatprep.mubr.msk.bf16.mxu1 %vm7833_vm2, %v7831_v1  ;;  %v2711_v25 = vrot.slane %v2709_v16, 1  ;;  %v5535_v16 = vrot.slane %v5533_v13, 1  ;;  %v8909_v13 = vld [vmem:[%s8455_s26 + $0x14] ss:$0 sps:$4 sm:$0x11]  }
 0x14d   : > { %7142 = vmatprep.subr.bf16.mxu1 %v7831_v1  ;;  %v5346_v54 = vand.u32 %v5341_v37, %v7987_v11  ;;  %v6562_v37 = vld [vmem:[%s8417_s4 + $0xc] sm:$0xf] }
 0x14e   : > { %v2712_v46 = vsel %vm932_vm4, %v2707_v24, %v2711_v25  ;;  %v5539_v21 = vor.u32 %v5538_v17, %v5535_v16  ;;  %v7694_v24 = vld [vmem:[%s8417_s4 + $0xc] sm:$0xff]   ;;  %v7711_v17 = vld [vmem:[%s9050_s8 + $0x40] ss:$0 sps:$4 sm:$0xcc]  }
 0x150   : > { %v5544_v25 = vand.u32 %v5539_v21, %v7987_v11  ;;  %v5689_v21 = vshll.u32 %v8909_v13, 16 }
 0x155   : > { %6923 = vmatmul.mubr.msk.bf16.vlgmr.msra.gmra.mrb[0].mxu0 %vm815_vm3, %v7671_v47  ;;  %v2788_v47 = vand.u32 %v2783_v28, %v7987_v11  ;;  %v7699_v28 = vld [vmem:[%s9050_s8 + $0x3c] sm:$0x18]  }
 0x156   : > { %6927 = vmatpush3.bf16.msra.mxu0 %v2644_v52  ;;  %6928 = vmatprep.mubr.msk.bf16.mxu0 %vm7833_vm2, %v7831_v1  ;;  %v5270_v52 = vsel %vm932_vm4, %v5265_v34, %v5269_v35  ;;  %v8849_v34 = vld [vmem:[%s8154_s13 + $0x10] sm:$0xf]  ;;  %v7700_v35 = vld [vmem:[%s9050_s8 + $0x3c] sm:$0x18]  }
 0x157   : > { %6932 = vmatprep.subr.bf16.mxu0 %v7831_v1  ;;  %7139 = vmatmul.mubr.msk.bf16.vlgmr.msra.gmra.mrb[0].mxu1 %vm815_vm3, %v7672_v57  ;;  %v5409_v57 = vshll.u32 %v7690_v44, 16  ;;  %v3062_v44 = vrot.slane %v7699_v28, 3  ;;  %v3206_v28 = vrot.slane %v7711_v17, 2 }
 0x158   : > { %7143 = vmatpush3.bf16.msra.mxu1 %v5202_v30  ;;  %7144 = vmatprep.mubr.msk.bf16.mxu1 %vm7833_vm2, %v7831_v1  ;;  %v6349_v30 = vcombine.low %v2772_v51, %v8693_v33  ;;  %v2778_v33 = vrot.slane %v8717_v53, 1  ;;  %v6354_v53 = vcombine.low %v2833_v59, %v8731_v38  ;;  %v7695_v38 = vld [vmem:[%s9050_s8 + $0x3c] ss:$0 sps:$4 sm:$0x66]   ;;  %v5619_v51 = vrot.slane %v7700_v35, 3 }
 0x159   : > { %7148 = vmatprep.subr.bf16.mxu1 %v7831_v1  ;;  %v5411_v23 = vrot.slane %v5409_v57, 4  ;;  %v2976_v8 = vshrl.u32 %v7695_v38, 16  ;;  %v2979_v9 = vshll.u32 %v7695_v38, 16  ;;  %v3067_v56 = vand.u32 %v3062_v44, %v7987_v11  ;;  %v8873_v57 = vld [vmem:[%s8154_s13 + $0x14] ss:$0 sps:$4 sm:$0x11]  }
 0x15a   : > { %v2777_v63 = vrot.slane %v6349_v30, 1  ;;  %v2839_v58 = vrot.slane %v6354_v53, 1  ;;  %v5624_v41 = vand.u32 %v5619_v51, %v7987_v11  ;;  %v3053_v36 = vshll.u32 %v8873_v57, 16  ;;  %v6571_v38 = vld [vmem:[%s8455_s26 + $0xc] sm:$0xf] }
 0x15b   : > { %v5412_v43 = vor.u32 %v5411_v23, %v5408_v27  ;;  %v2978_v14 = vrot.slane %v2976_v8, 1  ;;  %v2981_v15 = vrot.slane %v2979_v9, 2  ;;  %v8879_v27 = vld [vmem:[%s8417_s4 + $0x14] ss:$0 sps:$4 sm:$0x11]  }
 0x15c   : > { %v2779_v26 = vsel %vm1088_vm5, %v2777_v63, %v2778_v33  ;;  %v2841_v61 = vsel %vm1088_vm5, %v2839_v58, %v2840_v62  ;;  %v3055_v39 = vrot.slane %v3053_v36, 1  ;;  %v3145_v58 = vor.u32 %v3144_v2, %v3140_v40  ;;  %v8903_v8 = vld [vmem:[%s8172_s25 + $0x14] ss:$0 sps:$4 sm:$0x11]  }
 0x15d   : > { %v5417_v20 = vand.u32 %v5412_v43, %v7987_v11  ;;  %v2982_v18 = vor.u32 %v2981_v15, %v2978_v14  ;;  %v6377_v43 = vld [vmem:[%s8172_s25 + $0xc] sm:$0xf]  ;;  %v3132_v16 = vshll.u32 %v8903_v8, 16 }
 0x15f   : > { %v2987_v22 = vand.u32 %v2982_v18, %v7987_v11 }
 0x161   : > { %6929 = vmatmul.mubr.msk.bf16.vlgmr.msra.gmra.mrb[0].mxu0 %vm815_vm3, %v2633_v4  ;;  %v2918_v4 = vand.u32 %v6359_v6, %v7987_v11  ;;  %v8897_v6 = vld [vmem:[%s8455_s26 + $0x10] sm:$0xf] }
 0x162   : > { %6933 = vmatpush3.bf16.msra.mxu0 %v2727_v7  ;;  %6934 = vmatprep.mubr.msk.bf16.mxu0 %vm7833_vm2, %v7831_v1  ;;  %v6553_v7 = vld [vmem:[%s9050_s8 + $0x3c] sm:$0x3] }
 0x163   : > { %6938 = vmatprep.subr.bf16.mxu0 %v7831_v1  ;;  %7145 = vmatmul.mubr.msk.bf16.vlgmr.msra.gmra.mrb[0].mxu1 %vm815_vm3, %v5191_v10  ;;  %v5399_v10 = vsel %vm1088_vm5, %v5397_v0, %v5398_v5 }
 0x164   : > { %7149 = vmatpush3.bf16.msra.mxu1 %v5285_v3  ;;  %7150 = vmatprep.mubr.msk.bf16.mxu1 %vm7833_vm2, %v7831_v1  ;;  %v5475_v3 = vand.u32 %v6553_v7, %v7987_v11  ;;  %v3150_v7 = vand.u32 %v3145_v58, %v7987_v11  ;;  %v6584_v58 = vld [vmem:[%s8455_s26 + $0xc] sm:$0xe] }
 0x165   : > { %7154 = vmatprep.subr.bf16.mxu1 %v7831_v1 }
 0x16d   : > { %6935 = vmatmul.mubr.msk.bf16.vlgmr.msra.gmra.mrb[0].mxu0 %vm815_vm3, %v2712_v46  ;;  %v6373_v46 = vcombine.low %v6368_v29, %v8849_v34  ;;  %v7715_v29 = vld [vmem:[%s9050_s8 + $0x40] sm:$0x18]  }
 0x16e   : > { %6939 = vmatpush3.bf16.msra.mxu0 %v2788_v47  ;;  %6940 = vmatprep.mubr.msk.bf16.mxu0 %vm7833_vm2, %v7831_v1  ;;  %v8861_v47 = vld [vmem:[%s8417_s4 + $0x10] sm:$0xf]  ;;  %v3271_v51 = vshrl.u32 %v7715_v29, 16 }
 0x16f   : > { %6944 = vmatprep.subr.bf16.mxu0 %v7831_v1  ;;  %7151 = vmatmul.mubr.msk.bf16.vlgmr.msra.gmra.mrb[0].mxu1 %vm815_vm3, %v5270_v52  ;;  %v6567_v52 = vcombine.low %v6562_v37, %v8861_v47  ;;  %v3048_v30 = vshll.u32 %v6373_v46, 16  ;;  %v3046_v32 = vshrl.u32 %v6373_v46, 16  ;;  %v5691_v37 = vrot.slane %v5689_v21, 1  ;;  %v7716_v46 = vld [vmem:[%s9050_s8 + $0x40] sm:$0x18]  }
 0x170   : > { %7155 = vmatpush3.bf16.msra.mxu1 %v5346_v54  ;;  %7156 = vmatprep.mubr.msk.bf16.mxu1 %vm7833_vm2, %v7831_v1  ;;  %v7706_v54 = vld [vmem:[%s9050_s8 + $0x40] ss:$0 sps:$4 sm:$0x33]   ;;  %v5828_v31 = vshrl.u32 %v7716_v46, 16 }
 0x171   : > { %7160 = vmatprep.subr.bf16.mxu1 %v7831_v1  ;;  %v5605_v23 = vshll.u32 %v6567_v52, 16  ;;  %v5699_v63 = vshll.u32 %v7706_v54, 16  ;;  %v3050_v33 = vrot.slane %v3048_v30, 1 }
 0x172   : > { %v5830_v36 = vrot.slane %v5828_v31, 3 }
 0x173   : > { %v5607_v59 = vrot.slane %v5605_v23, 1  ;;  %v5701_v53 = vrot.slane %v5699_v63, 1  ;;  %v3051_v42 = vor.u32 %v3050_v33, %v3046_v32  ;;  %v6579_v32 = vld [vmem:[%s8417_s4 + $0xc] sm:$0xe]  ;;  %v3273_v23 = vrot.slane %v3271_v51, 3 }
 0x174   : > { %v6581_v33 = vcombine.low %v6579_v32, %v8861_v47 }
 0x179   : > { %6941 = vmatmul.mubr.msk.bf16.vlgmr.msra.gmra.mrb[0].mxu0 %vm815_vm3, %v2779_v26  ;;  %v8887_v26 = vld [vmem:[%s8172_s25 + $0x10] sm:$0xf] }
 0x17a   : > { %6945 = vmatpush3.bf16.msra.mxu0 %v2859_v50  ;;  %6946 = vmatprep.mubr.msk.bf16.mxu0 %vm7833_vm2, %v7831_v1  ;;  %v5603_v50 = vshrl.u32 %v6567_v52, 16  ;;  %v6381_v62 = vcombine.low %v6377_v43, %v8887_v26  ;;  %v3274_v52 = vshll.u32 %v7715_v29, 16 }
 0x17b   : > { %6950 = vmatprep.subr.bf16.mxu0 %v7831_v1  ;;  %7157 = vmatmul.mubr.msk.bf16.vlgmr.msra.gmra.mrb[0].mxu1 %vm815_vm3, %v5337_v45  ;;  %v5610_v45 = vshll.u32 %v8879_v27, 16 }
 0x17c   : > { %7161 = vmatpush3.bf16.msra.mxu1 %v5417_v20  ;;  %7162 = vmatprep.mubr.msk.bf16.mxu1 %vm7833_vm2, %v7831_v1  ;;  %v5697_v20 = vshrl.u32 %v7706_v54, 16  ;;  %v5608_v0 = vor.u32 %v5607_v59, %v5603_v50  ;;  %v3127_v9 = vshll.u32 %v6381_v62, 16  ;;  %v3125_v14 = vshrl.u32 %v6381_v62, 16  ;;  %v6385_v54 = vld [vmem:[%s8154_s13 + $0xc] sm:$0xe]  ;;  %s7741_s13 = scalar_lea.vmem %s7740_s14, 512 }
 0x17d   : > { %7166 = vmatprep.subr.bf16.mxu1 %v7831_v1  ;;  %v5612_v5 = vrot.slane %v5610_v45, 1  ;;  %v3276_v63 = vrot.slane %v3274_v52, 4  ;;  %v5757_v50 = vrot.slane %v6581_v33, 1  ;;  %v5758_v59 = vrot.slane %v8879_v27, 1  ;;  %p7743_p9 = scmp.lt.s32.totalorder %s7741_s13, %s7735_s23 }
 0x17e   : > { %v5702_v55 = vor.u32 %v5701_v53, %v5697_v20  ;;  %v3129_v15 = vrot.slane %v3127_v9, 1  ;;  %v6587_v27 = vcombine.low %v6584_v58, %v8897_v6 }
 0x17f   : > { %v3277_v43 = vor.u32 %v3276_v63, %v3273_v23  ;;  %v5759_v47 = vsel %vm1088_vm5, %v5757_v50, %v5758_v59  ;;  %p7744_p10 = por %p7743_p9, %p7742_p7 }
 0x181   : > { %v3282_v53 = vand.u32 %v3277_v43, %v7987_v11  ;;  %p7745_p11 = pnand %p7744_p10, %p7738_p6 }
 0x185   : > { %6947 = vmatmul.mubr.msk.bf16.vlgmr.msra.gmra.mrb[0].mxu0 %vm815_vm3, %v2841_v61  ;;  %v6575_v61 = vcombine.low %v6571_v38, %v8897_v6  ;;  %v3263_v38 = vrot.slane %v8903_v8, 1  ;;  %v6397_v6 = vld [vmem:[%s9052_s10] ss:$0 sm:$0xff] }
 0x186   : > { %6951 = vmatpush3.bf16.msra.mxu0 %v2918_v4  ;;  %6952 = vmatprep.mubr.msk.bf16.mxu0 %vm7833_vm2, %v7831_v1  ;;  %v3056_v4 = vsel %vm932_vm4, %v3051_v42, %v3055_v39  ;;  %v6390_v42 = vld [vmem:[%s8172_s25 + $0xc] sm:$0xe] }
 0x187   : > { %6956 = vmatprep.subr.bf16.mxu0 %v7831_v1  ;;  %7163 = vmatmul.mubr.msk.bf16.vlgmr.msra.gmra.mrb[0].mxu1 %vm815_vm3, %v5399_v10  ;;  %v5613_v10 = vsel %vm932_vm4, %v5608_v0, %v5612_v5  ;;  %v5684_v12 = vshll.u32 %v6575_v61, 16  ;;  %v5682_v18 = vshrl.u32 %v6575_v61, 16  ;;  %v5819_v0 = vrot.slane %v6587_v27, 1 }
 0x188   : > { %7167 = vmatpush3.bf16.msra.mxu1 %v5475_v3  ;;  %7168 = vmatprep.mubr.msk.bf16.mxu1 %vm7833_vm2, %v7831_v1  ;;  %v5707_v3 = vand.u32 %v5702_v55, %v7987_v11 }
 0x189   : > { %7172 = vmatprep.subr.bf16.mxu1 %v7831_v1 }
 0x191   : > { %6953 = vmatmul.mubr.msk.bf16.vlgmr.msra.gmra.mrb[0].mxu0 %vm815_vm3, %v7693_v19  ;;  %v5686_v19 = vrot.slane %v5684_v12, 1 }
 0x192   : > { %6957 = vmatpush3.bf16.msra.mxu0 %v2987_v22  ;;  %6958 = vmatprep.mubr.msk.bf16.mxu0 %vm7833_vm2, %v7831_v1  ;;  %v7712_v22 = vld [vmem:[%s9050_s8 + $0x40] ss:$0 sps:$4 sm:$0xcc]  }
 0x193   : > { %6962 = vmatprep.subr.bf16.mxu0 %v7831_v1  ;;  %7169 = vmatmul.mubr.msk.bf16.vlgmr.msra.gmra.mrb[0].mxu1 %vm815_vm3, %v7694_v24  ;;  %v3130_v24 = vor.u32 %v3129_v15, %v3125_v14  ;;  %v5687_v35 = vor.u32 %v5686_v19, %v5682_v18  ;;  %v5763_v44 = vrot.slane %v7712_v22, 2 }
 0x194   : > { %7173 = vmatpush3.bf16.msra.mxu1 %v5544_v25  ;;  %7174 = vmatprep.mubr.msk.bf16.mxu1 %vm7833_vm2, %v7831_v1  ;;  %v3134_v25 = vrot.slane %v3132_v16, 1 }
 0x195   : > { %7178 = vmatprep.subr.bf16.mxu1 %v7831_v1  ;;  %v5768_v30 = vand.u32 %v5763_v44, %v7987_v11 }
 0x196   : > { %v3135_v48 = vsel %vm932_vm4, %v3130_v24, %v3134_v25 }
 0x19d   : > { %6959 = vmatmul.mubr.msk.bf16.vlgmr.msra.gmra.mrb[0].mxu0 %vm815_vm3, %v7697_v49  ;;  %v3211_v49 = vand.u32 %v3206_v28, %v7987_v11 }
 0x19e   : > { %6963 = vmatpush3.bf16.msra.mxu0 %v3067_v56  ;;  %6964 = vmatprep.mubr.msk.bf16.mxu0 %vm7833_vm2, %v7831_v1  ;;  %v5692_v56 = vsel %vm932_vm4, %v5687_v35, %v5691_v37 }
 0x19f   : > { %6968 = vmatprep.subr.bf16.mxu0 %v7831_v1  ;;  %7175 = vmatmul.mubr.msk.bf16.vlgmr.msra.gmra.mrb[0].mxu1 %vm815_vm3, %v7698_v60  ;;  %v5831_v60 = vshll.u32 %v7716_v46, 16 }
 0x1a0   : > { %7179 = vmatpush3.bf16.msra.mxu1 %v5624_v41  ;;  %7180 = vmatprep.mubr.msk.bf16.mxu1 %vm7833_vm2, %v7831_v1  ;;  %v6387_v41 = vcombine.low %v6385_v54, %v8849_v34  ;;  %v3201_v34 = vrot.slane %v8873_v57, 1  ;;  %v6393_v57 = vcombine.low %v6390_v42, %v8887_v26 }
 0x1a1   : > { %7184 = vmatprep.subr.bf16.mxu1 %v7831_v1  ;;  %v5833_v40 = vrot.slane %v5831_v60, 4 }
 0x1a2   : > { %v3200_v2 = vrot.slane %v6387_v41, 1  ;;  %v3262_v62 = vrot.slane %v6393_v57, 1 }
 0x1a3   : > { %v5834_v45 = vor.u32 %v5833_v40, %v5830_v36 }
 0x1a4   : > { %v3202_v20 = vsel %vm1088_vm5, %v3200_v2, %v3201_v34  ;;  %v3264_v5 = vsel %vm1088_vm5, %v3262_v62, %v3263_v38 }
 0x1a5   : > { %v5839_v39 = vand.u32 %v5834_v45, %v7987_v11  ;;  %v5820_v11 = vrot.slane %v8909_v13, 1 }
 0x1a7   : > { %v5821_v26 = vsel %vm1088_vm5, %v5819_v0, %v5820_v11 }
 0x1a9   : > { %6965 = vmatmul.mubr.msk.bf16.vlgmr.msra.gmra.mrb[0].mxu0 %vm815_vm3, %v3056_v4 }
 0x1aa   : > { %6969 = vmatpush3.bf16.msra.mxu0 %v3150_v7  ;;  %6970 = vmatprep.mubr.msk.bf16.mxu0 %vm7833_vm2, %v7831_v1 }
 0x1ab   : > { %6974 = vmatprep.subr.bf16.mxu0 %v7831_v1  ;;  %7181 = vmatmul.mubr.msk.bf16.vlgmr.msra.gmra.mrb[0].mxu1 %vm815_vm3, %v5613_v10 }
 0x1ac   : > { %7185 = vmatpush3.bf16.msra.mxu1 %v5707_v3  ;;  %7186 = vmatprep.mubr.msk.bf16.mxu1 %vm7833_vm2, %v7831_v1 }
 0x1ad   : > { %7190 = vmatprep.subr.bf16.mxu1 %v7831_v1 }
 0x1b5   : > { %6971 = vmatmul.mubr.msk.bf16.vlgmr.msra.gmra.mrb[0].mxu0 %vm815_vm3, %v3135_v48 }
 0x1b6   : > { %6975 = vmatpush3.bf16.msra.mxu0 %v3211_v49  ;;  %6976 = vmatprep.mubr.msk.bf16.mxu0 %vm7833_vm2, %v7831_v1 }
 0x1b7   : > { %6980 = vmatprep.subr.bf16.mxu0 %v7831_v1  ;;  %7187 = vmatmul.mubr.msk.bf16.vlgmr.msra.gmra.mrb[0].mxu1 %vm815_vm3, %v5692_v56 }
 0x1b8   : > { %7191 = vmatpush3.bf16.msra.mxu1 %v5768_v30  ;;  %7192 = vmatprep.mubr.msk.bf16.mxu1 %vm7833_vm2, %v7831_v1 }
 0x1b9   : > { %7196 = vmatprep.subr.bf16.mxu1 %v7831_v1 }
 0x1c1   : > { %6977 = vmatmul.mubr.msk.bf16.vlgmr.msra.gmra.mrb[0].mxu0 %vm815_vm3, %v3202_v20 }
 0x1c2   : > { %6981 = vmatpush3.bf16.msra.mxu0 %v3282_v53  ;;  %6982 = vmatprep.mubr.msk.bf16.mxu0 %vm7833_vm2, %v7831_v1 }
 0x1c3   : > { %7193 = vmatmul.mubr.msk.bf16.vlgmr.msra.gmra.mrb[0].mxu1 %vm815_vm3, %v5759_v47 }
 0x1c4   : > { %7197 = vmatpush3.bf16.msra.mxu1 %v5839_v39  ;;  %7198 = vmatprep.mubr.msk.bf16.mxu1 %vm7833_vm2, %v7831_v1  ;;  %v6396_v1 = vld [vmem:[%s9051_s9] ss:$0 sm:$0xff] }
 0x1cd   : > { %6983 = vmatmul.mubr.msk.bf16.vlgmr.msra.gmra.mrb[0].mxu0 %vm815_vm3, %v3264_v5 }
 0x1cf   : > { %7199 = vmatmul.mubr.msk.bf16.vlgmr.msra.gmra.mrb[0].mxu1 %vm815_vm3, %v5821_v26 }
 0x2a0   : > { %v3318_v55 = vpop.f32.mrb[0].mxu0 }
 0x2a1   : > { %v3333_v61 = vmul.f32 %v6396_v1, %v3318_v55  ;;  %v6984_v4 = vpop.f32.mrb[1].mxu0 }
 0x2a2   : > { %v3321_v7 = vpop.f32.mrb[2].mxu0  ;;  %v5875_v9 = vpop.f32.mrb[0].mxu1 }
 0x2a3   : > { %v3341_v8 = vadd.f32 %v6397_v6, %v3333_v61  ;;  %v3334_v10 = vmul.f32 %v6396_v1, %v3321_v7  ;;  %v6985_v3 = vpop.f32.mrb[3].mxu0  ;;  %v5884_v13 = vmul.f32 %v6396_v1, %v5875_v9  ;;  %v7200_v12 = vpop.f32.mrb[1].mxu1 }
 0x2a4   : > { %v5878_v16 = vpop.f32.mrb[2].mxu1 }
 0x2a5   : > { %v3343_v14 = vsub.f32 0.0, %v3341_v8  ;;  %v3342_v15 = vadd.f32 %v6397_v6, %v3334_v10  ;;  %v5886_v17 = vadd.f32 %v6397_v6, %v5884_v13  ;;  %v5885_v18 = vmul.f32 %v6396_v1, %v5878_v16  ;;  %v7201_v19 = vpop.f32.mrb[3].mxu1 }
 0x2a7   : > { %v3345_v21 = vmul.f32 1.442695, %v3343_v14  ;;  %v3344_v22 = vsub.f32 0.0, %v3342_v15  ;;  %v5888_v24 = vsub.f32 0.0, %v5886_v17  ;;  %v5887_v25 = vadd.f32 %v6397_v6, %v5885_v18 }
 0x2a9   : > { %7719 = vpow2.f32 %v3345_v21  ;;  %v3347_v28 = vmul.f32 1.442695, %v3344_v22  ;;  %v5890_v29 = vmul.f32 1.442695, %v5888_v24  ;;  %v5889_v35 = vsub.f32 0.0, %v5887_v25 }
 0x2ab   : > { %7721 = vpow2.f32 %v3347_v28  ;;  %v5892_v37 = vmul.f32 1.442695, %v5889_v35 }
 0x2ac   : > { %7723 = vpow2.f32 %v5890_v29 }
 0x2ad   : > { %7725 = vpow2.f32 %v5892_v37 }
 0x2b3   : > { %v7720_v44 = vpop.eup %7719 }
 0x2b4   : > { %v3349_v46 = vadd.f32 1.0, %v7720_v44 }
 0x2b5   : > { %v7722_v48 = vpop.eup %7721 }
 0x2b6   : > { %v7724_v49 = vpop.eup %7723  ;;  %7727 = vrcp.f32 %v3349_v46  ;;  %v3350_v51 = vadd.f32 1.0, %v7722_v48 }
 0x2b7   : > { %v5894_v52 = vadd.f32 1.0, %v7724_v49  ;;  %v7726_v54 = vpop.eup %7725 }
 0x2b8   : > { %7729 = vrcp.f32 %v3350_v51  ;;  %v5895_v56 = vadd.f32 1.0, %v7726_v54 }
 0x2b9   : > { %7731 = vrcp.f32 %v5894_v52 }
 0x2ba   : > { %7733 = vrcp.f32 %v5895_v56 }
 0x2c0   : > { %v7728_v30 = vpop.eup %7727 }
 0x2c1   : > { %v3353_v31 = vmul.f32 %v7728_v30, %v3341_v8 }
 0x2c2   : > { %v7730_v60 = vpop.eup %7729 }
 0x2c3   : > { %v7732_v41 = vpop.eup %7731  ;;  %v6615_v32 = vpack.c.bf16 %v3353_v31, %v3353_v31  ;;  %v3354_v23 = vmul.f32 %v7730_v60, %v3342_v15 }
 0x2c4   : > { %v5898_v63 = vmul.f32 %v7732_v41, %v5886_v17  ;;  %v7734_v33 = vpop.eup %7733 }
 0x2c5   : > { %3364 = vst.msk [vmem:[%s672_s22] sm:$0xf] %vm3363_vm6, %v6615_v32  ;;  %v6616_v36 = vpack.c.bf16 %v3354_v23, %v3354_v23  ;;  %v5899_v2 = vmul.f32 %v7734_v33, %v5887_v25 }
 0x2c6   : > { %v6617_v40 = vpack.c.bf16 %v5898_v63, %v5898_v63 }
 0x2c7   : > { %3365 = vst.msk [vmem:[%s672_s22 + $0x4] sm:$0xf] %vm3363_vm6, %v6616_v36  ;;  %v6618_v34 = vpack.c.bf16 %v5899_v2, %v5899_v2 }
 0x2c8   : > { %6592 = vst.msk [vmem:[%s672_s22 + $0x8] sm:$0xf] %vm3363_vm6, %v6617_v40 }
 0x2c9   : > { %6593 = vst.msk [vmem:[%s672_s22 + $0xc] sm:$0xf] %vm3363_vm6, %v6618_v34 }
 0x2ca   : > { %7748 = shalt.err (!%p7745_p11)
}
 0x2cb   : > { %s7749_s25 = scalar_lea.hbm %s8984_s28, 256  ;;  %s7753_s12 = scalar_lea.hbm %s9053_s11, 4096 }
 0x2cc   : > { %p7750_p12 = scmp.ne.s32.totalorder %s8984_s28, %s7749_s25  ;;  %p7754_p1 = scmp.lt.u32.totalorder %s8984_s28, %s9053_s11 }
 0x2cd   : > { %p7755_p2 = scmp.lt.u32.totalorder %s7753_s12, %s7749_s25  ;;  %p7757_p5 = scmp.lt.u32.totalorder %s7749_s25, %s8984_s28 }
 0x2ce   : > { %p7751_p13 = pnand %p7750_p12, %p7948_p3 }
 0x2cf   : > { %p7756_p4 = por %p7755_p2, %p7754_p1 }
 0x2d0   : > { %p7752_p0 = pneg %p7751_p13 }
 0x2d1   : > { %p7758_p6 = por %p7757_p5, %p7756_p4 }
 0x2d3   : > { %p7759_p7 = pnand %p7758_p6, %p7752_p0 }
 0x2d5   : > { %7762 = shalt.err (!%p7759_p7)
}
 0x2d6   : > { %s7835_s1 = smov 64   ;;  %s7836_s20 = smov 4  }
 0x2d7   : > { %7487 = dma.vmem_to_hbm [thread:$0]  (%p7948_p3), %s8986_s19, 256, %s8984_s28, %s8990_s15, %s7835_s1, %s7835_s1, %s7836_s20  }
 0x2d8 PF: > { %p7493_p9 = scmp.ge.s32.totalorder %s7829_s24, 2  ;;  %s5943_s21 = sand.u32 1, %s7801_s17  }
 0x2d9   : > { %s5944_s27 = scalar_lea.sflag [#allocation3], %s5943_s21 }
 0x2da   : > { %p7490_p10 = pnand %p7493_p9, %p7957_p8 }
 0x2dc   : > { %7796 = dma.done.wait (!%p7490_p10), %s5944_s27, 256  }
 0x2dd   : > { %7798 = vsyncadd (!%p7490_p10), %s5944_s27, 4294967040  ;;  %s24_s24 = sadd.s32 1, %s7829_s24   ;;  %s9076_s23 = sld [smem:[#allocation5_spill]] }
 0x2de   : > { %p21_p11 = scmp.ge.s32.totalorder %s24_s24, 18   ;;  %s9077_s19 = sld [smem:[#allocation11_spill]] }
 0x2df   : > { %s9078_s20 = sld [smem:[#allocation6_spill]]  ;;  %s9079_s21 = sld [smem:[#allocation7_spill]] }
 0x2e0   : > { %s9080_s22 = sld [smem:[#allocation8_spill]]  ;;  %s9081_s30 = sld [smem:[#allocation9_spill]] }
 0x2e1   : > { %s9082_s17 = smov %s7805_s18  ;;  %23 = sbr.rel (!%p21_p11) target bundleno = 9 (0x9), region = 134 }
 0x2e3   : > { %s9083_s18 = smov %s9076_s23 }
 0x2e6   : > { %s9084_s23 = smov %s9081_s30 }
 0x2e8   :  { %5949 = vsyncpa [#allocation3], 1 }
 0x2e9   :  { %5951 = vsyncpa [#allocation3 + $0x1], 1 }

</bundles_post_ra>
